<compile_context>
chip_gen: v7x
topology: tpu7x:2x2x1
jax: 0.10.0
libtpu: 0.0.40
codegen_flags: <defaults>
</compile_context>

<pallas_src>
import functools
import math

import jax
import jax.numpy as jnp
from jax.experimental import pallas as pl
from jax.experimental.pallas import tpu as pltpu

# ----------------------------- model configuration (small, lane-dense) ----------------
CNN_HIDDEN = 128            # input feature dim of the transformer (CNN encoder output)
ATT_HIDDEN = 128            # attention block output dim
ATT_HEADS = 4
HEAD_DIM = ATT_HIDDEN       # DI-engine Attention(cnn_hidden, att_hidden, att_hidden, heads, drop)
MAX_T = 16                  # sequence length
N_ATT = 2
FEEDFORWARD_HIDDEN = 128
N_FEEDFORWARD = 2
BATCH = 2
LN_EPS = 1e-5               # PyTorch nn.LayerNorm default


# ----------------------------- the fused Pallas kernel --------------------------------
def _pc_transformer_kernel(*refs, n_att, n_ff, heads, head_dim, eps):
    """refs = (x, [qkv_w, qkv_b, proj_w, proj_b, ln_g, ln_b] * n_att,
                  [w, b, ln_g, ln_b] * n_ff, out)."""
    x_ref, out_ref = refs[0], refs[-1]
    b, t, d_in = x_ref.shape

    # Causal mask built in-kernel (True where attention is allowed) -- no DMA'd mask.
    row = jax.lax.broadcasted_iota(jnp.int32, (1, t, t), 1)
    col = jax.lax.broadcasted_iota(jnp.int32, (1, t, t), 2)
    allowed = col <= row                                      # (1, T, T) bool

    scale = 1.0 / math.sqrt(head_dim)

    def layer_norm(z, g_ref, b_ref):
        mean = jnp.mean(z, axis=-1, keepdims=True)
        var = jnp.mean(jnp.square(z - mean), axis=-1, keepdims=True)
        return (z - mean) * jax.lax.rsqrt(var + eps) * g_ref[...] + b_ref[...]

    h = x_ref[...].reshape(b * t, d_in)                       # (B*T, D)

    # ----- attention blocks: x = LayerNorm(att_drop(Attention(x, mask))) -----
    for i in range(n_att):
        qkv_w, qkv_b, proj_w, proj_b, ln_g, ln_b = refs[1 + 6 * i: 1 + 6 * (i + 1)]
        qkv = jnp.dot(h, qkv_w[...], preferred_element_type=jnp.float32) + qkv_b[...]
        # qkv layout (last dim): [Q heads | K heads | V heads], each head `head_dim` wide.
        head_outs = []
        for hi in range(heads):
            q = qkv[:, hi * head_dim:(hi + 1) * head_dim].reshape(b, t, head_dim)
            k = qkv[:, (heads + hi) * head_dim:
                       (heads + hi + 1) * head_dim].reshape(b, t, head_dim)
            v = qkv[:, (2 * heads + hi) * head_dim:
                       (2 * heads + hi + 1) * head_dim].reshape(b, t, head_dim)
            s = jnp.einsum("bqd,bkd->bqk", q, k,
                           preferred_element_type=jnp.float32) * scale
            s = jnp.where(allowed, s, -1e9)                   # masked_fill_(~mask, -1e9)
            s = s - jnp.max(s, axis=-1, keepdims=True)
            p = jnp.exp(s)
            p = p / jnp.sum(p, axis=-1, keepdims=True)        # softmax (dropout = id)
            o = jnp.einsum("bqk,bkd->bqd", p, v,
                           preferred_element_type=jnp.float32)
            head_outs.append(o.reshape(b * t, head_dim))
        att = jnp.concatenate(head_outs, axis=-1)             # (B*T, heads*head_dim)
        h = jnp.dot(att, proj_w[...], preferred_element_type=jnp.float32) + proj_b[...]
        h = layer_norm(h, ln_g, ln_b)

    # ----- feed-forward blocks: x = LayerNorm(ReLU(Linear(x))) -----
    base = 1 + 6 * n_att
    for j in range(n_ff):
        w_ref, b_ref, ln_g, ln_b = refs[base + 4 * j: base + 4 * (j + 1)]
        h = jnp.dot(h, w_ref[...], preferred_element_type=jnp.float32) + b_ref[...]
        h = jnp.maximum(h, 0.0)
        h = layer_norm(h, ln_g, ln_b)

    out_ref[...] = h.reshape(out_ref.shape).astype(out_ref.dtype)


# ----------------------------- wrapper -------------------------------------------------
def _flatten_params(params):
    flat = []
    for lp in params["att"]:
        flat += [lp["qkv_w"], lp["qkv_b"], lp["proj_w"], lp["proj_b"], lp["ln_g"], lp["ln_b"]]
    for lp in params["ff"]:
        flat += [lp["w"], lp["b"], lp["ln_g"], lp["ln_b"]]
    return flat


@jax.jit
def pc_transformer_forward(x, params):
    b, t, _ = x.shape
    flat = _flatten_params(params)
    out_dim = FEEDFORWARD_HIDDEN if N_FEEDFORWARD > 0 else ATT_HIDDEN
    kernel = functools.partial(
        _pc_transformer_kernel,
        n_att=N_ATT, n_ff=N_FEEDFORWARD, heads=ATT_HEADS, head_dim=HEAD_DIM, eps=LN_EPS)
    vmem = pl.BlockSpec(memory_space=pltpu.MemorySpace.VMEM)  # whole array, VMEM-resident
    return pl.pallas_call(
        kernel,
        out_shape=jax.ShapeDtypeStruct((b, t, out_dim), jnp.float32),
        in_specs=[vmem] * (1 + len(flat)),
        out_specs=vmem,
    )(x, *flat)


# ----------------------------- plain-JAX reference (for correctness check) -------------
def pc_transformer_reference(x, params):
    hp = jax.lax.Precision.HIGHEST
    b, t, _ = x.shape
    mask = jnp.tril(jnp.ones((t, t), dtype=bool))

    def ln(z, g, be):
        mean = z.mean(-1, keepdims=True)
        var = jnp.square(z - mean).mean(-1, keepdims=True)
        return (z - mean) / jnp.sqrt(var + LN_EPS) * g[0] + be[0]

    def split_heads(z):
        return z.reshape(b, t, ATT_HEADS, HEAD_DIM).transpose(0, 2, 1, 3)

    h = x
    for lp in params["att"]:
        qkv = jnp.einsum("btd,de->bte", h, lp["qkv_w"], precision=hp) + lp["qkv_b"][0]
        q, k, v = jnp.split(qkv, 3, axis=-1)
        q, k, v = split_heads(q), split_heads(k), split_heads(v)
        s = jnp.einsum("bhqd,bhkd->bhqk", q, k, precision=hp) / math.sqrt(HEAD_DIM)
        s = jnp.where(mask[None, None], s, -1e9)
        p = jax.nn.softmax(s, axis=-1)
        o = jnp.einsum("bhqk,bhkd->bhqd", p, v, precision=hp)
        o = o.transpose(0, 2, 1, 3).reshape(b, t, ATT_HEADS * HEAD_DIM)
        h = jnp.einsum("btd,de->bte", o, lp["proj_w"], precision=hp) + lp["proj_b"][0]
        h = ln(h, lp["ln_g"], lp["ln_b"])
    for lp in params["ff"]:
        h = jax.nn.relu(jnp.einsum("btd,de->bte", h, lp["w"], precision=hp) + lp["b"][0])
        h = ln(h, lp["ln_g"], lp["ln_b"])
    return h


# ----------------------------- deterministic parameter init ----------------------------
def init_params(key):
    keys = iter(jax.random.split(key, 2 * N_ATT + N_FEEDFORWARD + 2))

    def w(shape):
        return 0.02 * jax.random.normal(next(keys), shape, jnp.float32)

    def row(n, value=0.0):
        return jnp.full((1, n), value, jnp.float32)

    att = []
    in_dim = CNN_HIDDEN
    for _ in range(N_ATT):
        att.append({
            "qkv_w": w((in_dim, 3 * ATT_HEADS * HEAD_DIM)),
            "qkv_b": row(3 * ATT_HEADS * HEAD_DIM),
            "proj_w": w((ATT_HEADS * HEAD_DIM, ATT_HIDDEN)),
            "proj_b": row(ATT_HIDDEN),
            # nn.LayerNorm(att_hidden): weight=1, bias=0.  (The reference shares ONE
            # LayerNorm instance across all n_att norms; identical values either way.)
            "ln_g": row(ATT_HIDDEN, 1.0),
            "ln_b": row(ATT_HIDDEN),
        })
        in_dim = ATT_HIDDEN

    ff = []
    in_dim = ATT_HIDDEN
    for _ in range(N_FEEDFORWARD):
        ff.append({
            "w": w((in_dim, FEEDFORWARD_HIDDEN)),
            "b": row(FEEDFORWARD_HIDDEN),
            "ln_g": row(FEEDFORWARD_HIDDEN, 1.0),
            "ln_b": row(FEEDFORWARD_HIDDEN),
        })
        in_dim = FEEDFORWARD_HIDDEN

    return {"att": att, "ff": ff}


if __name__ == "__main__":
    key = jax.random.PRNGKey(0)
    k_param, k_x = jax.random.split(key)

    params = init_params(k_param)
    x = jax.random.normal(k_x, (BATCH, MAX_T, CNN_HIDDEN), jnp.float32)

    out = pc_transformer_forward(x, params)
    jax.block_until_ready(out)

    assert out.shape == (BATCH, MAX_T, FEEDFORWARD_HIDDEN), out.shape
    assert bool(jnp.all(jnp.isfinite(out)))

    ref = pc_transformer_reference(x, params)
    max_err = float(jnp.max(jnp.abs(out - ref)))
    assert max_err < 2e-3, f"max abs error vs pure-JAX reference = {max_err}"

    print("KERNEL_OK")
</pallas_src>

<mosaic_0001>
module attributes {stable_mosaic.version = 11 : i64} {
  func.func @_pc_transformer_kernel(%arg0: memref<2x16x128xf32, #tpu.memory_space<vmem>>, %arg1: memref<128x1536xf32, #tpu.memory_space<vmem>>, %arg2: memref<1x1536xf32, #tpu.memory_space<vmem>>, %arg3: memref<512x128xf32, #tpu.memory_space<vmem>>, %arg4: memref<1x128xf32, #tpu.memory_space<vmem>>, %arg5: memref<1x128xf32, #tpu.memory_space<vmem>>, %arg6: memref<1x128xf32, #tpu.memory_space<vmem>>, %arg7: memref<128x1536xf32, #tpu.memory_space<vmem>>, %arg8: memref<1x1536xf32, #tpu.memory_space<vmem>>, %arg9: memref<512x128xf32, #tpu.memory_space<vmem>>, %arg10: memref<1x128xf32, #tpu.memory_space<vmem>>, %arg11: memref<1x128xf32, #tpu.memory_space<vmem>>, %arg12: memref<1x128xf32, #tpu.memory_space<vmem>>, %arg13: memref<128x128xf32, #tpu.memory_space<vmem>>, %arg14: memref<1x128xf32, #tpu.memory_space<vmem>>, %arg15: memref<1x128xf32, #tpu.memory_space<vmem>>, %arg16: memref<1x128xf32, #tpu.memory_space<vmem>>, %arg17: memref<128x128xf32, #tpu.memory_space<vmem>>, %arg18: memref<1x128xf32, #tpu.memory_space<vmem>>, %arg19: memref<1x128xf32, #tpu.memory_space<vmem>>, %arg20: memref<1x128xf32, #tpu.memory_space<vmem>>, %arg21: memref<2x16x128xf32, #tpu.memory_space<vmem>>) attributes {dimension_semantics = [], scalar_prefetch = 0 : i64, scratch_operands = 0 : i64, tpu.core_type = #tpu.core_type<tc>} {
    %0 = tpu.iota {dimensions = array<i32: 1>} : vector<1x16x16xi32>
    %1 = tpu.iota {dimensions = array<i32: 2>} : vector<1x16x16xi32>
    %2 = arith.cmpi sle, %1, %0 : vector<1x16x16xi32>
    %c0 = arith.constant 0 : index
    %c0_0 = arith.constant 0 : index
    %c0_1 = arith.constant 0 : index
    %3 = vector.load %arg0[%c0, %c0_0, %c0_1] : memref<2x16x128xf32, #tpu.memory_space<vmem>>, vector<2x16x128xf32>
    %4 = vector.shape_cast %3 : vector<2x16x128xf32> to vector<32x128xf32>
    %c0_2 = arith.constant 0 : index
    %c0_3 = arith.constant 0 : index
    %5 = vector.load %arg1[%c0_2, %c0_3] : memref<128x1536xf32, #tpu.memory_space<vmem>>, vector<128x1536xf32>
    %cst = arith.constant dense<0.000000e+00> : vector<32x1536xf32>
    %6 = tpu.matmul %4, %5, %cst {dimension_numbers = #tpu.dot_dimension_numbers<[1], [0], [0], [1], [0, 0, 1, 1], [], []>} : vector<32x128xf32>, vector<128x1536xf32>, vector<32x1536xf32> -> vector<32x1536xf32>
    %c0_4 = arith.constant 0 : index
    %c0_5 = arith.constant 0 : index
    %7 = vector.load %arg2[%c0_4, %c0_5] : memref<1x1536xf32, #tpu.memory_space<vmem>>, vector<1x1536xf32>
    %8 = vector.broadcast %7 : vector<1x1536xf32> to vector<32x1536xf32>
    %9 = arith.addf %6, %8 : vector<32x1536xf32>
    %10 = vector.extract_strided_slice %9 {offsets = [0, 0], sizes = [32, 128], strides = [1, 1]} : vector<32x1536xf32> to vector<32x128xf32>
    %11 = vector.shape_cast %10 : vector<32x128xf32> to vector<2x16x128xf32>
    %12 = vector.extract_strided_slice %9 {offsets = [0, 512], sizes = [32, 128], strides = [1, 1]} : vector<32x1536xf32> to vector<32x128xf32>
    %13 = vector.shape_cast %12 : vector<32x128xf32> to vector<2x16x128xf32>
    %14 = vector.extract_strided_slice %9 {offsets = [0, 1024], sizes = [32, 128], strides = [1, 1]} : vector<32x1536xf32> to vector<32x128xf32>
    %15 = vector.shape_cast %14 : vector<32x128xf32> to vector<2x16x128xf32>
    "tpu.trace_start"() <{level = 10 : i32, message = "bqd,bkd->bqk"}> : () -> ()
    %cst_6 = arith.constant dense<0.000000e+00> : vector<2x16x16xf32>
    %16 = tpu.matmul %11, %13, %cst_6 {dimension_numbers = #tpu.dot_dimension_numbers<[2], [2], [1], [1], [0, 0, 0, 1, 1, 1], [0], [0]>} : vector<2x16x128xf32>, vector<2x16x128xf32>, vector<2x16x16xf32> -> vector<2x16x16xf32>
    "tpu.trace_stop"() : () -> ()
    %cst_7 = arith.constant 0.0883883461 : f32
    %17 = vector.broadcast %cst_7 : f32 to vector<2x16x16xf32>
    %18 = arith.mulf %16, %17 : vector<2x16x16xf32>
    %cst_8 = arith.constant -1.000000e+09 : f32
    %19 = vector.shape_cast %2 : vector<1x16x16xi1> to vector<1x16x16xi1>
    %20 = vector.broadcast %19 : vector<1x16x16xi1> to vector<2x16x16xi1>
    %21 = vector.broadcast %cst_8 : f32 to vector<2x16x16xf32>
    %22 = arith.select %20, %18, %21 : vector<2x16x16xi1>, vector<2x16x16xf32>
    %cst_9 = arith.constant dense<0xFF800000> : vector<2x16xf32>
    %23 = vector.multi_reduction <maximumf>, %22, %cst_9 [2] : vector<2x16x16xf32> to vector<2x16xf32>
    %24 = vector.shape_cast %23 : vector<2x16xf32> to vector<2x16x1xf32>
    %25 = vector.broadcast %24 : vector<2x16x1xf32> to vector<2x16x16xf32>
    %26 = arith.subf %22, %25 : vector<2x16x16xf32>
    %27 = math.exp %26 : vector<2x16x16xf32>
    %cst_10 = arith.constant dense<0.000000e+00> : vector<2x16xf32>
    %28 = vector.multi_reduction <add>, %27, %cst_10 [2] : vector<2x16x16xf32> to vector<2x16xf32>
    %29 = vector.shape_cast %28 : vector<2x16xf32> to vector<2x16x1xf32>
    %30 = vector.broadcast %29 : vector<2x16x1xf32> to vector<2x16x16xf32>
    %31 = arith.divf %27, %30 : vector<2x16x16xf32>
    "tpu.trace_start"() <{level = 10 : i32, message = "bqk,bkd->bqd"}> : () -> ()
    %cst_11 = arith.constant dense<0.000000e+00> : vector<2x16x128xf32>
    %32 = tpu.matmul %31, %15, %cst_11 {dimension_numbers = #tpu.dot_dimension_numbers<[2], [1], [1], [2], [0, 0, 0, 1, 1, 2], [0], [0]>} : vector<2x16x16xf32>, vector<2x16x128xf32>, vector<2x16x128xf32> -> vector<2x16x128xf32>
    "tpu.trace_stop"() : () -> ()
    %33 = vector.shape_cast %32 : vector<2x16x128xf32> to vector<32x128xf32>
    %34 = vector.extract_strided_slice %9 {offsets = [0, 128], sizes = [32, 128], strides = [1, 1]} : vector<32x1536xf32> to vector<32x128xf32>
    %35 = vector.shape_cast %34 : vector<32x128xf32> to vector<2x16x128xf32>
    %36 = vector.extract_strided_slice %9 {offsets = [0, 640], sizes = [32, 128], strides = [1, 1]} : vector<32x1536xf32> to vector<32x128xf32>
    %37 = vector.shape_cast %36 : vector<32x128xf32> to vector<2x16x128xf32>
    %38 = vector.extract_strided_slice %9 {offsets = [0, 1152], sizes = [32, 128], strides = [1, 1]} : vector<32x1536xf32> to vector<32x128xf32>
    %39 = vector.shape_cast %38 : vector<32x128xf32> to vector<2x16x128xf32>
    "tpu.trace_start"() <{level = 10 : i32, message = "bqd,bkd->bqk"}> : () -> ()
    %cst_12 = arith.constant dense<0.000000e+00> : vector<2x16x16xf32>
    %40 = tpu.matmul %35, %37, %cst_12 {dimension_numbers = #tpu.dot_dimension_numbers<[2], [2], [1], [1], [0, 0, 0, 1, 1, 1], [0], [0]>} : vector<2x16x128xf32>, vector<2x16x128xf32>, vector<2x16x16xf32> -> vector<2x16x16xf32>
    "tpu.trace_stop"() : () -> ()
    %cst_13 = arith.constant 0.0883883461 : f32
    %41 = vector.broadcast %cst_13 : f32 to vector<2x16x16xf32>
    %42 = arith.mulf %40, %41 : vector<2x16x16xf32>
    %cst_14 = arith.constant -1.000000e+09 : f32
    %43 = vector.shape_cast %2 : vector<1x16x16xi1> to vector<1x16x16xi1>
    %44 = vector.broadcast %43 : vector<1x16x16xi1> to vector<2x16x16xi1>
    %45 = vector.broadcast %cst_14 : f32 to vector<2x16x16xf32>
    %46 = arith.select %44, %42, %45 : vector<2x16x16xi1>, vector<2x16x16xf32>
    %cst_15 = arith.constant dense<0xFF800000> : vector<2x16xf32>
    %47 = vector.multi_reduction <maximumf>, %46, %cst_15 [2] : vector<2x16x16xf32> to vector<2x16xf32>
    %48 = vector.shape_cast %47 : vector<2x16xf32> to vector<2x16x1xf32>
    %49 = vector.broadcast %48 : vector<2x16x1xf32> to vector<2x16x16xf32>
    %50 = arith.subf %46, %49 : vector<2x16x16xf32>
    %51 = math.exp %50 : vector<2x16x16xf32>
    %cst_16 = arith.constant dense<0.000000e+00> : vector<2x16xf32>
    %52 = vector.multi_reduction <add>, %51, %cst_16 [2] : vector<2x16x16xf32> to vector<2x16xf32>
    %53 = vector.shape_cast %52 : vector<2x16xf32> to vector<2x16x1xf32>
    %54 = vector.broadcast %53 : vector<2x16x1xf32> to vector<2x16x16xf32>
    %55 = arith.divf %51, %54 : vector<2x16x16xf32>
    "tpu.trace_start"() <{level = 10 : i32, message = "bqk,bkd->bqd"}> : () -> ()
    %cst_17 = arith.constant dense<0.000000e+00> : vector<2x16x128xf32>
    %56 = tpu.matmul %55, %39, %cst_17 {dimension_numbers = #tpu.dot_dimension_numbers<[2], [1], [1], [2], [0, 0, 0, 1, 1, 2], [0], [0]>} : vector<2x16x16xf32>, vector<2x16x128xf32>, vector<2x16x128xf32> -> vector<2x16x128xf32>
    "tpu.trace_stop"() : () -> ()
    %57 = vector.shape_cast %56 : vector<2x16x128xf32> to vector<32x128xf32>
    %58 = vector.extract_strided_slice %9 {offsets = [0, 256], sizes = [32, 128], strides = [1, 1]} : vector<32x1536xf32> to vector<32x128xf32>
    %59 = vector.shape_cast %58 : vector<32x128xf32> to vector<2x16x128xf32>
    %60 = vector.extract_strided_slice %9 {offsets = [0, 768], sizes = [32, 128], strides = [1, 1]} : vector<32x1536xf32> to vector<32x128xf32>
    %61 = vector.shape_cast %60 : vector<32x128xf32> to vector<2x16x128xf32>
    %62 = vector.extract_strided_slice %9 {offsets = [0, 1280], sizes = [32, 128], strides = [1, 1]} : vector<32x1536xf32> to vector<32x128xf32>
    %63 = vector.shape_cast %62 : vector<32x128xf32> to vector<2x16x128xf32>
    "tpu.trace_start"() <{level = 10 : i32, message = "bqd,bkd->bqk"}> : () -> ()
    %cst_18 = arith.constant dense<0.000000e+00> : vector<2x16x16xf32>
    %64 = tpu.matmul %59, %61, %cst_18 {dimension_numbers = #tpu.dot_dimension_numbers<[2], [2], [1], [1], [0, 0, 0, 1, 1, 1], [0], [0]>} : vector<2x16x128xf32>, vector<2x16x128xf32>, vector<2x16x16xf32> -> vector<2x16x16xf32>
    "tpu.trace_stop"() : () -> ()
    %cst_19 = arith.constant 0.0883883461 : f32
    %65 = vector.broadcast %cst_19 : f32 to vector<2x16x16xf32>
    %66 = arith.mulf %64, %65 : vector<2x16x16xf32>
    %cst_20 = arith.constant -1.000000e+09 : f32
    %67 = vector.shape_cast %2 : vector<1x16x16xi1> to vector<1x16x16xi1>
    %68 = vector.broadcast %67 : vector<1x16x16xi1> to vector<2x16x16xi1>
    %69 = vector.broadcast %cst_20 : f32 to vector<2x16x16xf32>
    %70 = arith.select %68, %66, %69 : vector<2x16x16xi1>, vector<2x16x16xf32>
    %cst_21 = arith.constant dense<0xFF800000> : vector<2x16xf32>
    %71 = vector.multi_reduction <maximumf>, %70, %cst_21 [2] : vector<2x16x16xf32> to vector<2x16xf32>
    %72 = vector.shape_cast %71 : vector<2x16xf32> to vector<2x16x1xf32>
    %73 = vector.broadcast %72 : vector<2x16x1xf32> to vector<2x16x16xf32>
    %74 = arith.subf %70, %73 : vector<2x16x16xf32>
    %75 = math.exp %74 : vector<2x16x16xf32>
    %cst_22 = arith.constant dense<0.000000e+00> : vector<2x16xf32>
    %76 = vector.multi_reduction <add>, %75, %cst_22 [2] : vector<2x16x16xf32> to vector<2x16xf32>
    %77 = vector.shape_cast %76 : vector<2x16xf32> to vector<2x16x1xf32>
    %78 = vector.broadcast %77 : vector<2x16x1xf32> to vector<2x16x16xf32>
    %79 = arith.divf %75, %78 : vector<2x16x16xf32>
    "tpu.trace_start"() <{level = 10 : i32, message = "bqk,bkd->bqd"}> : () -> ()
    %cst_23 = arith.constant dense<0.000000e+00> : vector<2x16x128xf32>
    %80 = tpu.matmul %79, %63, %cst_23 {dimension_numbers = #tpu.dot_dimension_numbers<[2], [1], [1], [2], [0, 0, 0, 1, 1, 2], [0], [0]>} : vector<2x16x16xf32>, vector<2x16x128xf32>, vector<2x16x128xf32> -> vector<2x16x128xf32>
    "tpu.trace_stop"() : () -> ()
    %81 = vector.shape_cast %80 : vector<2x16x128xf32> to vector<32x128xf32>
    %82 = vector.extract_strided_slice %9 {offsets = [0, 384], sizes = [32, 128], strides = [1, 1]} : vector<32x1536xf32> to vector<32x128xf32>
    %83 = vector.shape_cast %82 : vector<32x128xf32> to vector<2x16x128xf32>
    %84 = vector.extract_strided_slice %9 {offsets = [0, 896], sizes = [32, 128], strides = [1, 1]} : vector<32x1536xf32> to vector<32x128xf32>
    %85 = vector.shape_cast %84 : vector<32x128xf32> to vector<2x16x128xf32>
    %86 = vector.extract_strided_slice %9 {offsets = [0, 1408], sizes = [32, 128], strides = [1, 1]} : vector<32x1536xf32> to vector<32x128xf32>
    %87 = vector.shape_cast %86 : vector<32x128xf32> to vector<2x16x128xf32>
    "tpu.trace_start"() <{level = 10 : i32, message = "bqd,bkd->bqk"}> : () -> ()
    %cst_24 = arith.constant dense<0.000000e+00> : vector<2x16x16xf32>
    %88 = tpu.matmul %83, %85, %cst_24 {dimension_numbers = #tpu.dot_dimension_numbers<[2], [2], [1], [1], [0, 0, 0, 1, 1, 1], [0], [0]>} : vector<2x16x128xf32>, vector<2x16x128xf32>, vector<2x16x16xf32> -> vector<2x16x16xf32>
    "tpu.trace_stop"() : () -> ()
    %cst_25 = arith.constant 0.0883883461 : f32
    %89 = vector.broadcast %cst_25 : f32 to vector<2x16x16xf32>
    %90 = arith.mulf %88, %89 : vector<2x16x16xf32>
    %cst_26 = arith.constant -1.000000e+09 : f32
    %91 = vector.shape_cast %2 : vector<1x16x16xi1> to vector<1x16x16xi1>
    %92 = vector.broadcast %91 : vector<1x16x16xi1> to vector<2x16x16xi1>
    %93 = vector.broadcast %cst_26 : f32 to vector<2x16x16xf32>
    %94 = arith.select %92, %90, %93 : vector<2x16x16xi1>, vector<2x16x16xf32>
    %cst_27 = arith.constant dense<0xFF800000> : vector<2x16xf32>
    %95 = vector.multi_reduction <maximumf>, %94, %cst_27 [2] : vector<2x16x16xf32> to vector<2x16xf32>
    %96 = vector.shape_cast %95 : vector<2x16xf32> to vector<2x16x1xf32>
    %97 = vector.broadcast %96 : vector<2x16x1xf32> to vector<2x16x16xf32>
    %98 = arith.subf %94, %97 : vector<2x16x16xf32>
    %99 = math.exp %98 : vector<2x16x16xf32>
    %cst_28 = arith.constant dense<0.000000e+00> : vector<2x16xf32>
    %100 = vector.multi_reduction <add>, %99, %cst_28 [2] : vector<2x16x16xf32> to vector<2x16xf32>
    %101 = vector.shape_cast %100 : vector<2x16xf32> to vector<2x16x1xf32>
    %102 = vector.broadcast %101 : vector<2x16x1xf32> to vector<2x16x16xf32>
    %103 = arith.divf %99, %102 : vector<2x16x16xf32>
    "tpu.trace_start"() <{level = 10 : i32, message = "bqk,bkd->bqd"}> : () -> ()
    %cst_29 = arith.constant dense<0.000000e+00> : vector<2x16x128xf32>
    %104 = tpu.matmul %103, %87, %cst_29 {dimension_numbers = #tpu.dot_dimension_numbers<[2], [1], [1], [2], [0, 0, 0, 1, 1, 2], [0], [0]>} : vector<2x16x16xf32>, vector<2x16x128xf32>, vector<2x16x128xf32> -> vector<2x16x128xf32>
    "tpu.trace_stop"() : () -> ()
    %105 = vector.shape_cast %104 : vector<2x16x128xf32> to vector<32x128xf32>
    %106 = tpu.concatenate %33, %57, %81, %105 in 1 : vector<32x128xf32>, vector<32x128xf32>, vector<32x128xf32>, vector<32x128xf32> -> vector<32x512xf32>
    %c0_30 = arith.constant 0 : index
    %c0_31 = arith.constant 0 : index
    %107 = vector.load %arg3[%c0_30, %c0_31] : memref<512x128xf32, #tpu.memory_space<vmem>>, vector<512x128xf32>
    %cst_32 = arith.constant dense<0.000000e+00> : vector<32x128xf32>
    %108 = tpu.matmul %106, %107, %cst_32 {dimension_numbers = #tpu.dot_dimension_numbers<[1], [0], [0], [1], [0, 0, 1, 1], [], []>} : vector<32x512xf32>, vector<512x128xf32>, vector<32x128xf32> -> vector<32x128xf32>
    %c0_33 = arith.constant 0 : index
    %c0_34 = arith.constant 0 : index
    %109 = vector.load %arg4[%c0_33, %c0_34] : memref<1x128xf32, #tpu.memory_space<vmem>>, vector<1x128xf32>
    %110 = vector.broadcast %109 : vector<1x128xf32> to vector<32x128xf32>
    %111 = arith.addf %108, %110 : vector<32x128xf32>
    %cst_35 = arith.constant dense<0.000000e+00> : vector<32xf32>
    %112 = vector.multi_reduction <add>, %111, %cst_35 [1] : vector<32x128xf32> to vector<32xf32>
    %113 = vector.shape_cast %112 : vector<32xf32> to vector<32x1xf32>
    %cst_36 = arith.constant 1.280000e+02 : f32
    %114 = vector.broadcast %cst_36 : f32 to vector<32x1xf32>
    %115 = arith.divf %113, %114 : vector<32x1xf32>
    %116 = vector.broadcast %115 : vector<32x1xf32> to vector<32x128xf32>
    %117 = arith.subf %111, %116 : vector<32x128xf32>
    %118 = arith.mulf %117, %117 : vector<32x128xf32>
    %cst_37 = arith.constant dense<0.000000e+00> : vector<32xf32>
    %119 = vector.multi_reduction <add>, %118, %cst_37 [1] : vector<32x128xf32> to vector<32xf32>
    %120 = vector.shape_cast %119 : vector<32xf32> to vector<32x1xf32>
    %cst_38 = arith.constant 1.280000e+02 : f32
    %121 = vector.broadcast %cst_38 : f32 to vector<32x1xf32>
    %122 = arith.divf %120, %121 : vector<32x1xf32>
    %123 = vector.broadcast %115 : vector<32x1xf32> to vector<32x128xf32>
    %124 = arith.subf %111, %123 : vector<32x128xf32>
    %cst_39 = arith.constant 9.99999974E-6 : f32
    %125 = vector.broadcast %cst_39 : f32 to vector<32x1xf32>
    %126 = arith.addf %122, %125 : vector<32x1xf32>
    %127 = math.rsqrt %126 : vector<32x1xf32>
    %128 = vector.broadcast %127 : vector<32x1xf32> to vector<32x128xf32>
    %129 = arith.mulf %124, %128 : vector<32x128xf32>
    %c0_40 = arith.constant 0 : index
    %c0_41 = arith.constant 0 : index
    %130 = vector.load %arg5[%c0_40, %c0_41] : memref<1x128xf32, #tpu.memory_space<vmem>>, vector<1x128xf32>
    %131 = vector.broadcast %130 : vector<1x128xf32> to vector<32x128xf32>
    %132 = arith.mulf %129, %131 : vector<32x128xf32>
    %c0_42 = arith.constant 0 : index
    %c0_43 = arith.constant 0 : index
    %133 = vector.load %arg6[%c0_42, %c0_43] : memref<1x128xf32, #tpu.memory_space<vmem>>, vector<1x128xf32>
    %134 = vector.broadcast %133 : vector<1x128xf32> to vector<32x128xf32>
    %135 = arith.addf %132, %134 : vector<32x128xf32>
    %c0_44 = arith.constant 0 : index
    %c0_45 = arith.constant 0 : index
    %136 = vector.load %arg7[%c0_44, %c0_45] : memref<128x1536xf32, #tpu.memory_space<vmem>>, vector<128x1536xf32>
    %cst_46 = arith.constant dense<0.000000e+00> : vector<32x1536xf32>
    %137 = tpu.matmul %135, %136, %cst_46 {dimension_numbers = #tpu.dot_dimension_numbers<[1], [0], [0], [1], [0, 0, 1, 1], [], []>} : vector<32x128xf32>, vector<128x1536xf32>, vector<32x1536xf32> -> vector<32x1536xf32>
    %c0_47 = arith.constant 0 : index
    %c0_48 = arith.constant 0 : index
    %138 = vector.load %arg8[%c0_47, %c0_48] : memref<1x1536xf32, #tpu.memory_space<vmem>>, vector<1x1536xf32>
    %139 = vector.broadcast %138 : vector<1x1536xf32> to vector<32x1536xf32>
    %140 = arith.addf %137, %139 : vector<32x1536xf32>
    %141 = vector.extract_strided_slice %140 {offsets = [0, 0], sizes = [32, 128], strides = [1, 1]} : vector<32x1536xf32> to vector<32x128xf32>
    %142 = vector.shape_cast %141 : vector<32x128xf32> to vector<2x16x128xf32>
    %143 = vector.extract_strided_slice %140 {offsets = [0, 512], sizes = [32, 128], strides = [1, 1]} : vector<32x1536xf32> to vector<32x128xf32>
    %144 = vector.shape_cast %143 : vector<32x128xf32> to vector<2x16x128xf32>
    %145 = vector.extract_strided_slice %140 {offsets = [0, 1024], sizes = [32, 128], strides = [1, 1]} : vector<32x1536xf32> to vector<32x128xf32>
    %146 = vector.shape_cast %145 : vector<32x128xf32> to vector<2x16x128xf32>
    "tpu.trace_start"() <{level = 10 : i32, message = "bqd,bkd->bqk"}> : () -> ()
    %cst_49 = arith.constant dense<0.000000e+00> : vector<2x16x16xf32>
    %147 = tpu.matmul %142, %144, %cst_49 {dimension_numbers = #tpu.dot_dimension_numbers<[2], [2], [1], [1], [0, 0, 0, 1, 1, 1], [0], [0]>} : vector<2x16x128xf32>, vector<2x16x128xf32>, vector<2x16x16xf32> -> vector<2x16x16xf32>
    "tpu.trace_stop"() : () -> ()
    %cst_50 = arith.constant 0.0883883461 : f32
    %148 = vector.broadcast %cst_50 : f32 to vector<2x16x16xf32>
    %149 = arith.mulf %147, %148 : vector<2x16x16xf32>
    %cst_51 = arith.constant -1.000000e+09 : f32
    %150 = vector.shape_cast %2 : vector<1x16x16xi1> to vector<1x16x16xi1>
    %151 = vector.broadcast %150 : vector<1x16x16xi1> to vector<2x16x16xi1>
    %152 = vector.broadcast %cst_51 : f32 to vector<2x16x16xf32>
    %153 = arith.select %151, %149, %152 : vector<2x16x16xi1>, vector<2x16x16xf32>
    %cst_52 = arith.constant dense<0xFF800000> : vector<2x16xf32>
    %154 = vector.multi_reduction <maximumf>, %153, %cst_52 [2] : vector<2x16x16xf32> to vector<2x16xf32>
    %155 = vector.shape_cast %154 : vector<2x16xf32> to vector<2x16x1xf32>
    %156 = vector.broadcast %155 : vector<2x16x1xf32> to vector<2x16x16xf32>
    %157 = arith.subf %153, %156 : vector<2x16x16xf32>
    %158 = math.exp %157 : vector<2x16x16xf32>
    %cst_53 = arith.constant dense<0.000000e+00> : vector<2x16xf32>
    %159 = vector.multi_reduction <add>, %158, %cst_53 [2] : vector<2x16x16xf32> to vector<2x16xf32>
    %160 = vector.shape_cast %159 : vector<2x16xf32> to vector<2x16x1xf32>
    %161 = vector.broadcast %160 : vector<2x16x1xf32> to vector<2x16x16xf32>
    %162 = arith.divf %158, %161 : vector<2x16x16xf32>
    "tpu.trace_start"() <{level = 10 : i32, message = "bqk,bkd->bqd"}> : () -> ()
    %cst_54 = arith.constant dense<0.000000e+00> : vector<2x16x128xf32>
    %163 = tpu.matmul %162, %146, %cst_54 {dimension_numbers = #tpu.dot_dimension_numbers<[2], [1], [1], [2], [0, 0, 0, 1, 1, 2], [0], [0]>} : vector<2x16x16xf32>, vector<2x16x128xf32>, vector<2x16x128xf32> -> vector<2x16x128xf32>
    "tpu.trace_stop"() : () -> ()
    %164 = vector.shape_cast %163 : vector<2x16x128xf32> to vector<32x128xf32>
    %165 = vector.extract_strided_slice %140 {offsets = [0, 128], sizes = [32, 128], strides = [1, 1]} : vector<32x1536xf32> to vector<32x128xf32>
    %166 = vector.shape_cast %165 : vector<32x128xf32> to vector<2x16x128xf32>
    %167 = vector.extract_strided_slice %140 {offsets = [0, 640], sizes = [32, 128], strides = [1, 1]} : vector<32x1536xf32> to vector<32x128xf32>
    %168 = vector.shape_cast %167 : vector<32x128xf32> to vector<2x16x128xf32>
    %169 = vector.extract_strided_slice %140 {offsets = [0, 1152], sizes = [32, 128], strides = [1, 1]} : vector<32x1536xf32> to vector<32x128xf32>
    %170 = vector.shape_cast %169 : vector<32x128xf32> to vector<2x16x128xf32>
    "tpu.trace_start"() <{level = 10 : i32, message = "bqd,bkd->bqk"}> : () -> ()
    %cst_55 = arith.constant dense<0.000000e+00> : vector<2x16x16xf32>
    %171 = tpu.matmul %166, %168, %cst_55 {dimension_numbers = #tpu.dot_dimension_numbers<[2], [2], [1], [1], [0, 0, 0, 1, 1, 1], [0], [0]>} : vector<2x16x128xf32>, vector<2x16x128xf32>, vector<2x16x16xf32> -> vector<2x16x16xf32>
    "tpu.trace_stop"() : () -> ()
    %cst_56 = arith.constant 0.0883883461 : f32
    %172 = vector.broadcast %cst_56 : f32 to vector<2x16x16xf32>
    %173 = arith.mulf %171, %172 : vector<2x16x16xf32>
    %cst_57 = arith.constant -1.000000e+09 : f32
    %174 = vector.shape_cast %2 : vector<1x16x16xi1> to vector<1x16x16xi1>
    %175 = vector.broadcast %174 : vector<1x16x16xi1> to vector<2x16x16xi1>
    %176 = vector.broadcast %cst_57 : f32 to vector<2x16x16xf32>
    %177 = arith.select %175, %173, %176 : vector<2x16x16xi1>, vector<2x16x16xf32>
    %cst_58 = arith.constant dense<0xFF800000> : vector<2x16xf32>
    %178 = vector.multi_reduction <maximumf>, %177, %cst_58 [2] : vector<2x16x16xf32> to vector<2x16xf32>
    %179 = vector.shape_cast %178 : vector<2x16xf32> to vector<2x16x1xf32>
    %180 = vector.broadcast %179 : vector<2x16x1xf32> to vector<2x16x16xf32>
    %181 = arith.subf %177, %180 : vector<2x16x16xf32>
    %182 = math.exp %181 : vector<2x16x16xf32>
    %cst_59 = arith.constant dense<0.000000e+00> : vector<2x16xf32>
    %183 = vector.multi_reduction <add>, %182, %cst_59 [2] : vector<2x16x16xf32> to vector<2x16xf32>
    %184 = vector.shape_cast %183 : vector<2x16xf32> to vector<2x16x1xf32>
    %185 = vector.broadcast %184 : vector<2x16x1xf32> to vector<2x16x16xf32>
    %186 = arith.divf %182, %185 : vector<2x16x16xf32>
    "tpu.trace_start"() <{level = 10 : i32, message = "bqk,bkd->bqd"}> : () -> ()
    %cst_60 = arith.constant dense<0.000000e+00> : vector<2x16x128xf32>
    %187 = tpu.matmul %186, %170, %cst_60 {dimension_numbers = #tpu.dot_dimension_numbers<[2], [1], [1], [2], [0, 0, 0, 1, 1, 2], [0], [0]>} : vector<2x16x16xf32>, vector<2x16x128xf32>, vector<2x16x128xf32> -> vector<2x16x128xf32>
    "tpu.trace_stop"() : () -> ()
    %188 = vector.shape_cast %187 : vector<2x16x128xf32> to vector<32x128xf32>
    %189 = vector.extract_strided_slice %140 {offsets = [0, 256], sizes = [32, 128], strides = [1, 1]} : vector<32x1536xf32> to vector<32x128xf32>
    %190 = vector.shape_cast %189 : vector<32x128xf32> to vector<2x16x128xf32>
    %191 = vector.extract_strided_slice %140 {offsets = [0, 768], sizes = [32, 128], strides = [1, 1]} : vector<32x1536xf32> to vector<32x128xf32>
    %192 = vector.shape_cast %191 : vector<32x128xf32> to vector<2x16x128xf32>
    %193 = vector.extract_strided_slice %140 {offsets = [0, 1280], sizes = [32, 128], strides = [1, 1]} : vector<32x1536xf32> to vector<32x128xf32>
    %194 = vector.shape_cast %193 : vector<32x128xf32> to vector<2x16x128xf32>
    "tpu.trace_start"() <{level = 10 : i32, message = "bqd,bkd->bqk"}> : () -> ()
    %cst_61 = arith.constant dense<0.000000e+00> : vector<2x16x16xf32>
    %195 = tpu.matmul %190, %192, %cst_61 {dimension_numbers = #tpu.dot_dimension_numbers<[2], [2], [1], [1], [0, 0, 0, 1, 1, 1], [0], [0]>} : vector<2x16x128xf32>, vector<2x16x128xf32>, vector<2x16x16xf32> -> vector<2x16x16xf32>
    "tpu.trace_stop"() : () -> ()
    %cst_62 = arith.constant 0.0883883461 : f32
    %196 = vector.broadcast %cst_62 : f32 to vector<2x16x16xf32>
    %197 = arith.mulf %195, %196 : vector<2x16x16xf32>
    %cst_63 = arith.constant -1.000000e+09 : f32
    %198 = vector.shape_cast %2 : vector<1x16x16xi1> to vector<1x16x16xi1>
    %199 = vector.broadcast %198 : vector<1x16x16xi1> to vector<2x16x16xi1>
    %200 = vector.broadcast %cst_63 : f32 to vector<2x16x16xf32>
    %201 = arith.select %199, %197, %200 : vector<2x16x16xi1>, vector<2x16x16xf32>
    %cst_64 = arith.constant dense<0xFF800000> : vector<2x16xf32>
    %202 = vector.multi_reduction <maximumf>, %201, %cst_64 [2] : vector<2x16x16xf32> to vector<2x16xf32>
    %203 = vector.shape_cast %202 : vector<2x16xf32> to vector<2x16x1xf32>
    %204 = vector.broadcast %203 : vector<2x16x1xf32> to vector<2x16x16xf32>
    %205 = arith.subf %201, %204 : vector<2x16x16xf32>
    %206 = math.exp %205 : vector<2x16x16xf32>
    %cst_65 = arith.constant dense<0.000000e+00> : vector<2x16xf32>
    %207 = vector.multi_reduction <add>, %206, %cst_65 [2] : vector<2x16x16xf32> to vector<2x16xf32>
    %208 = vector.shape_cast %207 : vector<2x16xf32> to vector<2x16x1xf32>
    %209 = vector.broadcast %208 : vector<2x16x1xf32> to vector<2x16x16xf32>
    %210 = arith.divf %206, %209 : vector<2x16x16xf32>
    "tpu.trace_start"() <{level = 10 : i32, message = "bqk,bkd->bqd"}> : () -> ()
    %cst_66 = arith.constant dense<0.000000e+00> : vector<2x16x128xf32>
    %211 = tpu.matmul %210, %194, %cst_66 {dimension_numbers = #tpu.dot_dimension_numbers<[2], [1], [1], [2], [0, 0, 0, 1, 1, 2], [0], [0]>} : vector<2x16x16xf32>, vector<2x16x128xf32>, vector<2x16x128xf32> -> vector<2x16x128xf32>
    "tpu.trace_stop"() : () -> ()
    %212 = vector.shape_cast %211 : vector<2x16x128xf32> to vector<32x128xf32>
    %213 = vector.extract_strided_slice %140 {offsets = [0, 384], sizes = [32, 128], strides = [1, 1]} : vector<32x1536xf32> to vector<32x128xf32>
    %214 = vector.shape_cast %213 : vector<32x128xf32> to vector<2x16x128xf32>
    %215 = vector.extract_strided_slice %140 {offsets = [0, 896], sizes = [32, 128], strides = [1, 1]} : vector<32x1536xf32> to vector<32x128xf32>
    %216 = vector.shape_cast %215 : vector<32x128xf32> to vector<2x16x128xf32>
    %217 = vector.extract_strided_slice %140 {offsets = [0, 1408], sizes = [32, 128], strides = [1, 1]} : vector<32x1536xf32> to vector<32x128xf32>
    %218 = vector.shape_cast %217 : vector<32x128xf32> to vector<2x16x128xf32>
    "tpu.trace_start"() <{level = 10 : i32, message = "bqd,bkd->bqk"}> : () -> ()
    %cst_67 = arith.constant dense<0.000000e+00> : vector<2x16x16xf32>
    %219 = tpu.matmul %214, %216, %cst_67 {dimension_numbers = #tpu.dot_dimension_numbers<[2], [2], [1], [1], [0, 0, 0, 1, 1, 1], [0], [0]>} : vector<2x16x128xf32>, vector<2x16x128xf32>, vector<2x16x16xf32> -> vector<2x16x16xf32>
    "tpu.trace_stop"() : () -> ()
    %cst_68 = arith.constant 0.0883883461 : f32
    %220 = vector.broadcast %cst_68 : f32 to vector<2x16x16xf32>
    %221 = arith.mulf %219, %220 : vector<2x16x16xf32>
    %cst_69 = arith.constant -1.000000e+09 : f32
    %222 = vector.shape_cast %2 : vector<1x16x16xi1> to vector<1x16x16xi1>
    %223 = vector.broadcast %222 : vector<1x16x16xi1> to vector<2x16x16xi1>
    %224 = vector.broadcast %cst_69 : f32 to vector<2x16x16xf32>
    %225 = arith.select %223, %221, %224 : vector<2x16x16xi1>, vector<2x16x16xf32>
    %cst_70 = arith.constant dense<0xFF800000> : vector<2x16xf32>
    %226 = vector.multi_reduction <maximumf>, %225, %cst_70 [2] : vector<2x16x16xf32> to vector<2x16xf32>
    %227 = vector.shape_cast %226 : vector<2x16xf32> to vector<2x16x1xf32>
    %228 = vector.broadcast %227 : vector<2x16x1xf32> to vector<2x16x16xf32>
    %229 = arith.subf %225, %228 : vector<2x16x16xf32>
    %230 = math.exp %229 : vector<2x16x16xf32>
    %cst_71 = arith.constant dense<0.000000e+00> : vector<2x16xf32>
    %231 = vector.multi_reduction <add>, %230, %cst_71 [2] : vector<2x16x16xf32> to vector<2x16xf32>
    %232 = vector.shape_cast %231 : vector<2x16xf32> to vector<2x16x1xf32>
    %233 = vector.broadcast %232 : vector<2x16x1xf32> to vector<2x16x16xf32>
    %234 = arith.divf %230, %233 : vector<2x16x16xf32>
    "tpu.trace_start"() <{level = 10 : i32, message = "bqk,bkd->bqd"}> : () -> ()
    %cst_72 = arith.constant dense<0.000000e+00> : vector<2x16x128xf32>
    %235 = tpu.matmul %234, %218, %cst_72 {dimension_numbers = #tpu.dot_dimension_numbers<[2], [1], [1], [2], [0, 0, 0, 1, 1, 2], [0], [0]>} : vector<2x16x16xf32>, vector<2x16x128xf32>, vector<2x16x128xf32> -> vector<2x16x128xf32>
    "tpu.trace_stop"() : () -> ()
    %236 = vector.shape_cast %235 : vector<2x16x128xf32> to vector<32x128xf32>
    %237 = tpu.concatenate %164, %188, %212, %236 in 1 : vector<32x128xf32>, vector<32x128xf32>, vector<32x128xf32>, vector<32x128xf32> -> vector<32x512xf32>
    %c0_73 = arith.constant 0 : index
    %c0_74 = arith.constant 0 : index
    %238 = vector.load %arg9[%c0_73, %c0_74] : memref<512x128xf32, #tpu.memory_space<vmem>>, vector<512x128xf32>
    %cst_75 = arith.constant dense<0.000000e+00> : vector<32x128xf32>
    %239 = tpu.matmul %237, %238, %cst_75 {dimension_numbers = #tpu.dot_dimension_numbers<[1], [0], [0], [1], [0, 0, 1, 1], [], []>} : vector<32x512xf32>, vector<512x128xf32>, vector<32x128xf32> -> vector<32x128xf32>
    %c0_76 = arith.constant 0 : index
    %c0_77 = arith.constant 0 : index
    %240 = vector.load %arg10[%c0_76, %c0_77] : memref<1x128xf32, #tpu.memory_space<vmem>>, vector<1x128xf32>
    %241 = vector.broadcast %240 : vector<1x128xf32> to vector<32x128xf32>
    %242 = arith.addf %239, %241 : vector<32x128xf32>
    %cst_78 = arith.constant dense<0.000000e+00> : vector<32xf32>
    %243 = vector.multi_reduction <add>, %242, %cst_78 [1] : vector<32x128xf32> to vector<32xf32>
    %244 = vector.shape_cast %243 : vector<32xf32> to vector<32x1xf32>
    %cst_79 = arith.constant 1.280000e+02 : f32
    %245 = vector.broadcast %cst_79 : f32 to vector<32x1xf32>
    %246 = arith.divf %244, %245 : vector<32x1xf32>
    %247 = vector.broadcast %246 : vector<32x1xf32> to vector<32x128xf32>
    %248 = arith.subf %242, %247 : vector<32x128xf32>
    %249 = arith.mulf %248, %248 : vector<32x128xf32>
    %cst_80 = arith.constant dense<0.000000e+00> : vector<32xf32>
    %250 = vector.multi_reduction <add>, %249, %cst_80 [1] : vector<32x128xf32> to vector<32xf32>
    %251 = vector.shape_cast %250 : vector<32xf32> to vector<32x1xf32>
    %cst_81 = arith.constant 1.280000e+02 : f32
    %252 = vector.broadcast %cst_81 : f32 to vector<32x1xf32>
    %253 = arith.divf %251, %252 : vector<32x1xf32>
    %254 = vector.broadcast %246 : vector<32x1xf32> to vector<32x128xf32>
    %255 = arith.subf %242, %254 : vector<32x128xf32>
    %cst_82 = arith.constant 9.99999974E-6 : f32
    %256 = vector.broadcast %cst_82 : f32 to vector<32x1xf32>
    %257 = arith.addf %253, %256 : vector<32x1xf32>
    %258 = math.rsqrt %257 : vector<32x1xf32>
    %259 = vector.broadcast %258 : vector<32x1xf32> to vector<32x128xf32>
    %260 = arith.mulf %255, %259 : vector<32x128xf32>
    %c0_83 = arith.constant 0 : index
    %c0_84 = arith.constant 0 : index
    %261 = vector.load %arg11[%c0_83, %c0_84] : memref<1x128xf32, #tpu.memory_space<vmem>>, vector<1x128xf32>
    %262 = vector.broadcast %261 : vector<1x128xf32> to vector<32x128xf32>
    %263 = arith.mulf %260, %262 : vector<32x128xf32>
    %c0_85 = arith.constant 0 : index
    %c0_86 = arith.constant 0 : index
    %264 = vector.load %arg12[%c0_85, %c0_86] : memref<1x128xf32, #tpu.memory_space<vmem>>, vector<1x128xf32>
    %265 = vector.broadcast %264 : vector<1x128xf32> to vector<32x128xf32>
    %266 = arith.addf %263, %265 : vector<32x128xf32>
    %c0_87 = arith.constant 0 : index
    %c0_88 = arith.constant 0 : index
    %267 = vector.load %arg13[%c0_87, %c0_88] : memref<128x128xf32, #tpu.memory_space<vmem>>, vector<128x128xf32>
    %cst_89 = arith.constant dense<0.000000e+00> : vector<32x128xf32>
    %268 = tpu.matmul %266, %267, %cst_89 {dimension_numbers = #tpu.dot_dimension_numbers<[1], [0], [0], [1], [0, 0, 1, 1], [], []>} : vector<32x128xf32>, vector<128x128xf32>, vector<32x128xf32> -> vector<32x128xf32>
    %c0_90 = arith.constant 0 : index
    %c0_91 = arith.constant 0 : index
    %269 = vector.load %arg14[%c0_90, %c0_91] : memref<1x128xf32, #tpu.memory_space<vmem>>, vector<1x128xf32>
    %270 = vector.broadcast %269 : vector<1x128xf32> to vector<32x128xf32>
    %271 = arith.addf %268, %270 : vector<32x128xf32>
    %cst_92 = arith.constant 0.000000e+00 : f32
    %272 = vector.broadcast %cst_92 : f32 to vector<32x128xf32>
    %273 = arith.maximumf %271, %272 : vector<32x128xf32>
    %cst_93 = arith.constant dense<0.000000e+00> : vector<32xf32>
    %274 = vector.multi_reduction <add>, %273, %cst_93 [1] : vector<32x128xf32> to vector<32xf32>
    %275 = vector.shape_cast %274 : vector<32xf32> to vector<32x1xf32>
    %cst_94 = arith.constant 1.280000e+02 : f32
    %276 = vector.broadcast %cst_94 : f32 to vector<32x1xf32>
    %277 = arith.divf %275, %276 : vector<32x1xf32>
    %278 = vector.broadcast %277 : vector<32x1xf32> to vector<32x128xf32>
    %279 = arith.subf %273, %278 : vector<32x128xf32>
    %280 = arith.mulf %279, %279 : vector<32x128xf32>
    %cst_95 = arith.constant dense<0.000000e+00> : vector<32xf32>
    %281 = vector.multi_reduction <add>, %280, %cst_95 [1] : vector<32x128xf32> to vector<32xf32>
    %282 = vector.shape_cast %281 : vector<32xf32> to vector<32x1xf32>
    %cst_96 = arith.constant 1.280000e+02 : f32
    %283 = vector.broadcast %cst_96 : f32 to vector<32x1xf32>
    %284 = arith.divf %282, %283 : vector<32x1xf32>
    %285 = vector.broadcast %277 : vector<32x1xf32> to vector<32x128xf32>
    %286 = arith.subf %273, %285 : vector<32x128xf32>
    %cst_97 = arith.constant 9.99999974E-6 : f32
    %287 = vector.broadcast %cst_97 : f32 to vector<32x1xf32>
    %288 = arith.addf %284, %287 : vector<32x1xf32>
    %289 = math.rsqrt %288 : vector<32x1xf32>
    %290 = vector.broadcast %289 : vector<32x1xf32> to vector<32x128xf32>
    %291 = arith.mulf %286, %290 : vector<32x128xf32>
    %c0_98 = arith.constant 0 : index
    %c0_99 = arith.constant 0 : index
    %292 = vector.load %arg15[%c0_98, %c0_99] : memref<1x128xf32, #tpu.memory_space<vmem>>, vector<1x128xf32>
    %293 = vector.broadcast %292 : vector<1x128xf32> to vector<32x128xf32>
    %294 = arith.mulf %291, %293 : vector<32x128xf32>
    %c0_100 = arith.constant 0 : index
    %c0_101 = arith.constant 0 : index
    %295 = vector.load %arg16[%c0_100, %c0_101] : memref<1x128xf32, #tpu.memory_space<vmem>>, vector<1x128xf32>
    %296 = vector.broadcast %295 : vector<1x128xf32> to vector<32x128xf32>
    %297 = arith.addf %294, %296 : vector<32x128xf32>
    %c0_102 = arith.constant 0 : index
    %c0_103 = arith.constant 0 : index
    %298 = vector.load %arg17[%c0_102, %c0_103] : memref<128x128xf32, #tpu.memory_space<vmem>>, vector<128x128xf32>
    %cst_104 = arith.constant dense<0.000000e+00> : vector<32x128xf32>
    %299 = tpu.matmul %297, %298, %cst_104 {dimension_numbers = #tpu.dot_dimension_numbers<[1], [0], [0], [1], [0, 0, 1, 1], [], []>} : vector<32x128xf32>, vector<128x128xf32>, vector<32x128xf32> -> vector<32x128xf32>
    %c0_105 = arith.constant 0 : index
    %c0_106 = arith.constant 0 : index
    %300 = vector.load %arg18[%c0_105, %c0_106] : memref<1x128xf32, #tpu.memory_space<vmem>>, vector<1x128xf32>
    %301 = vector.broadcast %300 : vector<1x128xf32> to vector<32x128xf32>
    %302 = arith.addf %299, %301 : vector<32x128xf32>
    %cst_107 = arith.constant 0.000000e+00 : f32
    %303 = vector.broadcast %cst_107 : f32 to vector<32x128xf32>
    %304 = arith.maximumf %302, %303 : vector<32x128xf32>
    %cst_108 = arith.constant dense<0.000000e+00> : vector<32xf32>
    %305 = vector.multi_reduction <add>, %304, %cst_108 [1] : vector<32x128xf32> to vector<32xf32>
    %306 = vector.shape_cast %305 : vector<32xf32> to vector<32x1xf32>
    %cst_109 = arith.constant 1.280000e+02 : f32
    %307 = vector.broadcast %cst_109 : f32 to vector<32x1xf32>
    %308 = arith.divf %306, %307 : vector<32x1xf32>
    %309 = vector.broadcast %308 : vector<32x1xf32> to vector<32x128xf32>
    %310 = arith.subf %304, %309 : vector<32x128xf32>
    %311 = arith.mulf %310, %310 : vector<32x128xf32>
    %cst_110 = arith.constant dense<0.000000e+00> : vector<32xf32>
    %312 = vector.multi_reduction <add>, %311, %cst_110 [1] : vector<32x128xf32> to vector<32xf32>
    %313 = vector.shape_cast %312 : vector<32xf32> to vector<32x1xf32>
    %cst_111 = arith.constant 1.280000e+02 : f32
    %314 = vector.broadcast %cst_111 : f32 to vector<32x1xf32>
    %315 = arith.divf %313, %314 : vector<32x1xf32>
    %316 = vector.broadcast %308 : vector<32x1xf32> to vector<32x128xf32>
    %317 = arith.subf %304, %316 : vector<32x128xf32>
    %cst_112 = arith.constant 9.99999974E-6 : f32
    %318 = vector.broadcast %cst_112 : f32 to vector<32x1xf32>
    %319 = arith.addf %315, %318 : vector<32x1xf32>
    %320 = math.rsqrt %319 : vector<32x1xf32>
    %321 = vector.broadcast %320 : vector<32x1xf32> to vector<32x128xf32>
    %322 = arith.mulf %317, %321 : vector<32x128xf32>
    %c0_113 = arith.constant 0 : index
    %c0_114 = arith.constant 0 : index
    %323 = vector.load %arg19[%c0_113, %c0_114] : memref<1x128xf32, #tpu.memory_space<vmem>>, vector<1x128xf32>
    %324 = vector.broadcast %323 : vector<1x128xf32> to vector<32x128xf32>
    %325 = arith.mulf %322, %324 : vector<32x128xf32>
    %c0_115 = arith.constant 0 : index
    %c0_116 = arith.constant 0 : index
    %326 = vector.load %arg20[%c0_115, %c0_116] : memref<1x128xf32, #tpu.memory_space<vmem>>, vector<1x128xf32>
    %327 = vector.broadcast %326 : vector<1x128xf32> to vector<32x128xf32>
    %328 = arith.addf %325, %327 : vector<32x128xf32>
    %329 = vector.shape_cast %328 : vector<32x128xf32> to vector<2x16x128xf32>
    %c0_117 = arith.constant 0 : index
    %c0_118 = arith.constant 0 : index
    %c0_119 = arith.constant 0 : index
    %330 = vector.load %arg21[%c0_117, %c0_118, %c0_119] : memref<2x16x128xf32, #tpu.memory_space<vmem>>, vector<2x16x128xf32>
    tpu.vector_store %arg21[%c0_117, %c0_118, %c0_119], %329 {strides = array<i32>} : memref<2x16x128xf32, #tpu.memory_space<vmem>>, vector<2x16x128xf32>,
    return
  }
}

</mosaic_0001>

<bundles_post_ra>
// kernel: pc_transformer_forward.1
= control target key start
LH: loop header
LB: loop body
LE: loop exit
PB: predicated region body
PF: predicated region fallthrough
CT: control target
= control target key end

     0   :  { %s8483_s0 = inlined_call_operand.hbm [shape: f32[2,16,128], index: 0, kind: input, shape index: {}]   ;;  %s8484_s1 = inlined_call_operand.hbm [shape: f32[128,1536], index: 1, kind: input, shape index: {}]   ;;  %s8485_s2 = inlined_call_operand.vmem [shape: f32[1,1536], index: 2, kind: input, shape index: {}]   ;;  %s8486_s3 = inlined_call_operand.hbm [shape: f32[512,128], index: 3, kind: input, shape index: {}]   ;;  %s8487_s4 = inlined_call_operand.vmem [shape: f32[1,128], index: 4, kind: input, shape index: {}]   ;;  %s8488_s5 = inlined_call_operand.vmem [shape: f32[1,128], index: 5, kind: input, shape index: {}]   ;;  %s8489_s6 = inlined_call_operand.hbm [shape: f32[1,128], index: 6, kind: input, shape index: {}]   ;;  %s8490_s7 = inlined_call_operand.hbm [shape: f32[128,1536], index: 7, kind: input, shape index: {}]   ;;  %s8491_s8 = inlined_call_operand.vmem [shape: f32[1,1536], index: 8, kind: input, shape index: {}]   ;;  %s8492_s9 = inlined_call_operand.hbm [shape: f32[512,128], index: 9, kind: input, shape index: {}]   ;;  %s8493_s10 = inlined_call_operand.vmem [shape: f32[1,128], index: 10, kind: input, shape index: {}]   ;;  %s8494_s11 = inlined_call_operand.vmem [shape: f32[1,128], index: 11, kind: input, shape index: {}]   ;;  %s8495_s12 = inlined_call_operand.hbm [shape: f32[1,128], index: 12, kind: input, shape index: {}]   ;;  %s8496_s13 = inlined_call_operand.hbm [shape: f32[128,128], index: 13, kind: input, shape index: {}]   ;;  %s8497_s14 = inlined_call_operand.vmem [shape: f32[1,128], index: 14, kind: input, shape index: {}]   ;;  %s8498_s15 = inlined_call_operand.vmem [shape: f32[1,128], index: 15, kind: input, shape index: {}]   ;;  %s8499_s16 = inlined_call_operand.vmem [shape: f32[1,128], index: 16, kind: input, shape index: {}]   ;;  %s8500_s17 = inlined_call_operand.hbm [shape: f32[128,128], index: 17, kind: input, shape index: {}]   ;;  %s8501_s18 = inlined_call_operand.vmem [shape: f32[1,128], index: 18, kind: input, shape index: {}]   ;;  %s8502_s19 = inlined_call_operand.vmem [shape: f32[1,128], index: 19, kind: input, shape index: {}]   ;;  %s8503_s20 = inlined_call_operand.vmem [shape: f32[1,128], index: 20, kind: input, shape index: {}]   ;;  %s8504_s21 = inlined_call_operand.hbm [shape: f32[2,16,128], index: 21, kind: output, shape index: {}]  }
   0x1   :  { %8511 = sst [smem:[#allocation24_spill]] %s8483_s0 }
   0x2   :  { %8512 = sst [smem:[#allocation25_spill]] %s8484_s1 }
   0x3   :  { %8513 = sst [smem:[#allocation26_spill]] %s8485_s2 }
   0x4   :  { %8514 = sst [smem:[#allocation27_spill]] %s8486_s3 }
   0x5   :  { %8515 = sst [smem:[#allocation28_spill]] %s8487_s4 }
   0x6   :  { %8516 = sst [smem:[#allocation29_spill]] %s8488_s5 }
   0x7   :  { %8517 = sst [smem:[#allocation30_spill]] %s8504_s21 }
   0x8   :  { %26 = vsyncpa [#allocation3], 0 }
   0x9   :  { %27 = vsyncpa [#allocation6], 0 }
   0xa   :  { %28 = vsyncpa [#allocation9], 0 }
   0xb   :  { %29 = vsyncpa [#allocation12], 0 }
   0xc   :  { %30 = vsyncpa [#allocation15], 0 }
   0xd   :  { %31 = vsyncpa [#allocation4], 0  ;;  %s7490_s2 = smov [#allocation5]   ;;  %s8518_s3 = sld [smem:[#allocation25_spill]] }
   0xe   :  { %s49_s25 = sshll.u32 %s7490_s2, 4  ;;  %s50_s25 = int_to_ptr.vmem [resolvable:$true] %s49_s25 }
  0x13   :  { %s7258_s28 = scalar_lea.hbm %s8518_s3, 24576 }
  0x14   :  { %p7259_p0 = scmp.ne.s32.totalorder %s8518_s3, %s7258_s28  ;;  %p7262_p1 = scmp.lt.u32.totalorder %s7258_s28, %s8518_s3 }
  0x16   :  { %p7264_p2 = pnand %p7262_p1, %p7259_p0 }
  0x18   :  { %7267 = shalt.err (!%p7264_p2)
}
  0x19   :  { %s7268_s5 = scalar_lea.vmem %s50_s25, 24576  ;;  %p7273_p4 = scmp.lt.s32.totalorder %s50_s25, %s50_s25 }
  0x1a   :  { %p7269_p3 = scmp.ne.s32.totalorder %s50_s25, %s7268_s5  ;;  %p7274_p5 = scmp.lt.s32.totalorder %s7268_s5, %s7268_s5 }
  0x1c   :  { %p7275_p6 = por %p7274_p5, %p7273_p4 }
  0x1e   :  { %p7276_p7 = pnand %p7275_p6, %p7269_p3 }
  0x20   :  { %7279 = shalt.err (!%p7276_p7)
}
  0x21   :  { %s8510_s22 = smov 1536   ;;  %s7492_s23 = smov 96  }
  0x22   :  { %55 = dma.hbm_to_vmem [thread:$0]  %s8518_s3, 24576, %s50_s25, [#allocation6], %s8510_s22, %s8510_s22, %s7492_s23  }
  0x23   :  { %s7493_s2 = smov [#allocation8]   ;;  %s7280_s29 = scalar_lea.hbm %s8489_s6, 16 }
  0x24   :  { %s80_s26 = sshll.u32 %s7493_s2, 4  ;;  %p7281_p8 = scmp.ne.s32.totalorder %s8489_s6, %s7280_s29  ;;  %s81_s26 = int_to_ptr.vmem [resolvable:$true] %s80_s26 }
  0x25   :  { %p7284_p9 = scmp.lt.u32.totalorder %s7280_s29, %s8489_s6 }
  0x27   :  { %p7286_p10 = pnand %p7284_p9, %p7281_p8 }
  0x29   :  { %7289 = shalt.err (!%p7286_p10)
}
  0x2a   :  { %s7290_s21 = scalar_lea.vmem %s81_s26, 16  ;;  %s7294_s25 = scalar_lea.vmem %s81_s26, 32 }
  0x2b   :  { %p7291_p11 = scmp.ne.s32.totalorder %s81_s26, %s7290_s21  ;;  %p7295_p12 = scmp.lt.s32.totalorder %s81_s26, %s81_s26 }
  0x2c   :  { %p7296_p13 = scmp.lt.s32.totalorder %s7294_s25, %s7290_s21 }
  0x2e   :  { %p7297_p0 = por %p7296_p13, %p7295_p12 }
  0x30   :  { %p7298_p1 = pnand %p7297_p0, %p7291_p11 }
  0x32   :  { %7301 = shalt.err (!%p7298_p1)
}
  0x33   :  { %83 = dma.hbm_to_vmem [thread:$0]  %s8489_s6, 16, %s81_s26, [#allocation9]  }
  0x34   :  { %s7494_s24 = smov [#allocation11]   ;;  %s7495_s27 = smov [#allocation14]  }
  0x35   :  { %s103_s2 = sshll.u32 %s7494_s24, 4  ;;  %s129_s28 = sshll.u32 %s7495_s27, 4  ;;  %s104_s2 = int_to_ptr.vmem [resolvable:$true] %s103_s2  ;;  %s7642_s28 = int_to_ptr.vmem [resolvable:$true] %s129_s28 }
  0x36   :  { %s7302_s4 = scalar_lea.hbm %s8492_s9, 8192 }
  0x37   :  { %p7303_p2 = scmp.ne.s32.totalorder %s8492_s9, %s7302_s4  ;;  %p7306_p3 = scmp.lt.u32.totalorder %s7302_s4, %s8492_s9 }
  0x39   :  { %p7308_p4 = pnand %p7306_p3, %p7303_p2 }
  0x3b   :  { %7311 = shalt.err (!%p7308_p4)
}
  0x3c   :  { %s7312_s6 = scalar_lea.vmem %s104_s2, 8192  ;;  %p7317_p6 = scmp.lt.s32.totalorder %s104_s2, %s104_s2 }
  0x3d   :  { %p7313_p5 = scmp.ne.s32.totalorder %s104_s2, %s7312_s6  ;;  %p7318_p7 = scmp.lt.s32.totalorder %s7312_s6, %s7312_s6 }
  0x3f   :  { %p7319_p8 = por %p7318_p7, %p7317_p6 }
  0x41   :  { %p7320_p9 = pnand %p7319_p8, %p7313_p5 }
  0x43   :  { %7323 = shalt.err (!%p7320_p9)
}
  0x44   :  { %s7496_s26 = smov 128   ;;  %s7497_s3 = smov 8  }
  0x45   :  { %109 = dma.hbm_to_vmem [thread:$0]  %s8492_s9, 8192, %s104_s2, [#allocation12], %s7496_s26, %s7496_s26, %s7497_s3  }
  0x46   :  { %s7324_s0 = scalar_lea.hbm %s8496_s13, 2048 }
  0x47   :  { %p7325_p10 = scmp.ne.s32.totalorder %s8496_s13, %s7324_s0  ;;  %p7328_p11 = scmp.lt.u32.totalorder %s7324_s0, %s8496_s13 }
  0x49   :  { %p7330_p12 = pnand %p7328_p11, %p7325_p10 }
  0x4b   :  { %7333 = shalt.err (!%p7330_p12)
}
  0x4c   :  { %s7334_s25 = scalar_lea.vmem %s7642_s28, 2048  ;;  %p7339_p0 = scmp.lt.s32.totalorder %s7642_s28, %s7642_s28 }
  0x4d   :  { %p7335_p13 = scmp.ne.s32.totalorder %s7642_s28, %s7334_s25  ;;  %p7340_p1 = scmp.lt.s32.totalorder %s7334_s25, %s7334_s25 }
  0x4f   :  { %p7341_p2 = por %p7340_p1, %p7339_p0 }
  0x51   :  { %p7342_p3 = pnand %p7341_p2, %p7335_p13 }
  0x53   :  { %7345 = shalt.err (!%p7342_p3)
}
  0x54   :  { %135 = dma.hbm_to_vmem [thread:$0]  %s8496_s13, 2048, %s7642_s28, [#allocation15], %s7496_s26, %s7496_s26, %s7497_s3  }
  0x55   :  { %s7498_s6 = smov [#allocation2]   ;;  %s7499_s24 = smov [#allocation7]  }
  0x56   :  { %s37_s1 = sshll.u32 %s7498_s6, 4  ;;  %s63_s27 = sshll.u32 %s7499_s24, 4  ;;  %s38_s1 = int_to_ptr.vmem [resolvable:$true] %s37_s1  ;;  %s7679_s27 = int_to_ptr.vmem [resolvable:$true] %s63_s27 }
  0x57   :  { %s8519_s4 = sld [smem:[#allocation24_spill]] }
  0x5d   :  { %s7346_s30 = scalar_lea.hbm %s8519_s4, 512 }
  0x5e   :  { %p7347_p4 = scmp.ne.s32.totalorder %s8519_s4, %s7346_s30  ;;  %p7350_p5 = scmp.lt.u32.totalorder %s7346_s30, %s8519_s4 }
  0x60   :  { %p7352_p6 = pnand %p7350_p5, %p7347_p4 }
  0x62   :  { %7355 = shalt.err (!%p7352_p6)
}
  0x63   :  { %s7356_s13 = scalar_lea.vmem %s38_s1, 512  ;;  %p7361_p8 = scmp.lt.s32.totalorder %s38_s1, %s38_s1 }
  0x64   :  { %p7357_p7 = scmp.ne.s32.totalorder %s38_s1, %s7356_s13  ;;  %p7362_p9 = scmp.lt.s32.totalorder %s7356_s13, %s7356_s13 }
  0x66   :  { %p7363_p10 = por %p7362_p9, %p7361_p8 }
  0x68   :  { %p7364_p11 = pnand %p7363_p10, %p7357_p7 }
  0x6a   :  { %7367 = shalt.err (!%p7364_p11)
}
  0x6b   :  { %43 = dma.hbm_to_vmem [thread:$0]  %s8519_s4, 512, %s38_s1, [#allocation3], %s7496_s26, %s7496_s26, %s7497_s3  }
  0x6c   :  { %s8520_s22 = sld [smem:[#allocation27_spill]] }
  0x72   :  { %s7368_s24 = scalar_lea.hbm %s8520_s22, 8192 }
  0x73   :  { %p7369_p12 = scmp.ne.s32.totalorder %s8520_s22, %s7368_s24  ;;  %p7372_p13 = scmp.lt.u32.totalorder %s7368_s24, %s8520_s22 }
  0x75   :  { %p7374_p0 = pnand %p7372_p13, %p7369_p12 }
  0x77   :  { %7377 = shalt.err (!%p7374_p0)
}
  0x78   :  { %s7378_s5 = scalar_lea.vmem %s7679_s27, 8192  ;;  %p7383_p2 = scmp.lt.s32.totalorder %s7679_s27, %s7679_s27 }
  0x79   :  { %p7379_p1 = scmp.ne.s32.totalorder %s7679_s27, %s7378_s5  ;;  %p7384_p3 = scmp.lt.s32.totalorder %s7378_s5, %s7378_s5 }
  0x7b   :  { %p7385_p4 = por %p7384_p3, %p7383_p2 }
  0x7d   :  { %p7386_p5 = pnand %p7385_p4, %p7379_p1 }
  0x7f   :  { %7389 = shalt.err (!%p7386_p5)
}
  0x80   :  { %69 = dma.hbm_to_vmem [thread:$0]  %s8520_s22, 8192, %s7679_s27, [#allocation6], %s7496_s26, %s7496_s26, %s7497_s3  }
  0x81   :  { %s7500_s25 = smov [#allocation10]   ;;  %s7501_s28 = smov [#allocation13]  }
  0x82   :  { %s89_s13 = sshll.u32 %s7500_s25, 4  ;;  %s120_s9 = sshll.u32 %s7501_s28, 4  ;;  %s90_s13 = int_to_ptr.vmem [resolvable:$true] %s89_s13  ;;  %s121_s9 = int_to_ptr.vmem [resolvable:$true] %s120_s9 }
  0x83   :  { %s7390_s24 = scalar_lea.hbm %s8490_s7, 24576 }
  0x84   :  { %p7391_p6 = scmp.ne.s32.totalorder %s8490_s7, %s7390_s24  ;;  %p7394_p7 = scmp.lt.u32.totalorder %s7390_s24, %s8490_s7 }
  0x86   :  { %p7396_p8 = pnand %p7394_p7, %p7391_p6 }
  0x88   :  { %7399 = shalt.err (!%p7396_p8)
}
  0x89   :  { %s7400_s27 = scalar_lea.vmem %s90_s13, 24576  ;;  %p7405_p10 = scmp.lt.s32.totalorder %s90_s13, %s90_s13 }
  0x8a   :  { %p7401_p9 = scmp.ne.s32.totalorder %s90_s13, %s7400_s27  ;;  %p7406_p11 = scmp.lt.s32.totalorder %s7400_s27, %s7400_s27 }
  0x8c   :  { %p7407_p12 = por %p7406_p11, %p7405_p10 }
  0x8e   :  { %p7408_p13 = pnand %p7407_p12, %p7401_p9 }
  0x90   :  { %7411 = shalt.err (!%p7408_p13)
}
  0x91   :  { %s8521_s22 = smov 1536   ;;  %s7412_s28 = scalar_lea.hbm %s8495_s12, 16 }
  0x92   :  { %95 = dma.hbm_to_vmem [thread:$0]  %s8490_s7, 24576, %s90_s13, [#allocation9], %s8521_s22, %s8521_s22, %s7492_s23  }
  0x93   :  { %p7413_p0 = scmp.ne.s32.totalorder %s8495_s12, %s7412_s28  ;;  %p7416_p1 = scmp.lt.u32.totalorder %s7412_s28, %s8495_s12 }
  0x95   :  { %p7418_p2 = pnand %p7416_p1, %p7413_p0 }
  0x97   :  { %7421 = shalt.err (!%p7418_p2)
}
  0x98   :  { %s7422_s0 = scalar_lea.vmem %s121_s9, 16  ;;  %s7426_s30 = scalar_lea.vmem %s121_s9, 32 }
  0x99   :  { %p7423_p3 = scmp.ne.s32.totalorder %s121_s9, %s7422_s0  ;;  %p7427_p4 = scmp.lt.s32.totalorder %s121_s9, %s121_s9 }
  0x9a   :  { %p7428_p5 = scmp.lt.s32.totalorder %s7426_s30, %s7422_s0 }
  0x9c   :  { %p7429_p6 = por %p7428_p5, %p7427_p4 }
  0x9e   :  { %p7430_p7 = pnand %p7429_p6, %p7423_p3 }
  0xa0   :  { %7433 = shalt.err (!%p7430_p7)
}
  0xa1   :  { %123 = dma.hbm_to_vmem [thread:$0]  %s8495_s12, 16, %s121_s9, [#allocation12]  }
  0xa2   :  { %s7502_s13 = smov [#allocation16]   ;;  %s7434_s5 = scalar_lea.hbm %s8500_s17, 2048 }
  0xa3   :  { %s147_s21 = sshll.u32 %s7502_s13, 4  ;;  %p7435_p8 = scmp.ne.s32.totalorder %s8500_s17, %s7434_s5  ;;  %s148_s21 = int_to_ptr.vmem [resolvable:$true] %s147_s21 }
  0xa4   :  { %p7438_p9 = scmp.lt.u32.totalorder %s7434_s5, %s8500_s17 }
  0xa6   :  { %p7440_p10 = pnand %p7438_p9, %p7435_p8 }
  0xa8   :  { %7443 = shalt.err (!%p7440_p10)
}
  0xa9   :  { %s7444_s2 = scalar_lea.vmem %s148_s21, 2048  ;;  %p7449_p12 = scmp.lt.s32.totalorder %s148_s21, %s148_s21 }
  0xaa   :  { %p7445_p11 = scmp.ne.s32.totalorder %s148_s21, %s7444_s2  ;;  %p7450_p13 = scmp.lt.s32.totalorder %s7444_s2, %s7444_s2 }
  0xac   :  { %p7451_p0 = por %p7450_p13, %p7449_p12 }
  0xae   :  { %p7452_p1 = pnand %p7451_p0, %p7445_p11 }
  0xb0   :  { %7455 = shalt.err (!%p7452_p1)
}
  0xb1   :  { %153 = dma.hbm_to_vmem [thread:$0]  %s8500_s17, 2048, %s148_s21, [#allocation15], %s7496_s26, %s7496_s26, %s7497_s3  }
  0xb2   :  { %7478 = dma.done.wait [#allocation3], 512  }
  0xb3   :  { %7479 = vsyncadd [#allocation3], 4294966784 }
  0xb4   :  { %7480 = dma.done.wait [#allocation6], 32768  }
  0xb5   :  { %7481 = vsyncadd [#allocation6], 4294934528 }
  0xb6   :  { %7482 = dma.done.wait [#allocation9], 24592  }
  0xb7   :  { %7483 = vsyncadd [#allocation9], 4294942704 }
  0xb8   :  { %7484 = dma.done.wait [#allocation12], 8208  }
  0xb9   :  { %7485 = vsyncadd [#allocation12], 4294959088 }
  0xba   :  { %7486 = dma.done.wait [#allocation15], 4096  }
  0xbb   :  { %7487 = vsyncadd [#allocation15], 4294963200  ;;  %v7503_v0 = vmov 0.0   ;;  %v199_v1 = vld [vmem:[#allocation5 + $0x8] sm:$0xff]  ;;  %v198_v3 = vld [vmem:[#allocation5] sm:$0xff]  ;;  %s8522_s24 = sld [smem:[#allocation26_spill]] }
  0xbc   :  { %518 = vmatprep.mubr.f32.mxu0 %v7503_v0  ;;  %607 = vmatprep.mubr.f32.mxu1 %v7503_v0  ;;  %v211_v2 = vld [vmem:[#allocation5 + $0x68] sm:$0xff]  ;;  %v210_v5 = vld [vmem:[#allocation5 + $0x60] sm:$0xff]  ;;  %v201_v63 = vld [vmem:[#allocation5 + $0x18] sm:$0xff]  ;;  %vm1150_vm1 = vcmask 130048   ;;  %s8527_s23 = sld [smem:[#allocation28_spill]]  ;;  %s8528_s27 = sld [smem:[#allocation29_spill]] }
  0xbd   :  { %v6379_v4 = vpack.c.bf16 %v211_v2, %v199_v1  ;;  %v223_v6 = vld [vmem:[#allocation5 + $0xc8] sm:$0xff]  ;;  %v6381_v8 = vpack.c.bf16 %v210_v5, %v198_v3  ;;  %v222_v10 = vld [vmem:[#allocation5 + $0xc0] sm:$0xff]  ;;  %v213_v1 = vld [vmem:[#allocation5 + $0x78] sm:$0xff]  ;;  %s7504_s0 = smov [#allocation17]  }
  0xbe   :  { %v235_v7 = vld [vmem:[#allocation5 + $0x128] sm:$0xff]  ;;  %v234_v11 = vld [vmem:[#allocation5 + $0x120] sm:$0xff]  ;;  %v6411_v2 = vpack.c.bf16 %v213_v1, %v201_v63  ;;  %v200_v3 = vld [vmem:[#allocation5 + $0x10] sm:$0xff] }
  0xbf   :  { %v6383_v9 = vpack.c.bf16 %v235_v7, %v223_v6  ;;  %v247_v12 = vld [vmem:[#allocation5 + $0x188] sm:$0xff]  ;;  %6380 = vmatprep.subr.bf16.mxu0 %v6379_v4  ;;  %v6385_v14 = vpack.c.bf16 %v234_v11, %v222_v10  ;;  %v246_v16 = vld [vmem:[#allocation5 + $0x180] sm:$0xff]  ;;  %v212_v4 = vld [vmem:[#allocation5 + $0x70] sm:$0xff] }
  0xc0   :  { %v259_v13 = vld [vmem:[#allocation5 + $0x1e8] sm:$0xff]  ;;  %6382 = vmatpush1.bf16.msra.mxu0 %v6381_v8  ;;  %v258_v17 = vld [vmem:[#allocation5 + $0x1e0] sm:$0xff]  ;;  %v225_v5 = vld [vmem:[#allocation5 + $0xd8] sm:$0xff]  ;;  %v6413_v6 = vpack.c.bf16 %v212_v4, %v200_v3  ;;  %6412 = vmatprep.subr.bf16.mxu1 %v6411_v2 }
  0xc1   :  { %6384 = vmatprep.subr.bf16.mxu0 %v6383_v9  ;;  %v6387_v15 = vpack.c.bf16 %v259_v13, %v247_v12  ;;  %v271_v18 = vld [vmem:[#allocation5 + $0x248] sm:$0xff]  ;;  %v6389_v20 = vpack.c.bf16 %v258_v17, %v246_v16  ;;  %v270_v22 = vld [vmem:[#allocation5 + $0x240] sm:$0xff]  ;;  %v237_v7 = vld [vmem:[#allocation5 + $0x138] sm:$0xff] }
  0xc2   :  { %v283_v19 = vld [vmem:[#allocation5 + $0x2a8] sm:$0xff]  ;;  %v282_v23 = vld [vmem:[#allocation5 + $0x2a0] sm:$0xff]  ;;  %v224_v8 = vld [vmem:[#allocation5 + $0xd0] sm:$0xff]  ;;  %v6415_v12 = vpack.c.bf16 %v237_v7, %v225_v5  ;;  %6414 = vmatpush1.bf16.msra.mxu1 %v6413_v6 }
  0xc3   :  { %v6391_v21 = vpack.c.bf16 %v283_v19, %v271_v18  ;;  %v295_v24 = vld [vmem:[#allocation5 + $0x308] sm:$0xff]  ;;  %v6393_v26 = vpack.c.bf16 %v282_v23, %v270_v22  ;;  %v294_v28 = vld [vmem:[#allocation5 + $0x300] sm:$0xff]  ;;  %v236_v9 = vld [vmem:[#allocation5 + $0x130] sm:$0xff] }
  0xc4   :  { %6386 = vmatpush1.bf16.msra.mxu0 %v6385_v14  ;;  %v307_v25 = vld [vmem:[#allocation5 + $0x368] sm:$0xff]  ;;  %v306_v29 = vld [vmem:[#allocation5 + $0x360] sm:$0xff]  ;;  %v249_v13 = vld [vmem:[#allocation5 + $0x198] sm:$0xff]  ;;  %6416 = vmatprep.subr.bf16.mxu1 %v6415_v12 }
  0xc5   :  { %6388 = vmatprep.subr.bf16.mxu0 %v6387_v15  ;;  %v6395_v27 = vpack.c.bf16 %v307_v25, %v295_v24  ;;  %v319_v30 = vld [vmem:[#allocation5 + $0x3c8] sm:$0xff]  ;;  %v6397_v32 = vpack.c.bf16 %v306_v29, %v294_v28  ;;  %v318_v34 = vld [vmem:[#allocation5 + $0x3c0] sm:$0xff]  ;;  %v261_v14 = vld [vmem:[#allocation5 + $0x1f8] sm:$0xff] }
  0xc6   :  { %v331_v31 = vld [vmem:[#allocation5 + $0x428] sm:$0xff]  ;;  %v330_v35 = vld [vmem:[#allocation5 + $0x420] sm:$0xff]  ;;  %v248_v22 = vld [vmem:[#allocation5 + $0x190] sm:$0xff] }
  0xc7   :  { %v6399_v33 = vpack.c.bf16 %v331_v31, %v319_v30  ;;  %v343_v36 = vld [vmem:[#allocation5 + $0x488] sm:$0xff]  ;;  %v6401_v38 = vpack.c.bf16 %v330_v35, %v318_v34  ;;  %v342_v40 = vld [vmem:[#allocation5 + $0x480] sm:$0xff]  ;;  %v260_v23 = vld [vmem:[#allocation5 + $0x1f0] sm:$0xff] }
  0xc8   :  { %6390 = vmatpush1.bf16.msra.mxu0 %v6389_v20  ;;  %v355_v37 = vld [vmem:[#allocation5 + $0x4e8] sm:$0xff]  ;;  %v354_v41 = vld [vmem:[#allocation5 + $0x4e0] sm:$0xff]  ;;  %v6417_v20 = vpack.c.bf16 %v236_v9, %v224_v8  ;;  %v7768_v25 = vld [vmem:[#allocation2 + $0x10] sm:$0xff] }
  0xc9   :  { %6392 = vmatprep.subr.bf16.mxu0 %v6391_v21  ;;  %v6403_v39 = vpack.c.bf16 %v355_v37, %v343_v36  ;;  %v367_v42 = vld [vmem:[#allocation5 + $0x548] sm:$0xff]  ;;  %v6405_v44 = vpack.c.bf16 %v354_v41, %v342_v40  ;;  %v366_v46 = vld [vmem:[#allocation5 + $0x540] sm:$0xff]  ;;  %v6419_v21 = vpack.c.bf16 %v261_v14, %v249_v13  ;;  %v272_v35 = vld [vmem:[#allocation5 + $0x250] sm:$0xff] }
  0xca   :  { %v379_v43 = vld [vmem:[#allocation5 + $0x5a8] sm:$0xff]  ;;  %v378_v47 = vld [vmem:[#allocation5 + $0x5a0] sm:$0xff]  ;;  %6418 = vmatpush1.bf16.msra.mxu1 %v6417_v20  ;;  %v284_v36 = vld [vmem:[#allocation5 + $0x2b0] sm:$0xff] }
  0xcb   :  { %v6407_v45 = vpack.c.bf16 %v379_v43, %v367_v42  ;;  %v203_v48 = vld [vmem:[#allocation5 + $0x28] sm:$0xff]  ;;  %v6409_v50 = vpack.c.bf16 %v378_v47, %v366_v46  ;;  %v202_v52 = vld [vmem:[#allocation5 + $0x20] sm:$0xff]  ;;  %6420 = vmatprep.subr.bf16.mxu1 %v6419_v21  ;;  %v309_v40 = vld [vmem:[#allocation5 + $0x378] sm:$0xff]  ;;  %v6425_v46 = vpack.c.bf16 %v284_v36, %v272_v35 }
  0xcc   :  { %6394 = vmatpush1.bf16.msra.mxu0 %v6393_v26  ;;  %v215_v49 = vld [vmem:[#allocation5 + $0x88] sm:$0xff]  ;;  %v214_v53 = vld [vmem:[#allocation5 + $0x80] sm:$0xff]  ;;  %v273_v26 = vld [vmem:[#allocation5 + $0x258] sm:$0xff] }
  0xcd   :  { %6396 = vmatprep.subr.bf16.mxu0 %v6395_v27  ;;  %v6443_v51 = vpack.c.bf16 %v215_v49, %v203_v48  ;;  %v227_v54 = vld [vmem:[#allocation5 + $0xe8] sm:$0xff]  ;;  %v7760_v56 = vld [vmem:[#allocation2] sm:$0xff]  ;;  %v6445_v57 = vpack.c.bf16 %v214_v53, %v202_v52  ;;  %v285_v27 = vld [vmem:[#allocation5 + $0x2b8] sm:$0xff] }
  0xce   :  { %v239_v55 = vld [vmem:[#allocation5 + $0x148] sm:$0xff]  ;;  %v226_v58 = vld [vmem:[#allocation5 + $0xe0] sm:$0xff]  ;;  %v6423_v34 = vpack.c.bf16 %v285_v27, %v273_v26  ;;  %v296_v48 = vld [vmem:[#allocation5 + $0x310] sm:$0xff] }
  0xcf   :  { %v238_v59 = vld [vmem:[#allocation5 + $0x140] sm:$0xff]  ;;  %v251_v60 = vld [vmem:[#allocation5 + $0x1a8] sm:$0xff]  ;;  %v6447_v61 = vpack.c.bf16 %v239_v55, %v227_v54  ;;  %v308_v49 = vld [vmem:[#allocation5 + $0x370] sm:$0xff] }
  0xd0   :  { %6398 = vmatpush1.bf16.msra.mxu0 %v6397_v32  ;;  %v263_v62 = vld [vmem:[#allocation5 + $0x208] sm:$0xff]  ;;  %v6449_v10 = vpack.c.bf16 %v238_v59, %v226_v58  ;;  %v250_v16 = vld [vmem:[#allocation5 + $0x1a0] sm:$0xff]  ;;  %v333_v52 = vld [vmem:[#allocation5 + $0x438] sm:$0xff]  ;;  %v6429_v59 = vpack.c.bf16 %v308_v49, %v296_v48 }
  0xd1   :  { %6400 = vmatprep.subr.bf16.mxu0 %v6399_v33  ;;  %v7764_v11 = vld [vmem:[#allocation2 + $0x8] sm:$0xff]  ;;  %v6451_v15 = vpack.c.bf16 %v263_v62, %v251_v60  ;;  %v262_v17 = vld [vmem:[#allocation5 + $0x200] sm:$0xff]  ;;  %v6421_v33 = vpack.c.bf16 %v260_v23, %v248_v22  ;;  %v332_v62 = vld [vmem:[#allocation5 + $0x430] sm:$0xff] }
  0xd2   :  { %v275_v18 = vld [vmem:[#allocation5 + $0x268] sm:$0xff]  ;;  %v6453_v24 = vpack.c.bf16 %v262_v17, %v250_v16  ;;  %v274_v29 = vld [vmem:[#allocation5 + $0x260] sm:$0xff]  ;;  %v345_v1 = vld [vmem:[#allocation5 + $0x498] sm:$0xff] }
  0xd3   :  { %v287_v19 = vld [vmem:[#allocation5 + $0x2c8] sm:$0xff]  ;;  %v286_v30 = vld [vmem:[#allocation5 + $0x2c0] sm:$0xff]  ;;  %6422 = vmatpush1.bf16.msra.mxu1 %v6421_v33  ;;  %v357_v2 = vld [vmem:[#allocation5 + $0x4f8] sm:$0xff] }
  0xd4   :  { %6402 = vmatpush1.bf16.msra.mxu0 %v6401_v38  ;;  %v6455_v28 = vpack.c.bf16 %v287_v19, %v275_v18  ;;  %v299_v31 = vld [vmem:[#allocation5 + $0x328] sm:$0xff]  ;;  %v6457_v37 = vpack.c.bf16 %v286_v30, %v274_v29  ;;  %v7772_v38 = vld [vmem:[#allocation2 + $0x18] sm:$0xff]  ;;  %v298_v42 = vld [vmem:[#allocation5 + $0x320] sm:$0xff]  ;;  %6424 = vmatprep.subr.bf16.mxu1 %v6423_v34  ;;  %v6435_v9 = vpack.c.bf16 %v357_v2, %v345_v1 }
  0xd5   :  { %6404 = vmatprep.subr.bf16.mxu0 %v6403_v39  ;;  %v311_v32 = vld [vmem:[#allocation5 + $0x388] sm:$0xff]  ;;  %v297_v39 = vld [vmem:[#allocation5 + $0x318] sm:$0xff]  ;;  %v310_v43 = vld [vmem:[#allocation5 + $0x380] sm:$0xff] }
  0xd6   :  { %v6459_v41 = vpack.c.bf16 %v311_v32, %v299_v31  ;;  %v6427_v47 = vpack.c.bf16 %v309_v40, %v297_v39  ;;  %v322_v54 = vld [vmem:[#allocation5 + $0x3e0] sm:$0xff]  ;;  %v359_v58 = vld [vmem:[#allocation5 + $0x508] sm:$0xff]  ;;  %v356_v12 = vld [vmem:[#allocation5 + $0x4f0] sm:$0xff] }
  0xd7   :  { %v334_v55 = vld [vmem:[#allocation5 + $0x440] sm:$0xff]  ;;  %6426 = vmatpush1.bf16.msra.mxu1 %v6425_v46  ;;  %v371_v6 = vld [vmem:[#allocation5 + $0x568] sm:$0xff]  ;;  %v369_v14 = vld [vmem:[#allocation5 + $0x558] sm:$0xff] }
  0xd8   :  { %6406 = vmatpush1.bf16.msra.mxu0 %v6405_v44  ;;  %v323_v44 = vld [vmem:[#allocation5 + $0x3e8] sm:$0xff]  ;;  %6428 = vmatprep.subr.bf16.mxu1 %v6427_v47  ;;  %v6465_v63 = vpack.c.bf16 %v334_v55, %v322_v54  ;;  %v346_v4 = vld [vmem:[#allocation5 + $0x4a0] sm:$0xff]  ;;  %v368_v23 = vld [vmem:[#allocation5 + $0x550] sm:$0xff] }
  0xd9   :  { %6408 = vmatprep.subr.bf16.mxu0 %v6407_v45  ;;  %v335_v45 = vld [vmem:[#allocation5 + $0x448] sm:$0xff]  ;;  %v358_v5 = vld [vmem:[#allocation5 + $0x500] sm:$0xff]  ;;  %v205_v27 = vld [vmem:[#allocation5 + $0x38] sm:$0xff] }
  0xda   :  { %v6463_v53 = vpack.c.bf16 %v335_v45, %v323_v44  ;;  %v383_v7 = vld [vmem:[#allocation5 + $0x5c8] sm:$0xff]  ;;  %v6469_v13 = vpack.c.bf16 %v358_v5, %v346_v4  ;;  %v370_v17 = vld [vmem:[#allocation5 + $0x560] sm:$0xff]  ;;  %v204_v36 = vld [vmem:[#allocation5 + $0x30] sm:$0xff] }
  0xdb   :  { %6430 = vmatpush1.bf16.msra.mxu1 %v6429_v59  ;;  %v6471_v16 = vpack.c.bf16 %v383_v7, %v371_v6  ;;  %v382_v18 = vld [vmem:[#allocation5 + $0x5c0] sm:$0xff]  ;;  %v207_v19 = vld [vmem:[#allocation5 + $0x48] sm:$0xff]  ;;  %v229_v40 = vld [vmem:[#allocation5 + $0xf8] sm:$0xff] }
  0xdc   :  { %6410 = vmatpush1.bf16.msra.mxu0 %v6409_v50  ;;  %v6461_v50 = vpack.c.bf16 %v310_v43, %v298_v42  ;;  %v219_v20 = vld [vmem:[#allocation5 + $0xa8] sm:$0xff]  ;;  %v6473_v26 = vpack.c.bf16 %v382_v18, %v370_v17  ;;  %v206_v30 = vld [vmem:[#allocation5 + $0x40] sm:$0xff]  ;;  %v228_v49 = vld [vmem:[#allocation5 + $0xf0] sm:$0xff] }
  0xdd   :  { %6444 = vmatprep.subr.bf16.mxu0 %v6443_v51  ;;  %v321_v51 = vld [vmem:[#allocation5 + $0x3d8] sm:$0xff]  ;;  %v6507_v29 = vpack.c.bf16 %v219_v20, %v207_v19  ;;  %v218_v31 = vld [vmem:[#allocation5 + $0xa0] sm:$0xff]  ;;  %v231_v32 = vld [vmem:[#allocation5 + $0x108] sm:$0xff] }
  0xde   :  { %v6431_v60 = vpack.c.bf16 %v333_v52, %v321_v51  ;;  %v243_v33 = vld [vmem:[#allocation5 + $0x168] sm:$0xff]  ;;  %v6509_v39 = vpack.c.bf16 %v218_v31, %v206_v30  ;;  %v230_v43 = vld [vmem:[#allocation5 + $0x100] sm:$0xff]  ;;  %v253_v52 = vld [vmem:[#allocation5 + $0x1b8] sm:$0xff] }
  0xdf   :  { %519 = vmatmul.mubr.f32.vlgmr.msra.gmra.mrb[0].mxu0 %v7760_v56  ;;  %v6511_v42 = vpack.c.bf16 %v243_v33, %v231_v32  ;;  %v242_v44 = vld [vmem:[#allocation5 + $0x160] sm:$0xff]  ;;  %v255_v45 = vld [vmem:[#allocation5 + $0x1c8] sm:$0xff]  ;;  %v277_v2 = vld [vmem:[#allocation5 + $0x278] sm:$0xff] }
  0xe0   :  { %6446 = vmatpush1.bf16.msra.mxu0 %v6445_v57  ;;  %524 = vmatprep.mubr.f32.mxu0 %v7503_v0  ;;  %v347_v57 = vld [vmem:[#allocation5 + $0x4a8] sm:$0xff]  ;;  %v6513_v51 = vpack.c.bf16 %v242_v44, %v230_v43  ;;  %v254_v55 = vld [vmem:[#allocation5 + $0x1c0] sm:$0xff] }
  0xe1   :  { %6448 = vmatprep.subr.bf16.mxu0 %v6447_v61  ;;  %v320_v61 = vld [vmem:[#allocation5 + $0x3d0] sm:$0xff]  ;;  %v6467_v3 = vpack.c.bf16 %v359_v58, %v347_v57  ;;  %6432 = vmatprep.subr.bf16.mxu1 %v6431_v60  ;;  %v267_v46 = vld [vmem:[#allocation5 + $0x228] sm:$0xff]  ;;  %v266_v57 = vld [vmem:[#allocation5 + $0x220] sm:$0xff] }
  0xe2   :  { %v6433_v8 = vpack.c.bf16 %v332_v62, %v320_v61  ;;  %v6515_v54 = vpack.c.bf16 %v267_v46, %v255_v45  ;;  %v279_v58 = vld [vmem:[#allocation5 + $0x288] sm:$0xff]  ;;  %v252_v62 = vld [vmem:[#allocation5 + $0x1b0] sm:$0xff]  ;;  %v6517_v1 = vpack.c.bf16 %v266_v57, %v254_v55  ;;  %v278_v5 = vld [vmem:[#allocation5 + $0x280] sm:$0xff] }
  0xe3   :  { %525 = vmatmul.mubr.f32.gmra.mrb[2].mxu0 %v7764_v11  ;;  %v291_v59 = vld [vmem:[#allocation5 + $0x2e8] sm:$0xff]  ;;  %v290_v6 = vld [vmem:[#allocation5 + $0x2e0] sm:$0xff] }
  0xe4   :  { %6450 = vmatpush1.bf16.msra.mxu0 %v6449_v10  ;;  %530 = vmatprep.mubr.f32.mxu0 %v7503_v0  ;;  %v344_v10 = vld [vmem:[#allocation5 + $0x490] sm:$0xff]  ;;  %v6519_v4 = vpack.c.bf16 %v291_v59, %v279_v58  ;;  %v303_v7 = vld [vmem:[#allocation5 + $0x348] sm:$0xff]  ;;  %v302_v18 = vld [vmem:[#allocation5 + $0x340] sm:$0xff] }
  0xe5   :  { %6452 = vmatprep.subr.bf16.mxu0 %v6451_v15  ;;  %v381_v15 = vld [vmem:[#allocation5 + $0x5b8] sm:$0xff]  ;;  %6434 = vmatpush1.bf16.msra.mxu1 %v6433_v8  ;;  %v6437_v21 = vpack.c.bf16 %v356_v12, %v344_v10  ;;  %v315_v8 = vld [vmem:[#allocation5 + $0x3a8] sm:$0xff]  ;;  %v276_v12 = vld [vmem:[#allocation5 + $0x270] sm:$0xff] }
  0xe6   :  { %6436 = vmatprep.subr.bf16.mxu1 %v6435_v9  ;;  %v6439_v22 = vpack.c.bf16 %v381_v15, %v369_v14  ;;  %v6521_v14 = vpack.c.bf16 %v290_v6, %v278_v5  ;;  %v301_v15 = vld [vmem:[#allocation5 + $0x338] sm:$0xff]  ;;  %v6523_v17 = vpack.c.bf16 %v315_v8, %v303_v7  ;;  %v314_v19 = vld [vmem:[#allocation5 + $0x3a0] sm:$0xff]  ;;  %v327_v20 = vld [vmem:[#allocation5 + $0x408] sm:$0xff] }
  0xe7   :  { %531 = vmatmul.mubr.f32.gmra.mrb[4].mxu0 %v7768_v25  ;;  %v326_v31 = vld [vmem:[#allocation5 + $0x400] sm:$0xff]  ;;  %v351_v33 = vld [vmem:[#allocation5 + $0x4c8] sm:$0xff]  ;;  %v208_v5 = vld [vmem:[#allocation5 + $0x50] sm:$0xff] }
  0xe8   :  { %6454 = vmatpush1.bf16.msra.mxu0 %v6453_v24  ;;  %536 = vmatprep.mubr.f32.mxu0 %v7503_v0  ;;  %v380_v24 = vld [vmem:[#allocation5 + $0x5b0] sm:$0xff]  ;;  %v338_v32 = vld [vmem:[#allocation5 + $0x460] sm:$0xff]  ;;  %v375_v46 = vld [vmem:[#allocation5 + $0x588] sm:$0xff] }
  0xe9   :  { %6456 = vmatprep.subr.bf16.mxu0 %v6455_v28  ;;  %v217_v28 = vld [vmem:[#allocation5 + $0x98] sm:$0xff]  ;;  %6438 = vmatpush1.bf16.msra.mxu1 %v6437_v21  ;;  %v6441_v34 = vpack.c.bf16 %v380_v24, %v368_v23  ;;  %v339_v21 = vld [vmem:[#allocation5 + $0x468] sm:$0xff]  ;;  %v300_v24 = vld [vmem:[#allocation5 + $0x330] sm:$0xff] }
  0xea   :  { %6440 = vmatprep.subr.bf16.mxu1 %v6439_v22  ;;  %v6475_v35 = vpack.c.bf16 %v217_v28, %v205_v27  ;;  %v6525_v27 = vpack.c.bf16 %v314_v19, %v302_v18  ;;  %v325_v28 = vld [vmem:[#allocation5 + $0x3f8] sm:$0xff]  ;;  %v6527_v30 = vpack.c.bf16 %v339_v21, %v327_v20  ;;  %v350_v44 = vld [vmem:[#allocation5 + $0x4c0] sm:$0xff]  ;;  %v220_v6 = vld [vmem:[#allocation5 + $0xb0] sm:$0xff] }
  0xeb   :  { %537 = vmatmul.mubr.f32.gmra.mrb[6].mxu0 %v7772_v38  ;;  %v362_v45 = vld [vmem:[#allocation5 + $0x520] sm:$0xff]  ;;  %v233_v7 = vld [vmem:[#allocation5 + $0x118] sm:$0xff]  ;;  %v256_v18 = vld [vmem:[#allocation5 + $0x1d0] sm:$0xff] }
  0xec   :  { %6458 = vmatpush1.bf16.msra.mxu0 %v6457_v37  ;;  %696 = vmatprep.mubr.f32.mxu0 %v7503_v0  ;;  %v216_v37 = vld [vmem:[#allocation5 + $0x90] sm:$0xff]  ;;  %v374_v57 = vld [vmem:[#allocation5 + $0x580] sm:$0xff]  ;;  %v245_v8 = vld [vmem:[#allocation5 + $0x178] sm:$0xff] }
  0xed   :  { %6460 = vmatprep.subr.bf16.mxu0 %v6459_v41  ;;  %v241_v41 = vld [vmem:[#allocation5 + $0x158] sm:$0xff]  ;;  %6442 = vmatpush1.bf16.msra.mxu1 %v6441_v34  ;;  %v6477_v47 = vpack.c.bf16 %v216_v37, %v204_v36  ;;  %v363_v34 = vld [vmem:[#allocation5 + $0x528] sm:$0xff]  ;;  %v324_v37 = vld [vmem:[#allocation5 + $0x3f0] sm:$0xff] }
  0xee   :  { %6476 = vmatprep.subr.bf16.mxu1 %v6475_v35  ;;  %v6479_v48 = vpack.c.bf16 %v241_v41, %v229_v40  ;;  %v6529_v40 = vpack.c.bf16 %v338_v32, %v326_v31  ;;  %v349_v41 = vld [vmem:[#allocation5 + $0x4b8] sm:$0xff]  ;;  %v6531_v43 = vpack.c.bf16 %v363_v34, %v351_v33  ;;  %v386_v58 = vld [vmem:[#allocation5 + $0x5e0] sm:$0xff]  ;;  %v268_v19 = vld [vmem:[#allocation5 + $0x230] sm:$0xff] }
  0xef   :  { %v281_v20 = vld [vmem:[#allocation5 + $0x298] sm:$0xff]  ;;  %v304_v31 = vld [vmem:[#allocation5 + $0x350] sm:$0xff] }
  0xf0   :  { %6462 = vmatpush1.bf16.msra.mxu0 %v6461_v50  ;;  %v240_v50 = vld [vmem:[#allocation5 + $0x150] sm:$0xff]  ;;  %608 = vmatmul.mubr.f32.vlgmr.msra.gmra.mrb[0].mxu1 %v7760_v56  ;;  %v293_v21 = vld [vmem:[#allocation5 + $0x2f8] sm:$0xff] }
  0xf1   :  { %6464 = vmatprep.subr.bf16.mxu0 %v6463_v53  ;;  %v265_v53 = vld [vmem:[#allocation5 + $0x218] sm:$0xff]  ;;  %6478 = vmatpush1.bf16.msra.mxu1 %v6477_v47  ;;  %v6481_v60 = vpack.c.bf16 %v240_v50, %v228_v49  ;;  %v387_v47 = vld [vmem:[#allocation5 + $0x5e8] sm:$0xff]  ;;  %v348_v50 = vld [vmem:[#allocation5 + $0x4b0] sm:$0xff] }
  0xf2   :  { %613 = vmatprep.mubr.f32.mxu1 %v7503_v0  ;;  %6480 = vmatprep.subr.bf16.mxu1 %v6479_v48  ;;  %v6483_v61 = vpack.c.bf16 %v265_v53, %v253_v52  ;;  %v6533_v52 = vpack.c.bf16 %v362_v45, %v350_v44  ;;  %v373_v53 = vld [vmem:[#allocation5 + $0x578] sm:$0xff]  ;;  %v6535_v55 = vpack.c.bf16 %v387_v47, %v375_v46  ;;  %v316_v32 = vld [vmem:[#allocation5 + $0x3b0] sm:$0xff] }
  0xf3   :  { %v6557_v33 = vpack.c.bf16 %v316_v32, %v304_v31  ;;  %v329_v34 = vld [vmem:[#allocation5 + $0x418] sm:$0xff]  ;;  %v364_v45 = vld [vmem:[#allocation5 + $0x530] sm:$0xff] }
  0xf4   :  { %6466 = vmatpush1.bf16.msra.mxu0 %v6465_v63  ;;  %v264_v63 = vld [vmem:[#allocation5 + $0x210] sm:$0xff]  ;;  %614 = vmatmul.mubr.f32.gmra.mrb[2].mxu1 %v7764_v11  ;;  %v377_v46 = vld [vmem:[#allocation5 + $0x598] sm:$0xff] }
  0xf5   :  { %6468 = vmatprep.subr.bf16.mxu0 %v6467_v3  ;;  %v289_v3 = vld [vmem:[#allocation5 + $0x2d8] sm:$0xff]  ;;  %6482 = vmatpush1.bf16.msra.mxu1 %v6481_v60  ;;  %v6485_v9 = vpack.c.bf16 %v264_v63, %v252_v62  ;;  %v384_v62 = vld [vmem:[#allocation5 + $0x5d0] sm:$0xff]  ;;  %v6537_v63 = vpack.c.bf16 %v386_v58, %v374_v57 }
  0xf6   :  { %619 = vmatprep.mubr.f32.mxu1 %v7503_v0  ;;  %6484 = vmatprep.subr.bf16.mxu1 %v6483_v61  ;;  %v6487_v10 = vpack.c.bf16 %v289_v3, %v277_v2  ;;  %v372_v61 = vld [vmem:[#allocation5 + $0x570] sm:$0xff]  ;;  %v221_v2 = vld [vmem:[#allocation5 + $0xb8] sm:$0xff] }
  0xf7   :  { %v6505_v3 = vpack.c.bf16 %v384_v62, %v372_v61  ;;  %v389_v47 = vld [vmem:[#allocation5 + $0x5f8] sm:$0xff] }
  0xf8   :  { %6470 = vmatpush1.bf16.msra.mxu0 %v6469_v13  ;;  %v288_v13 = vld [vmem:[#allocation5 + $0x2d0] sm:$0xff]  ;;  %620 = vmatmul.mubr.f32.gmra.mrb[4].mxu1 %v7768_v25 }
  0xf9   :  { %6472 = vmatprep.subr.bf16.mxu0 %v6471_v16  ;;  %v313_v16 = vld [vmem:[#allocation5 + $0x398] sm:$0xff]  ;;  %6486 = vmatpush1.bf16.msra.mxu1 %v6485_v9  ;;  %v6489_v22 = vpack.c.bf16 %v288_v13, %v276_v12  ;;  %v6541_v9 = vpack.c.bf16 %v220_v6, %v208_v5  ;;  %v232_v12 = vld [vmem:[#allocation5 + $0x110] sm:$0xff] }
  0xfa   :  { %625 = vmatprep.mubr.f32.mxu1 %v7503_v0  ;;  %6488 = vmatprep.subr.bf16.mxu1 %v6487_v10  ;;  %v6491_v23 = vpack.c.bf16 %v313_v16, %v301_v15  ;;  %v6543_v10 = vpack.c.bf16 %v245_v8, %v233_v7  ;;  %v244_v13 = vld [vmem:[#allocation5 + $0x170] sm:$0xff]  ;;  %v269_v15 = vld [vmem:[#allocation5 + $0x238] sm:$0xff] }
  0xfb   :  { %v6545_v16 = vpack.c.bf16 %v244_v13, %v232_v12 }
  0xfc   :  { %6474 = vmatpush1.bf16.msra.mxu0 %v6473_v26  ;;  %v312_v26 = vld [vmem:[#allocation5 + $0x390] sm:$0xff]  ;;  %626 = vmatmul.mubr.f32.gmra.mrb[6].mxu1 %v7772_v38 }
  0xfd   :  { %6508 = vmatprep.subr.bf16.mxu0 %v6507_v29  ;;  %v337_v29 = vld [vmem:[#allocation5 + $0x458] sm:$0xff]  ;;  %6490 = vmatpush1.bf16.msra.mxu1 %v6489_v22  ;;  %v6493_v35 = vpack.c.bf16 %v312_v26, %v300_v24  ;;  %v6549_v22 = vpack.c.bf16 %v268_v19, %v256_v18  ;;  %v280_v24 = vld [vmem:[#allocation5 + $0x290] sm:$0xff] }
  0xfe   :  { %785 = vmatprep.mubr.f32.mxu1 %v7503_v0  ;;  %6492 = vmatprep.subr.bf16.mxu1 %v6491_v23  ;;  %v6495_v36 = vpack.c.bf16 %v337_v29, %v325_v28  ;;  %v6551_v23 = vpack.c.bf16 %v293_v21, %v281_v20  ;;  %v292_v26 = vld [vmem:[#allocation5 + $0x2f0] sm:$0xff]  ;;  %v317_v28 = vld [vmem:[#allocation5 + $0x3b8] sm:$0xff] }
  0xff   :  { %697 = vmatmul.mubr.f32.vlgmr.msra.gmra.mrb[8].mxu0 %v7760_v56  ;;  %v6553_v29 = vpack.c.bf16 %v292_v26, %v280_v24 }
 0x100   :  { %6510 = vmatpush1.bf16.msra.mxu0 %v6509_v39  ;;  %702 = vmatprep.mubr.f32.mxu0 %v7503_v0  ;;  %v336_v39 = vld [vmem:[#allocation5 + $0x450] sm:$0xff] }
 0x101   :  { %6512 = vmatprep.subr.bf16.mxu0 %v6511_v42  ;;  %v361_v42 = vld [vmem:[#allocation5 + $0x518] sm:$0xff]  ;;  %6494 = vmatpush1.bf16.msra.mxu1 %v6493_v35  ;;  %v6497_v48 = vpack.c.bf16 %v336_v39, %v324_v37  ;;  %v328_v37 = vld [vmem:[#allocation5 + $0x410] sm:$0xff] }
 0x102   :  { %6496 = vmatprep.subr.bf16.mxu1 %v6495_v36  ;;  %v6499_v49 = vpack.c.bf16 %v361_v42, %v349_v41  ;;  %v341_v35 = vld [vmem:[#allocation5 + $0x478] sm:$0xff]  ;;  %v340_v39 = vld [vmem:[#allocation5 + $0x470] sm:$0xff] }
 0x103   :  { %703 = vmatmul.mubr.f32.gmra.mrb[10].mxu0 %v7764_v11  ;;  %v6559_v36 = vpack.c.bf16 %v341_v35, %v329_v34  ;;  %v353_v41 = vld [vmem:[#allocation5 + $0x4d8] sm:$0xff] }
 0x104   :  { %6514 = vmatpush1.bf16.msra.mxu0 %v6513_v51  ;;  %708 = vmatprep.mubr.f32.mxu0 %v7503_v0  ;;  %v360_v51 = vld [vmem:[#allocation5 + $0x510] sm:$0xff]  ;;  %v365_v42 = vld [vmem:[#allocation5 + $0x538] sm:$0xff] }
 0x105   :  { %6516 = vmatprep.subr.bf16.mxu0 %v6515_v54  ;;  %v385_v54 = vld [vmem:[#allocation5 + $0x5d8] sm:$0xff]  ;;  %6498 = vmatpush1.bf16.msra.mxu1 %v6497_v48  ;;  %v6501_v59 = vpack.c.bf16 %v360_v51, %v348_v50  ;;  %v6563_v44 = vpack.c.bf16 %v365_v42, %v353_v41  ;;  %v376_v50 = vld [vmem:[#allocation5 + $0x590] sm:$0xff] }
 0x106   :  { %6500 = vmatprep.subr.bf16.mxu1 %v6499_v49  ;;  %v6503_v60 = vpack.c.bf16 %v385_v54, %v373_v53  ;;  %v6567_v49 = vpack.c.bf16 %v389_v47, %v377_v46  ;;  %v388_v51 = vld [vmem:[#allocation5 + $0x5f0] sm:$0xff]  ;;  %v187_v53 = vlaneseq }
 0x107   :  { %709 = vmatmul.mubr.f32.gmra.mrb[12].mxu0 %v7768_v25 }
 0x108   :  { %6518 = vmatpush1.bf16.msra.mxu0 %v6517_v1  ;;  %714 = vmatprep.mubr.f32.mxu0 %v7503_v0  ;;  %v209_v1 = vld [vmem:[#allocation5 + $0x58] sm:$0xff]  ;;  %v7815_v54 = vshrl.u32 %v187_v53, 7 }
 0x109   :  { %6520 = vmatprep.subr.bf16.mxu0 %v6519_v4  ;;  %6502 = vmatpush1.bf16.msra.mxu1 %v6501_v59  ;;  %v6539_v4 = vpack.c.bf16 %v221_v2, %v209_v1 }
 0x10a   :  { %6504 = vmatprep.subr.bf16.mxu1 %v6503_v60  ;;  %v412_v2 = vsub.s32 4, %v7815_v54  ;;  %v7868_v41 = vsub.s32 1, %v7815_v54  ;;  %v424_v42 = vsub.s32 7, %v7815_v54 }
 0x10b   :  { %715 = vmatmul.mubr.f32.gmra.mrb[14].mxu0 %v7772_v38 }
 0x10c   :  { %6522 = vmatpush1.bf16.msra.mxu0 %v6521_v14  ;;  %874 = vmatprep.mubr.f32.mxu0 %v7503_v0  ;;  %v257_v14 = vld [vmem:[#allocation5 + $0x1d8] sm:$0xff] }
 0x10d   :  { %6524 = vmatprep.subr.bf16.mxu0 %v6523_v17  ;;  %6506 = vmatpush1.bf16.msra.mxu1 %v6505_v3  ;;  %v6547_v17 = vpack.c.bf16 %v269_v15, %v257_v14  ;;  %v416_v3 = vsub.s32 5, %v7815_v54 }
 0x10e   :  { %6540 = vmatprep.subr.bf16.mxu1 %v6539_v4 }
 0x110   :  { %6526 = vmatpush1.bf16.msra.mxu0 %v6525_v27  ;;  %786 = vmatmul.mubr.f32.vlgmr.msra.gmra.mrb[8].mxu1 %v7760_v56  ;;  %v305_v27 = vld [vmem:[#allocation5 + $0x358] sm:$0xff] }
 0x111   :  { %6528 = vmatprep.subr.bf16.mxu0 %v6527_v30  ;;  %6542 = vmatpush1.bf16.msra.mxu1 %v6541_v9  ;;  %v6555_v30 = vpack.c.bf16 %v317_v28, %v305_v27 }
 0x112   :  { %791 = vmatprep.mubr.f32.mxu1 %v7503_v0  ;;  %6544 = vmatprep.subr.bf16.mxu1 %v6543_v10 }
 0x114   :  { %6530 = vmatpush1.bf16.msra.mxu0 %v6529_v40  ;;  %792 = vmatmul.mubr.f32.gmra.mrb[10].mxu1 %v7764_v11  ;;  %v6561_v40 = vpack.c.bf16 %v340_v39, %v328_v37  ;;  %v391_v39 = vld [vmem:[%s8522_s24 + $0x8] sm:$0xf] }
 0x115   :  { %6532 = vmatprep.subr.bf16.mxu0 %v6531_v43  ;;  %6546 = vmatpush1.bf16.msra.mxu1 %v6545_v16  ;;  %v352_v43 = vld [vmem:[#allocation5 + $0x4d0] sm:$0xff] }
 0x116   :  { %797 = vmatprep.mubr.f32.mxu1 %v7503_v0  ;;  %6548 = vmatprep.subr.bf16.mxu1 %v6547_v17  ;;  %v6565_v48 = vpack.c.bf16 %v364_v45, %v352_v43  ;;  %v433_v45 = vrot.slane %v391_v39, %v7868_v41 }
 0x118   :  { %6534 = vmatpush1.bf16.msra.mxu0 %v6533_v52  ;;  %798 = vmatmul.mubr.f32.gmra.mrb[12].mxu1 %v7768_v25  ;;  %v6569_v52 = vpack.c.bf16 %v388_v51, %v376_v50 }
 0x119   :  { %6536 = vmatprep.subr.bf16.mxu0 %v6535_v55  ;;  %6550 = vmatpush1.bf16.msra.mxu1 %v6549_v22  ;;  %v7818_v55 = vsub.s32 0, %v7815_v54 }
 0x11a   :  { %803 = vmatprep.mubr.f32.mxu1 %v7503_v0  ;;  %6552 = vmatprep.subr.bf16.mxu1 %v6551_v23 }
 0x11b   :  { %v429_v43 = vrot.slane %v391_v39, %v7818_v55 }
 0x11c   :  { %6538 = vmatpush1.bf16.msra.mxu0 %v6537_v63  ;;  %804 = vmatmul.mubr.f32.gmra.mrb[14].mxu1 %v7772_v38 }
 0x11d   :  { %6554 = vmatpush1.bf16.msra.mxu1 %v6553_v29  ;;  %963 = vmatprep.mubr.f32.mxu1 %v7503_v0 }
 0x11e   :  { %6556 = vmatprep.subr.bf16.mxu1 %v6555_v30 }
 0x11f   :  { %875 = vmatmul.mubr.f32.vlgmr.msra.gmra.mrb[16].mxu0 %v7760_v56 }
 0x120   :  { %880 = vmatprep.mubr.f32.mxu0 %v7503_v0 }
 0x121   :  { %6558 = vmatpush1.bf16.msra.mxu1 %v6557_v33 }
 0x122   :  { %6560 = vmatprep.subr.bf16.mxu1 %v6559_v36 }
 0x123   :  { %881 = vmatmul.mubr.f32.gmra.mrb[18].mxu0 %v7764_v11 }
 0x124   :  { %886 = vmatprep.mubr.f32.mxu0 %v7503_v0 }
 0x125   :  { %6562 = vmatpush1.bf16.msra.mxu1 %v6561_v40  ;;  %v420_v40 = vsub.s32 6, %v7815_v54 }
 0x126   :  { %6564 = vmatprep.subr.bf16.mxu1 %v6563_v44 }
 0x127   :  { %887 = vmatmul.mubr.f32.gmra.mrb[20].mxu0 %v7768_v25 }
 0x128   :  { %892 = vmatprep.mubr.f32.mxu0 %v7503_v0 }
 0x129   :  { %6566 = vmatpush1.bf16.msra.mxu1 %v6565_v48 }
 0x12a   :  { %6568 = vmatprep.subr.bf16.mxu1 %v6567_v49 }
 0x12b   :  { %893 = vmatmul.mubr.f32.gmra.mrb[22].mxu0 %v7772_v38 }
 0x12d   :  { %6570 = vmatpush1.bf16.msra.mxu1 %v6569_v52 }
 0x130   :  { %964 = vmatmul.mubr.f32.vlgmr.msra.gmra.mrb[16].mxu1 %v7760_v56  ;;  %v7823_v56 = vld [vmem:[%s8522_s24] sm:$0xff] }
 0x131   :  { %969 = vmatprep.mubr.f32.mxu1 %v7503_v0  ;;  %v413_v5 = vrot.slane %v7823_v56, %v412_v2  ;;  %v417_v7 = vrot.slane %v7823_v56, %v416_v3  ;;  %v421_v47 = vrot.slane %v7823_v56, %v420_v40  ;;  %v425_v49 = vrot.slane %v7823_v56, %v424_v42 }
 0x134   :  { %970 = vmatmul.mubr.f32.gmra.mrb[18].mxu1 %v7764_v11  ;;  %v397_v11 = vrot.slane %v7823_v56, %v7818_v55 }
 0x135   :  { %975 = vmatprep.mubr.f32.mxu1 %v7503_v0 }
 0x138   :  { %976 = vmatmul.mubr.f32.gmra.mrb[20].mxu1 %v7768_v25 }
 0x139   :  { %981 = vmatprep.mubr.f32.mxu1 %v7503_v0 }
 0x13c   :  { %982 = vmatmul.mubr.f32.gmra.mrb[22].mxu1 %v7772_v38 }
 0x1b2   :  { %v520_v25 = vpop.f32.mrb[0].mxu0 }
 0x1b3   :  { %v521_v57 = vadd.f32 %v520_v25, %v397_v11  ;;  %v7827_v58 = vpop.f32.mrb[1].mxu0 }
 0x1b5   :  { %6083 = vmatprep.mubr.f32.mxu0 %v521_v57 }
 0x1b6   :  { %v526_v38 = vpop.f32.mrb[2].mxu0 }
 0x1b7   :  { %v7829_v59 = vpop.f32.mrb[3].mxu0  ;;  %v527_v33 = vadd.f32 %v526_v38, %v397_v11 }
 0x1ba   :  { %v532_v60 = vpop.f32.mrb[4].mxu0 }
 0x1bb   :  { %v533_v61 = vadd.f32 %v532_v60, %v397_v11  ;;  %v7831_v62 = vpop.f32.mrb[5].mxu0 }
 0x1bd   :  { %6090 = vmatprep.mubr.f32.mxu1 %v533_v61 }
 0x1be   :  { %v538_v63 = vpop.f32.mrb[6].mxu0 }
 0x1bf   :  { %v7833_v1 = vpop.f32.mrb[7].mxu0  ;;  %v539_v37 = vadd.f32 %v538_v63, %v397_v11 }
 0x1c3   :  { %v7843_v8 = vpop.f32.mrb[0].mxu1 }
 0x1c4   :  { %v7845_v9 = vpop.f32.mrb[1].mxu1 }
 0x1c7   :  { %v7847_v17 = vpop.f32.mrb[2].mxu1 }
 0x1c8   :  { %v7849_v19 = vpop.f32.mrb[3].mxu1 }
 0x1cb   :  { %v7853_v23 = vpop.f32.mrb[4].mxu1 }
 0x1cc   :  { %v7855_v26 = vpop.f32.mrb[5].mxu1 }
 0x1cf   :  { %v7857_v32 = vpop.f32.mrb[6].mxu1 }
 0x1d0   :  { %v7859_v35 = vpop.f32.mrb[7].mxu1 }
 0x1d2   :  { %v698_v4 = vpop.f32.mrb[8].mxu0 }
 0x1d3   :  { %v700_v6 = vpop.f32.mrb[9].mxu0  ;;  %v699_v12 = vadd.f32 %v698_v4, %v413_v5 }
 0x1d4   :  { %v701_v15 = vadd.f32 %v700_v6, %v417_v7 }
 0x1d6   :  { %v704_v10 = vpop.f32.mrb[10].mxu0 }
 0x1d7   :  { %v705_v13 = vadd.f32 %v704_v10, %v413_v5  ;;  %v706_v14 = vpop.f32.mrb[11].mxu0 }
 0x1d8   :  { %v707_v16 = vadd.f32 %v706_v14, %v417_v7 }
 0x1d9   :  { %v6571_v18 = vpack.c.bf16 %v705_v13, %v699_v12 }
 0x1da   :  { %v7851_v20 = vpack.c.bf16 %v707_v16, %v701_v15  ;;  %v710_v21 = vpop.f32.mrb[12].mxu0 }
 0x1db   :  { %6572 = vmatprep.subr.bf16.mxu0 %v6571_v18  ;;  %v712_v22 = vpop.f32.mrb[13].mxu0  ;;  %v711_v24 = vadd.f32 %v710_v21, %v413_v5 }
 0x1dc   :  { %6574 = vmatpush3.bf16.xpose.msra.mxu0 %v6571_v18  ;;  %v713_v27 = vadd.f32 %v712_v22, %v417_v7 }
 0x1de   :  { %v716_v28 = vpop.f32.mrb[14].mxu0 }
 0x1df   :  { %v717_v29 = vadd.f32 %v716_v28, %v413_v5  ;;  %v718_v30 = vpop.f32.mrb[15].mxu0 }
 0x1e0   :  { %v719_v31 = vadd.f32 %v718_v30, %v417_v7 }
 0x1e1   :  { %v6575_v34 = vpack.c.bf16 %v717_v29, %v711_v24 }
 0x1e2   :  { %v7861_v36 = vpack.c.bf16 %v719_v31, %v713_v27 }
 0x1e3   :  { %6084 = vmatmul.mubr.f32.vlgmr.msra.gmra.mrb[24].mxu0 %v527_v33  ;;  %6576 = vmatprep.subr.bf16.mxu1 %v6575_v34  ;;  %v787_v48 = vpop.f32.mrb[8].mxu1 }
 0x1e4   :  { %6578 = vmatpush3.bf16.xpose.msra.mxu1 %v6575_v34  ;;  %v789_v51 = vpop.f32.mrb[9].mxu1  ;;  %v788_v38 = vadd.f32 %v787_v48, %v421_v47 }
 0x1e5   :  { %v790_v61 = vadd.f32 %v789_v51, %v425_v49 }
 0x1e7   :  { %v793_v63 = vpop.f32.mrb[10].mxu1 }
 0x1e8   :  { %v794_v5 = vadd.f32 %v793_v63, %v421_v47  ;;  %v795_v6 = vpop.f32.mrb[11].mxu1 }
 0x1e9   :  { %v796_v12 = vadd.f32 %v795_v6, %v425_v49 }
 0x1ea   :  { %v7881_v14 = vpack.c.bf16 %v794_v5, %v788_v38 }
 0x1eb   :  { %6091 = vmatmul.mubr.f32.vlgmr.msra.gmra.mrb[24].mxu1 %v539_v37  ;;  %v7883_v15 = vpack.c.bf16 %v796_v12, %v790_v61  ;;  %v799_v16 = vpop.f32.mrb[12].mxu1 }
 0x1ec   :  { %v801_v21 = vpop.f32.mrb[13].mxu1  ;;  %v800_v29 = vadd.f32 %v799_v16, %v421_v47 }
 0x1ed   :  { %v802_v31 = vadd.f32 %v801_v21, %v425_v49 }
 0x1ef   :  { %v805_v33 = vpop.f32.mrb[14].mxu1 }
 0x1f0   :  { %v806_v37 = vadd.f32 %v805_v33, %v421_v47  ;;  %v7898_v47 = vsub.s32 3, %v7815_v54 }
 0x1f2   :  { %v876_v44 = vpop.f32.mrb[16].mxu0 }
 0x1f3   :  { %v878_v46 = vpop.f32.mrb[17].mxu0  ;;  %v877_v50 = vadd.f32 %v876_v44, %v429_v43  ;;  %v807_v44 = vpop.f32.mrb[15].mxu1 }
 0x1f4   :  { %v879_v52 = vadd.f32 %v878_v46, %v433_v45  ;;  %v808_v48 = vadd.f32 %v807_v44, %v425_v49  ;;  %v441_v49 = vrot.slane %v391_v39, %v7898_v47 }
 0x1f6   :  { %v882_v11 = vpop.f32.mrb[18].mxu0  ;;  %v7890_v51 = vpack.c.bf16 %v808_v48, %v802_v31 }
 0x1f7   :  { %v883_v25 = vadd.f32 %v882_v11, %v429_v43  ;;  %v884_v57 = vpop.f32.mrb[19].mxu0 }
 0x1f8   :  { %v885_v60 = vadd.f32 %v884_v57, %v433_v45 }
 0x1f9   :  { %v6579_v4 = vpack.c.bf16 %v883_v25, %v877_v50  ;;  %v7888_v50 = vpack.c.bf16 %v806_v37, %v800_v29 }
 0x1fa   :  { %v7879_v7 = vpack.c.bf16 %v885_v60, %v879_v52  ;;  %v888_v10 = vpop.f32.mrb[20].mxu0  ;;  %v7894_v52 = vsub.s32 2, %v7815_v54 }
 0x1fb   :  { %6580 = vmatprep.subr.bf16.mxu0 %v6579_v4  ;;  %v890_v13 = vpop.f32.mrb[21].mxu0  ;;  %v889_v18 = vadd.f32 %v888_v10, %v429_v43 }
 0x1fc   :  { %6582 = vmatpush3.bf16.msra.mxu0 %v6579_v4  ;;  %v891_v22 = vadd.f32 %v890_v13, %v433_v45 }
 0x1fd   :  { %6588 = vmatprep.subr.bf16.mxu0 %v7851_v20 }
 0x1fe   :  { %v894_v24 = vpop.f32.mrb[22].mxu0 }
 0x1ff   :  { %v895_v27 = vadd.f32 %v894_v24, %v429_v43  ;;  %v896_v28 = vpop.f32.mrb[23].mxu0 }
 0x200   :  { %v897_v30 = vadd.f32 %v896_v28, %v433_v45  ;;  %v437_v45 = vrot.slane %v391_v39, %v7894_v52  ;;  %v189_v28 = vadd.s32 8, %v7815_v54 }
 0x201   :  { %v6583_v34 = vpack.c.bf16 %v895_v27, %v889_v18  ;;  %v191_v27 = vand.u32 127, %v187_v53 }
 0x202   :  { %v7886_v46 = vpack.c.bf16 %v897_v30, %v891_v22 }
 0x203   :  { %6584 = vmatprep.subr.bf16.mxu1 %v6583_v34  ;;  %v965_v43 = vpop.f32.mrb[16].mxu1  ;;  %vm7912_vm0 = vcmp.le.s32.totalorder %v191_v27, %v7815_v54  ;;  %vm7916_vm2 = vcmp.le.s32.totalorder %v191_v27, %v189_v28 }
 0x204   :  { %6586 = vmatpush3.bf16.msra.mxu1 %v6583_v34  ;;  %v966_v11 = vadd.f32 %v965_v43, %v437_v45  ;;  %v967_v25 = vpop.f32.mrb[17].mxu1 }
 0x205   :  { %6592 = vmatprep.subr.bf16.mxu1 %v7861_v36  ;;  %v968_v38 = vadd.f32 %v967_v25, %v441_v49 }
 0x207   :  { %v971_v57 = vpop.f32.mrb[18].mxu1 }
 0x208   :  { %v972_v60 = vadd.f32 %v971_v57, %v437_v45  ;;  %v973_v61 = vpop.f32.mrb[19].mxu1 }
 0x209   :  { %v974_v63 = vadd.f32 %v973_v61, %v441_v49 }
 0x20a   :  { %v7901_v5 = vpack.c.bf16 %v972_v60, %v966_v11 }
 0x20b   :  { %v977_v4 = vpop.f32.mrb[20].mxu1  ;;  %v7903_v12 = vpack.c.bf16 %v974_v63, %v968_v38 }
 0x20c   :  { %v978_v6 = vadd.f32 %v977_v4, %v437_v45  ;;  %v979_v10 = vpop.f32.mrb[21].mxu1 }
 0x20d   :  { %v980_v13 = vadd.f32 %v979_v10, %v441_v49 }
 0x20f   :  { %v983_v16 = vpop.f32.mrb[22].mxu1 }
 0x210   :  { %v984_v18 = vadd.f32 %v983_v16, %v437_v45  ;;  %v985_v21 = vpop.f32.mrb[23].mxu1 }
 0x211   :  { %v986_v22 = vadd.f32 %v985_v21, %v441_v49 }
 0x212   :  { %v7905_v24 = vpack.c.bf16 %v984_v18, %v978_v6 }
 0x213   :  { %v7907_v39 = vpack.c.bf16 %v986_v22, %v980_v13 }
 0x2b6   :  { %v6085_v29 = vpop.f32.mrb[24].mxu0 }
 0x2b7   :  { %v1054_v30 = vpop.f32.mrb[25].mxu0  ;;  %v1139_v33 = vmul.f32 0.088388346, %v6085_v29 }
 0x2b8   :  { %v1138_v34 = vmul.f32 0.088388346, %v1054_v30 }
 0x2b9   :  { %v1147_v48 = vsel %vm7916_vm2, %v1139_v33, -1e+09 }
 0x2ba   :  { %v1146_v44 = vsel %vm7912_vm0, %v1138_v34, -1e+09  ;;  %v1154_v11 = vsel %vm1150_vm1, %v1147_v48, -inf }
 0x2bb   :  { %v1151_v53 = vsel %vm1150_vm1, %v1146_v44, -inf }
 0x2bc   :  { %1152 = vmax.xlane.f32.xlu0 %v1151_v53 }
 0x2be   :  { %v6092_v43 = vpop.f32.mrb[24].mxu1 }
 0x2bf   :  { %v1129_v45 = vpop.f32.mrb[25].mxu1  ;;  %v1141_v49 = vmul.f32 0.088388346, %v6092_v43 }
 0x2c0   :  { %v1140_v25 = vmul.f32 0.088388346, %v1129_v45  ;;  %1155 = vmax.xlane.f32.xlu0 %v1154_v11 }
 0x2c1   :  { %v1149_v60 = vsel %vm7916_vm2, %v1141_v49, -1e+09 }
 0x2c2   :  { %v1148_v57 = vsel %vm7912_vm0, %v1140_v25, -1e+09  ;;  %v1160_v61 = vsel %vm1150_vm1, %v1149_v60, -inf }
 0x2c3   :  { %v1157_v38 = vsel %vm1150_vm1, %v1148_v57, -inf }
 0x2c4   :  { %1158 = vmax.xlane.f32.xlu1 %v1157_v38 }
 0x2c8   :  { %1161 = vmax.xlane.f32.xlu1 %v1160_v61  ;;  %v401_v61 = vrot.slane %v7823_v56, %v7868_v41 }
 0x349   :  { %v1153_v63 = vpop.xlane.xlu0 %1152 }
 0x34a   :  { %v1163_v4 = vsub.f32 %v1146_v44, %v1153_v63 }
 0x34c   :  { %v1167_v6 = vmul.f32 1.442695, %v1163_v4 }
 0x34d   :  { %v1156_v10 = vpop.xlane.xlu0 %1155 }
 0x34e   :  { %7098 = vpow2.f32 %v1167_v6  ;;  %v1164_v13 = vsub.f32 %v1147_v48, %v1156_v10  ;;  %v523_v6 = vadd.f32 %v7827_v58, %v401_v61  ;;  %v541_v58 = vadd.f32 %v7833_v1, %v401_v61 }
 0x350   :  { %v1169_v16 = vmul.f32 1.442695, %v1164_v13 }
 0x351   :  { %v1159_v18 = vpop.xlane.xlu1 %1158 }
 0x352   :  { %7100 = vpow2.f32 %v1169_v16  ;;  %v1165_v21 = vsub.f32 %v1148_v57, %v1159_v18  ;;  %v529_v18 = vadd.f32 %v7829_v59, %v401_v61 }
 0x354   :  { %v1171_v22 = vmul.f32 1.442695, %v1165_v21 }
 0x355   :  { %v1162_v27 = vpop.xlane.xlu1 %1161 }
 0x356   :  { %7102 = vpow2.f32 %v1171_v22  ;;  %v1166_v28 = vsub.f32 %v1149_v60, %v1162_v27  ;;  %v535_v22 = vadd.f32 %v7831_v62, %v401_v61 }
 0x358   :  { %v7099_v29 = vpop.eup %7098  ;;  %v1173_v30 = vmul.f32 1.442695, %v1166_v28 }
 0x359   :  { %v1175_v33 = vsel %vm1150_vm1, %v7099_v29, 0.0 }
 0x35a   :  { %7104 = vpow2.f32 %v1173_v30  ;;  %1176 = vadd.xlane.f32.xlu0 %v1175_v33 }
 0x35c   :  { %v7101_v34 = vpop.eup %7100 }
 0x35d   :  { %v1178_v44 = vsel %vm1150_vm1, %v7101_v34, 0.0 }
 0x35e   :  { %1179 = vadd.xlane.f32.xlu1 %v1178_v44 }
 0x360   :  { %v7103_v53 = vpop.eup %7102 }
 0x361   :  { %v1181_v48 = vsel %vm1150_vm1, %v7103_v53, 0.0 }
 0x362   :  { %1182 = vadd.xlane.f32.xlu0 %v1181_v48 }
 0x364   :  { %v7105_v43 = vpop.eup %7104 }
 0x365   :  { %v1184_v45 = vsel %vm1150_vm1, %v7105_v43, 0.0 }
 0x366   :  { %1185 = vadd.xlane.f32.xlu1 %v1184_v45 }
 0x3e7   :  { %v1177_v11 = vpop.xlane.xlu0 %1176 }
 0x3e8   :  { %7106 = vrcp.f32 %v1177_v11 }
 0x3eb   :  { %v1180_v49 = vpop.xlane.xlu1 %1179 }
 0x3ec   :  { %7108 = vrcp.f32 %v1180_v49 }
 0x3ef   :  { %v1183_v25 = vpop.xlane.xlu0 %1182 }
 0x3f0   :  { %7110 = vrcp.f32 %v1183_v25 }
 0x3f2   :  { %v7107_v57 = vpop.eup %7106 }
 0x3f3   :  { %v1186_v38 = vpop.xlane.xlu1 %1185  ;;  %v1188_v60 = vmul.f32 %v7107_v57, %v7099_v29 }
 0x3f4   :  { %7112 = vrcp.f32 %v1186_v38 }
 0x3f5   :  { %6097 = vmatprep.mubr.msk.f32.mxu0 %vm1150_vm1, %v1188_v60 }
 0x3f6   :  { %v7109_v63 = vpop.eup %7108 }
 0x3f7   :  { %v1190_v4 = vmul.f32 %v7109_v63, %v7101_v34 }
 0x3f9   :  { %6098 = vmatmul.mubr.msk.f32.vlgmr.msra.gmra.mrb[26].mxu0 %vm1150_vm1, %v1190_v4 }
 0x3fa   :  { %v7111_v10 = vpop.eup %7110  ;;  %6590 = vmatpush3.bf16.xpose.msra.mxu0 %v7851_v20  ;;  %6111 = vmatprep.mubr.f32.mxu0 %v523_v6 }
 0x3fb   :  { %6596 = vmatprep.subr.bf16.mxu0 %v7879_v7  ;;  %v1192_v13 = vmul.f32 %v7111_v10, %v7103_v53 }
 0x3fd   :  { %6104 = vmatprep.mubr.msk.f32.mxu1 %vm1150_vm1, %v1192_v13 }
 0x3fe   :  { %v7113_v16 = vpop.eup %7112 }
 0x3ff   :  { %v1194_v21 = vmul.f32 %v7113_v16, %v7105_v43 }
 0x401   :  { %6112 = vmatmul.mubr.f32.vlgmr.msra.gmra.mrb[28].mxu0 %v529_v18  ;;  %6105 = vmatmul.mubr.msk.f32.vlgmr.msra.gmra.mrb[26].mxu1 %vm1150_vm1, %v1194_v21 }
 0x402   :  { %6594 = vmatpush3.bf16.xpose.msra.mxu1 %v7861_v36  ;;  %6598 = vmatpush3.bf16.msra.mxu0 %v7879_v7 }
 0x403   :  { %6118 = vmatprep.mubr.f32.mxu1 %v535_v22  ;;  %6600 = vmatprep.subr.bf16.mxu1 %v7886_v46 }
 0x404   :  { %6604 = vmatprep.subr.bf16.mxu0 %v7881_v14 }
 0x409   :  { %6119 = vmatmul.mubr.f32.vlgmr.msra.gmra.mrb[28].mxu1 %v541_v58 }
 0x40a   :  { %6602 = vmatpush3.bf16.msra.mxu1 %v7886_v46 }
 0x40b   :  { %6608 = vmatprep.subr.bf16.mxu1 %v7888_v50 }
 0x4cc   :  { %v7954_v59 = vpop.f32.mrb[26].mxu0 }
 0x4cd   :  { %v7956_v62 = vpop.f32.mrb[27].mxu0 }
 0x4d4   :  { %v6113_v20 = vpop.f32.mrb[28].mxu0  ;;  %v7958_v36 = vpop.f32.mrb[26].mxu1 }
 0x4d5   :  { %v1508_v7 = vmul.f32 0.088388346, %v6113_v20  ;;  %v1423_v27 = vpop.f32.mrb[29].mxu0  ;;  %v7960_v28 = vpop.f32.mrb[27].mxu1 }
 0x4d6   :  { %v1507_v29 = vmul.f32 0.088388346, %v1423_v27 }
 0x4d7   :  { %v1512_v1 = vsel %vm7916_vm2, %v1508_v7, -1e+09 }
 0x4d8   :  { %v1518_v30 = vsel %vm1150_vm1, %v1512_v1, -inf  ;;  %v1511_v46 = vsel %vm7912_vm0, %v1507_v29, -1e+09 }
 0x4d9   :  { %1519 = vmax.xlane.f32.xlu1 %v1518_v30  ;;  %v1515_v33 = vsel %vm1150_vm1, %v1511_v46, -inf }
 0x4da   :  { %1516 = vmax.xlane.f32.xlu0 %v1515_v33 }
 0x4dc   :  { %v6120_v34 = vpop.f32.mrb[28].mxu1 }
 0x4dd   :  { %v1510_v44 = vmul.f32 0.088388346, %v6120_v34  ;;  %v1498_v53 = vpop.f32.mrb[29].mxu1 }
 0x4de   :  { %v1509_v48 = vmul.f32 0.088388346, %v1498_v53  ;;  %v405_v53 = vrot.slane %v7823_v56, %v7894_v52 }
 0x4df   :  { %v1514_v43 = vsel %vm7916_vm2, %v1510_v44, -1e+09 }
 0x4e0   :  { %v1524_v45 = vsel %vm1150_vm1, %v1514_v43, -inf  ;;  %v1513_v11 = vsel %vm7912_vm0, %v1509_v48, -1e+09 }
 0x4e1   :  { %1525 = vmax.xlane.f32.xlu1 %v1524_v45  ;;  %v1521_v49 = vsel %vm1150_vm1, %v1513_v11, -inf }
 0x4e2   :  { %1522 = vmax.xlane.f32.xlu0 %v1521_v49 }
 0x566   :  { %v1520_v25 = vpop.xlane.xlu1 %1519 }
 0x567   :  { %v1528_v57 = vsub.f32 %v1512_v1, %v1520_v25  ;;  %v1517_v38 = vpop.xlane.xlu0 %1516 }
 0x568   :  { %v1527_v60 = vsub.f32 %v1511_v46, %v1517_v38  ;;  %v616_v38 = vadd.f32 %v7847_v17, %v405_v53 }
 0x569   :  { %v1533_v61 = vmul.f32 1.442695, %v1528_v57 }
 0x56a   :  { %v1531_v63 = vmul.f32 1.442695, %v1527_v60 }
 0x56b   :  { %7114 = vpow2.f32 %v1533_v61  ;;  %v622_v61 = vadd.f32 %v7853_v23, %v405_v53 }
 0x56c   :  { %7116 = vpow2.f32 %v1531_v63 }
 0x56e   :  { %v1526_v4 = vpop.xlane.xlu1 %1525 }
 0x56f   :  { %v1530_v6 = vsub.f32 %v1514_v43, %v1526_v4  ;;  %v1523_v10 = vpop.xlane.xlu0 %1522 }
 0x570   :  { %v1529_v13 = vsub.f32 %v1513_v11, %v1523_v10  ;;  %v610_v11 = vadd.f32 %v7843_v8, %v405_v53  ;;  %v628_v8 = vadd.f32 %v7857_v32, %v405_v53 }
 0x571   :  { %v1537_v16 = vmul.f32 1.442695, %v1530_v6 }
 0x572   :  { %v1535_v18 = vmul.f32 1.442695, %v1529_v13 }
 0x573   :  { %7118 = vpow2.f32 %v1537_v16 }
 0x574   :  { %7120 = vpow2.f32 %v1535_v18 }
 0x575   :  { %v7115_v21 = vpop.eup %7114 }
 0x576   :  { %v7117_v22 = vpop.eup %7116  ;;  %v1542_v58 = vsel %vm1150_vm1, %v7115_v21, 0.0 }
 0x577   :  { %1543 = vadd.xlane.f32.xlu1 %v1542_v58  ;;  %v1539_v20 = vsel %vm1150_vm1, %v7117_v22, 0.0 }
 0x578   :  { %1540 = vadd.xlane.f32.xlu0 %v1539_v20 }
 0x57d   :  { %v7119_v7 = vpop.eup %7118 }
 0x57e   :  { %v7121_v27 = vpop.eup %7120  ;;  %v1548_v29 = vsel %vm1150_vm1, %v7119_v7, 0.0 }
 0x57f   :  { %1549 = vadd.xlane.f32.xlu1 %v1548_v29  ;;  %v1545_v1 = vsel %vm1150_vm1, %v7121_v27, 0.0 }
 0x580   :  { %1546 = vadd.xlane.f32.xlu0 %v1545_v1 }
 0x604   :  { %v1544_v30 = vpop.xlane.xlu1 %1543 }
 0x605   :  { %7122 = vrcp.f32 %v1544_v30  ;;  %v1541_v46 = vpop.xlane.xlu0 %1540 }
 0x606   :  { %7124 = vrcp.f32 %v1541_v46 }
 0x60c   :  { %v1550_v33 = vpop.xlane.xlu1 %1549 }
 0x60d   :  { %7126 = vrcp.f32 %v1550_v33  ;;  %v1547_v34 = vpop.xlane.xlu0 %1546 }
 0x60e   :  { %7128 = vrcp.f32 %v1547_v34 }
 0x60f   :  { %v7123_v44 = vpop.eup %7122 }
 0x610   :  { %v7125_v48 = vpop.eup %7124  ;;  %v1554_v45 = vmul.f32 %v7123_v44, %v7115_v21 }
 0x611   :  { %v1552_v43 = vmul.f32 %v7125_v48, %v7117_v22 }
 0x613   :  { %6125 = vmatprep.mubr.msk.f32.mxu0 %vm1150_vm1, %v1552_v43 }
 0x614   :  { %6126 = vmatmul.mubr.msk.f32.vlgmr.msra.gmra.mrb[30].mxu0 %vm1150_vm1, %v1554_v45 }
 0x615   :  { %6606 = vmatpush3.bf16.xpose.msra.mxu0 %v7881_v14  ;;  %6139 = vmatprep.mubr.f32.mxu0 %v610_v11 }
 0x616   :  { %6612 = vmatprep.subr.bf16.mxu0 %v7901_v5 }
 0x617   :  { %v7127_v49 = vpop.eup %7126 }
 0x618   :  { %v7129_v25 = vpop.eup %7128  ;;  %v1558_v60 = vmul.f32 %v7127_v49, %v7119_v7 }
 0x619   :  { %v1556_v57 = vmul.f32 %v7129_v25, %v7121_v27 }
 0x61b   :  { %6132 = vmatprep.mubr.msk.f32.mxu1 %vm1150_vm1, %v1556_v57 }
 0x61c   :  { %6140 = vmatmul.mubr.f32.vlgmr.msra.gmra.mrb[32].mxu0 %v616_v38  ;;  %6133 = vmatmul.mubr.msk.f32.vlgmr.msra.gmra.mrb[30].mxu1 %vm1150_vm1, %v1558_v60 }
 0x61d   :  { %6610 = vmatpush3.bf16.xpose.msra.mxu1 %v7888_v50  ;;  %6614 = vmatpush3.bf16.msra.mxu0 %v7901_v5 }
 0x61e   :  { %6146 = vmatprep.mubr.f32.mxu1 %v622_v61  ;;  %6616 = vmatprep.subr.bf16.mxu1 %v7905_v24 }
 0x61f   :  { %6620 = vmatprep.subr.bf16.mxu0 %v7883_v15 }
 0x624   :  { %6147 = vmatmul.mubr.f32.vlgmr.msra.gmra.mrb[32].mxu1 %v628_v8 }
 0x625   :  { %6618 = vmatpush3.bf16.msra.mxu1 %v7905_v24 }
 0x626   :  { %6624 = vmatprep.subr.bf16.mxu1 %v7890_v51 }
 0x6e7   :  { %v7996_v17 = vpop.f32.mrb[30].mxu0 }
 0x6e8   :  { %v7998_v23 = vpop.f32.mrb[31].mxu0 }
 0x6ef   :  { %v6141_v14 = vpop.f32.mrb[32].mxu0  ;;  %v8000_v50 = vpop.f32.mrb[30].mxu1 }
 0x6f0   :  { %v1872_v5 = vmul.f32 0.088388346, %v6141_v14  ;;  %v1787_v63 = vpop.f32.mrb[33].mxu0  ;;  %v8002_v4 = vpop.f32.mrb[31].mxu1 }
 0x6f1   :  { %v1871_v6 = vmul.f32 0.088388346, %v1787_v63 }
 0x6f2   :  { %v1876_v32 = vsel %vm7916_vm2, %v1872_v5, -1e+09 }
 0x6f3   :  { %v1882_v10 = vsel %vm1150_vm1, %v1876_v32, -inf  ;;  %v1875_v24 = vsel %vm7912_vm0, %v1871_v6, -1e+09 }
 0x6f4   :  { %1883 = vmax.xlane.f32.xlu1 %v1882_v10  ;;  %v1879_v13 = vsel %vm1150_vm1, %v1875_v24, -inf }
 0x6f5   :  { %1880 = vmax.xlane.f32.xlu0 %v1879_v13 }
 0x6f7   :  { %v6148_v16 = vpop.f32.mrb[32].mxu1 }
 0x6f8   :  { %v1874_v18 = vmul.f32 0.088388346, %v6148_v16  ;;  %v1862_v21 = vpop.f32.mrb[33].mxu1 }
 0x6f9   :  { %v1873_v22 = vmul.f32 0.088388346, %v1862_v21 }
 0x6fa   :  { %v1878_v58 = vsel %vm7916_vm2, %v1874_v18, -1e+09 }
 0x6fb   :  { %v1888_v20 = vsel %vm1150_vm1, %v1878_v58, -inf  ;;  %v1877_v7 = vsel %vm7912_vm0, %v1873_v22, -1e+09 }
 0x6fc   :  { %1889 = vmax.xlane.f32.xlu1 %v1888_v20  ;;  %v1885_v27 = vsel %vm1150_vm1, %v1877_v7, -inf }
 0x6fd   :  { %1886 = vmax.xlane.f32.xlu0 %v1885_v27 }
 0x781   :  { %v1884_v29 = vpop.xlane.xlu1 %1883 }
 0x782   :  { %v1892_v1 = vsub.f32 %v1876_v32, %v1884_v29  ;;  %v1881_v30 = vpop.xlane.xlu0 %1880 }
 0x783   :  { %v1891_v46 = vsub.f32 %v1875_v24, %v1881_v30  ;;  %v409_v24 = vrot.slane %v7823_v56, %v7898_v47 }
 0x784   :  { %v1897_v33 = vmul.f32 1.442695, %v1892_v1 }
 0x785   :  { %v1895_v34 = vmul.f32 1.442695, %v1891_v46  ;;  %v612_v21 = vadd.f32 %v7845_v9, %v409_v24  ;;  %v624_v27 = vadd.f32 %v7855_v26, %v409_v24  ;;  %v630_v9 = vadd.f32 %v7859_v35, %v409_v24 }
 0x786   :  { %7130 = vpow2.f32 %v1897_v33 }
 0x787   :  { %7132 = vpow2.f32 %v1895_v34 }
 0x789   :  { %v1890_v44 = vpop.xlane.xlu1 %1889 }
 0x78a   :  { %v1894_v53 = vsub.f32 %v1878_v58, %v1890_v44  ;;  %v1887_v48 = vpop.xlane.xlu0 %1886 }
 0x78b   :  { %v1893_v43 = vsub.f32 %v1877_v7, %v1887_v48  ;;  %v618_v7 = vadd.f32 %v7849_v19, %v409_v24 }
 0x78c   :  { %v1901_v45 = vmul.f32 1.442695, %v1894_v53 }
 0x78d   :  { %v1899_v11 = vmul.f32 1.442695, %v1893_v43 }
 0x78e   :  { %7134 = vpow2.f32 %v1901_v45 }
 0x78f   :  { %7136 = vpow2.f32 %v1899_v11 }
 0x790   :  { %v7131_v49 = vpop.eup %7130 }
 0x791   :  { %v7133_v25 = vpop.eup %7132  ;;  %v1906_v57 = vsel %vm1150_vm1, %v7131_v49, 0.0 }
 0x792   :  { %1907 = vadd.xlane.f32.xlu1 %v1906_v57  ;;  %v1903_v38 = vsel %vm1150_vm1, %v7133_v25, 0.0 }
 0x793   :  { %1904 = vadd.xlane.f32.xlu0 %v1903_v38 }
 0x798   :  { %v7135_v60 = vpop.eup %7134 }
 0x799   :  { %v7137_v61 = vpop.eup %7136  ;;  %v1912_v8 = vsel %vm1150_vm1, %v7135_v60, 0.0 }
 0x79a   :  { %1913 = vadd.xlane.f32.xlu1 %v1912_v8  ;;  %v1909_v14 = vsel %vm1150_vm1, %v7137_v61, 0.0 }
 0x79b   :  { %1910 = vadd.xlane.f32.xlu0 %v1909_v14 }
 0x81f   :  { %v1908_v5 = vpop.xlane.xlu1 %1907 }
 0x820   :  { %7138 = vrcp.f32 %v1908_v5  ;;  %v1905_v63 = vpop.xlane.xlu0 %1904 }
 0x821   :  { %7140 = vrcp.f32 %v1905_v63 }
 0x827   :  { %v1914_v6 = vpop.xlane.xlu1 %1913 }
 0x828   :  { %7142 = vrcp.f32 %v1914_v6  ;;  %v1911_v32 = vpop.xlane.xlu0 %1910 }
 0x829   :  { %7144 = vrcp.f32 %v1911_v32 }
 0x82a   :  { %v7139_v10 = vpop.eup %7138 }
 0x82b   :  { %v7141_v13 = vpop.eup %7140  ;;  %v1918_v18 = vmul.f32 %v7139_v10, %v7131_v49 }
 0x82c   :  { %v1916_v16 = vmul.f32 %v7141_v13, %v7133_v25 }
 0x82e   :  { %6153 = vmatprep.mubr.msk.f32.mxu0 %vm1150_vm1, %v1916_v16 }
 0x82f   :  { %6154 = vmatmul.mubr.msk.f32.vlgmr.msra.gmra.mrb[34].mxu0 %vm1150_vm1, %v1918_v18 }
 0x830   :  { %6622 = vmatpush3.bf16.xpose.msra.mxu0 %v7883_v15  ;;  %6167 = vmatprep.mubr.f32.mxu0 %v612_v21 }
 0x831   :  { %6628 = vmatprep.subr.bf16.mxu0 %v7903_v12 }
 0x832   :  { %v7143_v22 = vpop.eup %7142 }
 0x833   :  { %v7145_v58 = vpop.eup %7144  ;;  %v1922_v56 = vmul.f32 %v7143_v22, %v7135_v60 }
 0x834   :  { %v1920_v20 = vmul.f32 %v7145_v58, %v7137_v61 }
 0x836   :  { %6160 = vmatprep.mubr.msk.f32.mxu1 %vm1150_vm1, %v1920_v20 }
 0x837   :  { %6168 = vmatmul.mubr.f32.vlgmr.msra.gmra.mrb[36].mxu0 %v618_v7  ;;  %6161 = vmatmul.mubr.msk.f32.vlgmr.msra.gmra.mrb[34].mxu1 %vm1150_vm1, %v1922_v56  ;;  %v2465_v7 = vld [vmem:[#allocation7 + $0x80] sm:$0xff]  ;;  %v2466_v56 = vld [vmem:[#allocation7 + $0x88] sm:$0xff] }
 0x838   :  { %6626 = vmatpush3.bf16.xpose.msra.mxu1 %v7890_v51  ;;  %6630 = vmatpush3.bf16.msra.mxu0 %v7903_v12 }
 0x839   :  { %6174 = vmatprep.mubr.f32.mxu1 %v624_v27  ;;  %6632 = vmatprep.subr.bf16.mxu1 %v7907_v39  ;;  %v6635_v27 = vpack.c.bf16 %v2466_v56, %v2465_v7  ;;  %v2455_v7 = vld [vmem:[#allocation7 + $0x30] sm:$0xff]  ;;  %v2456_v56 = vld [vmem:[#allocation7 + $0x38] sm:$0xff] }
 0x83b   :  { %6636 = vmatprep.subr.bf16.mxu0 %v6635_v27 }
 0x83f   :  { %6175 = vmatmul.mubr.f32.vlgmr.msra.gmra.mrb[36].mxu1 %v630_v9  ;;  %v2497_v9 = vld [vmem:[#allocation7 + $0x180] sm:$0xff] }
 0x840   :  { %6634 = vmatpush3.bf16.msra.mxu1 %v7907_v39 }
 0x902   :  { %v8036_v19 = vpop.f32.mrb[34].mxu0 }
 0x903   :  { %v8038_v15 = vpop.f32.mrb[35].mxu0 }
 0x90a   :  { %v6169_v26 = vpop.f32.mrb[36].mxu0  ;;  %v8040_v29 = vpop.f32.mrb[34].mxu1 }
 0x90b   :  { %v2236_v1 = vmul.f32 0.088388346, %v6169_v26  ;;  %v2151_v30 = vpop.f32.mrb[37].mxu0  ;;  %v8042_v51 = vpop.f32.mrb[35].mxu1  ;;  %v2498_v26 = vld [vmem:[#allocation7 + $0x188] sm:$0xff] }
 0x90c   :  { %v2235_v12 = vmul.f32 0.088388346, %v2151_v30 }
 0x90d   :  { %v2240_v46 = vsel %vm7916_vm2, %v2236_v1, -1e+09  ;;  %v6667_v1 = vpack.c.bf16 %v2498_v26, %v2497_v9  ;;  %v2473_v26 = vld [vmem:[#allocation7 + $0xc0] sm:$0xff] }
 0x90e   :  { %v2246_v35 = vsel %vm1150_vm1, %v2240_v46, -inf  ;;  %v2239_v39 = vsel %vm7912_vm0, %v2235_v12, -1e+09 }
 0x90f   :  { %2247 = vmax.xlane.f32.xlu1 %v2246_v35  ;;  %v2243_v33 = vsel %vm1150_vm1, %v2239_v39, -inf  ;;  %6668 = vmatprep.subr.bf16.mxu1 %v6667_v1 }
 0x910   :  { %2244 = vmax.xlane.f32.xlu0 %v2243_v33  ;;  %v2450_v33 = vld [vmem:[#allocation7 + $0x8] sm:$0xff] }
 0x912   :  { %v6176_v34 = vpop.f32.mrb[36].mxu1 }
 0x913   :  { %v2238_v44 = vmul.f32 0.088388346, %v6176_v34  ;;  %v2226_v53 = vpop.f32.mrb[37].mxu1 }
 0x914   :  { %v2237_v48 = vmul.f32 0.088388346, %v2226_v53  ;;  %v2468_v53 = vld [vmem:[#allocation7 + $0x98] sm:$0xff] }
 0x915   :  { %v2242_v43 = vsel %vm7916_vm2, %v2238_v44, -1e+09  ;;  %v2467_v44 = vld [vmem:[#allocation7 + $0x90] sm:$0xff] }
 0x916   :  { %v2252_v45 = vsel %vm1150_vm1, %v2242_v43, -inf  ;;  %v2241_v11 = vsel %vm7912_vm0, %v2237_v48, -1e+09 }
 0x917   :  { %2253 = vmax.xlane.f32.xlu1 %v2252_v45  ;;  %v2249_v49 = vsel %vm1150_vm1, %v2241_v11, -inf }
 0x918   :  { %2250 = vmax.xlane.f32.xlu0 %v2249_v49  ;;  %v6639_v49 = vpack.c.bf16 %v2468_v53, %v2467_v44  ;;  %v2475_v53 = vld [vmem:[#allocation7 + $0xd0] sm:$0xff] }
 0x99c   :  { %v2248_v25 = vpop.xlane.xlu1 %2247 }
 0x99d   :  { %v2256_v57 = vsub.f32 %v2240_v46, %v2248_v25  ;;  %v2245_v38 = vpop.xlane.xlu0 %2244  ;;  %v2451_v25 = vld [vmem:[#allocation7 + $0x10] sm:$0xff] }
 0x99e   :  { %v2255_v60 = vsub.f32 %v2239_v39, %v2245_v38  ;;  %v2449_v39 = vld [vmem:[#allocation7] sm:$0xff] }
 0x99f   :  { %v2261_v61 = vmul.f32 1.442695, %v2256_v57  ;;  %v6637_v45 = vpack.c.bf16 %v2450_v33, %v2449_v39  ;;  %v2452_v57 = vld [vmem:[#allocation7 + $0x18] sm:$0xff]  ;;  %v2469_v38 = vld [vmem:[#allocation7 + $0xa0] sm:$0xff]  ;;  %v2502_v39 = vld [vmem:[#allocation7 + $0x1a8] sm:$0xff] }
 0x9a0   :  { %v2259_v8 = vmul.f32 1.442695, %v2255_v60  ;;  %v2470_v60 = vld [vmem:[#allocation7 + $0xa8] sm:$0xff]  ;;  %v2457_v33 = vld [vmem:[#allocation7 + $0x40] sm:$0xff] }
 0x9a1   :  { %7146 = vpow2.f32 %v2261_v61  ;;  %v6641_v61 = vpack.c.bf16 %v2452_v57, %v2451_v25  ;;  %v2504_v25 = vld [vmem:[#allocation7 + $0x1b8] sm:$0xff] }
 0x9a2   :  { %7148 = vpow2.f32 %v2259_v8  ;;  %v2453_v8 = vld [vmem:[#allocation7 + $0x20] sm:$0xff] }
 0x9a4   :  { %v2254_v14 = vpop.xlane.xlu1 %2253 }
 0x9a5   :  { %v2258_v5 = vsub.f32 %v2242_v43, %v2254_v14  ;;  %v2251_v63 = vpop.xlane.xlu0 %2250  ;;  %v2454_v14 = vld [vmem:[#allocation7 + $0x28] sm:$0xff] }
 0x9a6   :  { %v2257_v6 = vsub.f32 %v2241_v11, %v2251_v63  ;;  %v2471_v63 = vld [vmem:[#allocation7 + $0xb0] sm:$0xff] }
 0x9a7   :  { %v2265_v32 = vmul.f32 1.442695, %v2258_v5  ;;  %v6643_v5 = vpack.c.bf16 %v2470_v60, %v2469_v38  ;;  %v2459_v38 = vld [vmem:[#allocation7 + $0x50] sm:$0xff]  ;;  %v2460_v60 = vld [vmem:[#allocation7 + $0x58] sm:$0xff] }
 0x9a8   :  { %v2263_v10 = vmul.f32 1.442695, %v2257_v6  ;;  %v2481_v6 = vld [vmem:[#allocation7 + $0x100] sm:$0xff] }
 0x9a9   :  { %7150 = vpow2.f32 %v2265_v32  ;;  %v2482_v32 = vld [vmem:[#allocation7 + $0x108] sm:$0xff] }
 0x9aa   :  { %7152 = vpow2.f32 %v2263_v10  ;;  %v6669_v27 = vpack.c.bf16 %v2482_v32, %v2481_v6  ;;  %v2488_v6 = vld [vmem:[#allocation7 + $0x138] sm:$0xff]  ;;  %v2478_v32 = vld [vmem:[#allocation7 + $0xe8] sm:$0xff] }
 0x9ab   :  { %v7147_v24 = vpop.eup %7146 }
 0x9ac   :  { %v7149_v13 = vpop.eup %7148  ;;  %v2270_v16 = vsel %vm1150_vm1, %v7147_v24, 0.0 }
 0x9ad   :  { %2271 = vadd.xlane.f32.xlu1 %v2270_v16  ;;  %v2267_v18 = vsel %vm1150_vm1, %v7149_v13, 0.0  ;;  %v2500_v16 = vld [vmem:[#allocation7 + $0x198] sm:$0xff] }
 0x9ae   :  { %2268 = vadd.xlane.f32.xlu0 %v2267_v18 }
 0x9b3   :  { %v7151_v21 = vpop.eup %7150 }
 0x9b4   :  { %v7153_v22 = vpop.eup %7152  ;;  %v2276_v58 = vsel %vm1150_vm1, %v7151_v21, 0.0 }
 0x9b5   :  { %2277 = vadd.xlane.f32.xlu1 %v2276_v58  ;;  %v2273_v20 = vsel %vm1150_vm1, %v7153_v22, 0.0 }
 0x9b6   :  { %2274 = vadd.xlane.f32.xlu0 %v2273_v20  ;;  %v6645_v20 = vpack.c.bf16 %v2454_v14, %v2453_v8  ;;  %v2477_v14 = vld [vmem:[#allocation7 + $0xe0] sm:$0xff] }
 0xa3a   :  { %v2272_v30 = vpop.xlane.xlu1 %2271 }
 0xa3b   :  { %7154 = vrcp.f32 %v2272_v30  ;;  %v2269_v12 = vpop.xlane.xlu0 %2268  ;;  %v2483_v30 = vld [vmem:[#allocation7 + $0x110] sm:$0xff] }
 0xa3c   :  { %7156 = vrcp.f32 %v2269_v12  ;;  %v2484_v12 = vld [vmem:[#allocation7 + $0x118] sm:$0xff] }
 0xa3d   :  { %v6673_v44 = vpack.c.bf16 %v2484_v12, %v2483_v30  ;;  %v2463_v12 = vld [vmem:[#allocation7 + $0x70] sm:$0xff] }
 0xa42   :  { %v2278_v46 = vpop.xlane.xlu1 %2277 }
 0xa43   :  { %7158 = vrcp.f32 %v2278_v46  ;;  %v2275_v35 = vpop.xlane.xlu0 %2274  ;;  %v2474_v46 = vld [vmem:[#allocation7 + $0xc8] sm:$0xff] }
 0xa44   :  { %7160 = vrcp.f32 %v2275_v35  ;;  %v2501_v35 = vld [vmem:[#allocation7 + $0x1a0] sm:$0xff] }
 0xa45   :  { %v7155_v34 = vpop.eup %7154 }
 0xa46   :  { %v7157_v48 = vpop.eup %7156  ;;  %v2282_v11 = vmul.f32 %v7155_v34, %v7147_v24  ;;  %v2472_v24 = vld [vmem:[#allocation7 + $0xb8] sm:$0xff]  ;;  %v2458_v34 = vld [vmem:[#allocation7 + $0x48] sm:$0xff] }
 0xa47   :  { %v2280_v43 = vmul.f32 %v7157_v48, %v7149_v13  ;;  %v2499_v13 = vld [vmem:[#allocation7 + $0x190] sm:$0xff]  ;;  %v6647_v9 = vpack.c.bf16 %v2472_v24, %v2471_v63  ;;  %v6675_v48 = vpack.c.bf16 %v2502_v39, %v2501_v35  ;;  %v6653_v57 = vpack.c.bf16 %v2458_v34, %v2457_v33  ;;  %v2506_v24 = vld [vmem:[#allocation7 + $0x1c8] sm:$0xff]  ;;  %v2464_v39 = vld [vmem:[#allocation7 + $0x78] sm:$0xff] }
 0xa48   :  { %v6671_v1 = vpack.c.bf16 %v2500_v16, %v2499_v13  ;;  %v2487_v63 = vld [vmem:[#allocation7 + $0x130] sm:$0xff]  ;;  %v6657_v13 = vpack.c.bf16 %v2460_v60, %v2459_v38  ;;  %v2461_v16 = vld [vmem:[#allocation7 + $0x60] sm:$0xff]  ;;  %v2492_v34 = vld [vmem:[#allocation7 + $0x158] sm:$0xff] }
 0xa49   :  { %6181 = vmatprep.mubr.msk.f32.mxu0 %vm1150_vm1, %v2280_v43  ;;  %v2485_v43 = vld [vmem:[#allocation7 + $0x120] sm:$0xff]  ;;  %v2491_v33 = vld [vmem:[#allocation7 + $0x150] sm:$0xff] }
 0xa4a   :  { %6182 = vmatmul.mubr.msk.f32.vlgmr.msra.gmra.mrb[38].mxu0 %vm1150_vm1, %v2282_v11  ;;  %v2476_v11 = vld [vmem:[#allocation7 + $0xd8] sm:$0xff]  ;;  %v2495_v60 = vld [vmem:[#allocation7 + $0x170] sm:$0xff] }
 0xa4b   :  { %6638 = vmatpush3.bf16.msra.mxu0 %v6637_v45  ;;  %2584 = vmatprep.mubr.f32.mxu0 %v7998_v23  ;;  %v2486_v45 = vld [vmem:[#allocation7 + $0x128] sm:$0xff]  ;;  %v6655_v8 = vpack.c.bf16 %v2476_v11, %v2475_v53  ;;  %v6665_v53 = vpack.c.bf16 %v2464_v39, %v2463_v12 }
 0xa4c   :  { %6640 = vmatprep.subr.bf16.mxu0 %v6639_v49  ;;  %v2503_v49 = vld [vmem:[#allocation7 + $0x1b0] sm:$0xff]  ;;  %v2494_v11 = vld [vmem:[#allocation7 + $0x168] sm:$0xff] }
 0xa4d   :  { %v7159_v10 = vpop.eup %7158 }
 0xa4e   :  { %v7161_v18 = vpop.eup %7160  ;;  %v2286_v23 = vmul.f32 %v7159_v10, %v7151_v21  ;;  %v6651_v21 = vpack.c.bf16 %v2474_v46, %v2473_v26  ;;  %v2505_v10 = vld [vmem:[#allocation7 + $0x1c0] sm:$0xff]  ;;  %v2507_v26 = vld [vmem:[#allocation7 + $0x1d0] sm:$0xff] }
 0xa4f   :  { %6642 = vmatpush3.bf16.msra.mxu0 %v6641_v61  ;;  %v2284_v58 = vmul.f32 %v7161_v18, %v7153_v22  ;;  %v6649_v22 = vpack.c.bf16 %v2456_v56, %v2455_v7  ;;  %v6677_v61 = vpack.c.bf16 %v2486_v45, %v2485_v43  ;;  %v2462_v18 = vld [vmem:[#allocation7 + $0x68] sm:$0xff]  ;;  %v2479_v7 = vld [vmem:[#allocation7 + $0xf0] sm:$0xff]  ;;  %v6683_v56 = vpack.c.bf16 %v2506_v24, %v2505_v10  ;;  %v2493_v45 = vld [vmem:[#allocation7 + $0x160] sm:$0xff] }
 0xa50   :  { %6644 = vmatprep.subr.bf16.mxu0 %v6643_v5  ;;  %v6679_v5 = vpack.c.bf16 %v2504_v25, %v2503_v49  ;;  %v6661_v30 = vpack.c.bf16 %v2462_v18, %v2461_v16  ;;  %v2511_v49 = vld [vmem:[#allocation7 + $0x1f0] sm:$0xff]  ;;  %v2512_v25 = vld [vmem:[#allocation7 + $0x1f8] sm:$0xff] }
 0xa51   :  { %6188 = vmatprep.mubr.msk.f32.mxu1 %vm1150_vm1, %v2284_v58  ;;  %v6681_v58 = vpack.c.bf16 %v2488_v6, %v2487_v63  ;;  %v6695_v38 = vpack.c.bf16 %v2512_v25, %v2511_v49  ;;  %v2759_v25 = vld [vmem:[#allocation10 + $0x10] sm:$0xff] }
 0xa52   :  { %6189 = vmatmul.mubr.msk.f32.vlgmr.msra.gmra.mrb[38].mxu1 %vm1150_vm1, %v2286_v23  ;;  %v2490_v23 = vld [vmem:[#allocation7 + $0x148] sm:$0xff] }
 0xa53   :  { %6646 = vmatpush3.bf16.msra.mxu0 %v6645_v20  ;;  %6670 = vmatpush3.bf16.msra.mxu1 %v6669_v27  ;;  %v6659_v20 = vpack.c.bf16 %v2478_v32, %v2477_v14  ;;  %v2489_v27 = vld [vmem:[#allocation7 + $0x140] sm:$0xff] }
 0xa54   :  { %6648 = vmatprep.subr.bf16.mxu0 %v6647_v9  ;;  %6672 = vmatprep.subr.bf16.mxu1 %v6671_v1  ;;  %v2480_v9 = vld [vmem:[#allocation7 + $0xf8] sm:$0xff]  ;;  %v6685_v46 = vpack.c.bf16 %v2490_v23, %v2489_v27 }
 0xa55   :  { %v2508_v1 = vld [vmem:[#allocation7 + $0x1d8] sm:$0xff]  ;;  %v6663_v35 = vpack.c.bf16 %v2480_v9, %v2479_v7 }
 0xa57   :  { %6650 = vmatpush3.bf16.msra.mxu0 %v6649_v22  ;;  %6674 = vmatpush3.bf16.msra.mxu1 %v6673_v44  ;;  %v6687_v22 = vpack.c.bf16 %v2508_v1, %v2507_v26  ;;  %v2509_v44 = vld [vmem:[#allocation7 + $0x1e0] sm:$0xff] }
 0xa58   :  { %6652 = vmatprep.subr.bf16.mxu0 %v6651_v21  ;;  %6676 = vmatprep.subr.bf16.mxu1 %v6675_v48  ;;  %v2510_v21 = vld [vmem:[#allocation7 + $0x1e8] sm:$0xff]  ;;  %v6689_v48 = vpack.c.bf16 %v2492_v34, %v2491_v33 }
 0xa59   :  { %v6691_v43 = vpack.c.bf16 %v2510_v21, %v2509_v44  ;;  %v2758_v34 = vld [vmem:[#allocation10 + $0x8] sm:$0xff]  ;;  %v2760_v21 = vld [vmem:[#allocation10 + $0x18] sm:$0xff] }
 0xa5a   :  { %v2770_v44 = vld [vmem:[#allocation10 + $0x68] sm:$0xff] }
 0xa5b   :  { %6654 = vmatpush3.bf16.msra.mxu0 %v6653_v57  ;;  %6678 = vmatpush3.bf16.msra.mxu1 %v6677_v61  ;;  %v6693_v57 = vpack.c.bf16 %v2494_v11, %v2493_v45  ;;  %v2496_v61 = vld [vmem:[#allocation7 + $0x178] sm:$0xff]  ;;  %v2769_v45 = vld [vmem:[#allocation10 + $0x60] sm:$0xff] }
 0xa5c   :  { %6656 = vmatprep.subr.bf16.mxu0 %v6655_v8  ;;  %6680 = vmatprep.subr.bf16.mxu1 %v6679_v5  ;;  %v6697_v8 = vpack.c.bf16 %v2496_v61, %v2495_v60  ;;  %v2794_v61 = vld [vmem:[#allocation10 + $0x128] sm:$0xff] }
 0xa5f   :  { %6658 = vmatpush3.bf16.msra.mxu0 %v6657_v13  ;;  %6682 = vmatpush3.bf16.msra.mxu1 %v6681_v58 }
 0xa60   :  { %6660 = vmatprep.subr.bf16.mxu0 %v6659_v20  ;;  %6684 = vmatprep.subr.bf16.mxu1 %v6683_v56 }
 0xa63   :  { %6662 = vmatpush3.bf16.msra.mxu0 %v6661_v30  ;;  %6686 = vmatpush3.bf16.msra.mxu1 %v6685_v46 }
 0xa64   :  { %6664 = vmatprep.subr.bf16.mxu0 %v6663_v35  ;;  %6688 = vmatprep.subr.bf16.mxu1 %v6687_v22 }
 0xa67   :  { %6666 = vmatpush3.bf16.msra.mxu0 %v6665_v53  ;;  %6690 = vmatpush3.bf16.msra.mxu1 %v6689_v48  ;;  %v6699_v53 = vpack.c.bf16 %v2770_v44, %v2758_v34  ;;  %v2772_v48 = vld [vmem:[#allocation10 + $0x78] sm:$0xff] }
 0xa68   :  { %6692 = vmatprep.subr.bf16.mxu1 %v6691_v43  ;;  %v2757_v43 = vld [vmem:[#allocation10] sm:$0xff]  ;;  %v6731_v11 = vpack.c.bf16 %v2772_v48, %v2760_v21  ;;  %v2830_v21 = vld [vmem:[#allocation10 + $0x248] sm:$0xff]  ;;  %v2832_v48 = vld [vmem:[#allocation10 + $0x258] sm:$0xff] }
 0xa69   :  { %v6701_v49 = vpack.c.bf16 %v2769_v45, %v2757_v43  ;;  %6700 = vmatprep.subr.bf16.mxu0 %v6699_v53  ;;  %v2842_v53 = vld [vmem:[#allocation10 + $0x2a8] sm:$0xff]  ;;  %v2829_v45 = vld [vmem:[#allocation10 + $0x240] sm:$0xff] }
 0xa6a   :  { %2585 = vmatmul.mubr.f32.vlgmr.msra.gmra.mrb[40].mxu0 %v7956_v62  ;;  %v6711_v43 = vpack.c.bf16 %v2842_v53, %v2830_v21  ;;  %v2926_v21 = vld [vmem:[#allocation10 + $0x548] sm:$0xff] }
 0xa6b   :  { %2589 = vmatprep.mubr.f32.mxu0 %v7996_v17  ;;  %6694 = vmatpush3.bf16.msra.mxu1 %v6693_v57  ;;  %v2771_v57 = vld [vmem:[#allocation10 + $0x70] sm:$0xff]  ;;  %v2938_v53 = vld [vmem:[#allocation10 + $0x5a8] sm:$0xff] }
 0xa6c   :  { %6696 = vmatprep.subr.bf16.mxu1 %v6695_v38  ;;  %v2782_v38 = vld [vmem:[#allocation10 + $0xc8] sm:$0xff]  ;;  %v6733_v60 = vpack.c.bf16 %v2771_v57, %v2759_v25  ;;  %6702 = vmatpush1.bf16.msra.mxu0 %v6701_v49  ;;  %v2831_v57 = vld [vmem:[#allocation10 + $0x250] sm:$0xff] }
 0xa6e   :  { %2590 = vmatmul.mubr.f32.gmra.mrb[42].mxu0 %v7954_v59 }
 0xa6f   :  { %2594 = vmatprep.mubr.f32.mxu0 %v8002_v4  ;;  %6698 = vmatpush3.bf16.msra.mxu1 %v6697_v8  ;;  %v2784_v8 = vld [vmem:[#allocation10 + $0xd8] sm:$0xff] }
 0xa70   :  { %6732 = vmatprep.subr.bf16.mxu1 %v6731_v11  ;;  %v2841_v11 = vld [vmem:[#allocation10 + $0x2a0] sm:$0xff] }
 0xa71   :  { %v6713_v25 = vpack.c.bf16 %v2841_v11, %v2829_v45  ;;  %v2925_v45 = vld [vmem:[#allocation10 + $0x540] sm:$0xff] }
 0xa72   :  { %2595 = vmatmul.mubr.f32.gmra.mrb[44].mxu0 %v7960_v28  ;;  %v2937_v11 = vld [vmem:[#allocation10 + $0x5a0] sm:$0xff] }
 0xa73   :  { %2599 = vmatprep.mubr.f32.mxu0 %v8000_v50 }
 0xa76   :  { %2600 = vmatmul.mubr.f32.gmra.mrb[46].mxu0 %v7958_v36 }
 0xa77   :  { %3077 = vmatprep.mubr.f32.mxu0 %v7503_v0 }
 0xb1d   :  { %v6183_v62 = vpop.f32.mrb[38].mxu0 }
 0xb1e   :  { %v2359_v17 = vpop.f32.mrb[39].mxu0 }
 0xb1f   :  { %2669 = vmatprep.mubr.f32.mxu1 %v2359_v17  ;;  %v6703_v17 = vpack.c.bf16 %v2794_v61, %v2782_v38  ;;  %v2843_v38 = vld [vmem:[#allocation10 + $0x2b0] sm:$0xff]  ;;  %v2866_v61 = vld [vmem:[#allocation10 + $0x368] sm:$0xff] }
 0xb20   :  { %2670 = vmatmul.mubr.f32.vlgmr.msra.gmra.mrb[40].mxu1 %v8038_v15 }
 0xb21   :  { %2674 = vmatprep.mubr.f32.mxu1 %v6183_v62  ;;  %v2796_v62 = vld [vmem:[#allocation10 + $0x138] sm:$0xff]  ;;  %6734 = vmatpush1.bf16.msra.mxu1 %v6733_v60  ;;  %v6745_v60 = vpack.c.bf16 %v2843_v38, %v2831_v57  ;;  %v2927_v57 = vld [vmem:[#allocation10 + $0x550] sm:$0xff] }
 0xb22   :  { %6704 = vmatprep.subr.bf16.mxu0 %v6703_v17  ;;  %v2868_v17 = vld [vmem:[#allocation10 + $0x378] sm:$0xff]  ;;  %v2939_v38 = vld [vmem:[#allocation10 + $0x5b0] sm:$0xff] }
 0xb24   :  { %2675 = vmatmul.mubr.f32.gmra.mrb[42].mxu1 %v8036_v19 }
 0xb25   :  { %v6190_v59 = vpop.f32.mrb[38].mxu1 }
 0xb26   :  { %v2440_v28 = vpop.f32.mrb[39].mxu1 }
 0xb27   :  { %2679 = vmatprep.mubr.f32.mxu1 %v2440_v28  ;;  %v2781_v28 = vld [vmem:[#allocation10 + $0xc0] sm:$0xff] }
 0xb28   :  { %2680 = vmatmul.mubr.f32.gmra.mrb[44].mxu1 %v8042_v51  ;;  %v5707_v51 = vld [vmem:[%s8527_s23] ss:$0 sm:$0xff] }
 0xb29   :  { %2684 = vmatprep.mubr.f32.mxu1 %v6190_v59  ;;  %v6735_v59 = vpack.c.bf16 %v2796_v62, %v2784_v8  ;;  %v2856_v8 = vld [vmem:[#allocation10 + $0x318] sm:$0xff] }
 0xb2b   :  { %6736 = vmatprep.subr.bf16.mxu1 %v6735_v59  ;;  %v2853_v59 = vld [vmem:[#allocation10 + $0x300] sm:$0xff] }
 0xb2c   :  { %2685 = vmatmul.mubr.f32.gmra.mrb[46].mxu1 %v8040_v29 }
 0xb2d   :  { %3166 = vmatprep.mubr.f32.mxu1 %v7503_v0 }
 0xb3d   :  { %v5831_v36 = vpop.f32.mrb[40].mxu0 }
 0xb3e   :  { %v5832_v50 = vpop.f32.mrb[41].mxu0 }
 0xb3f   :  { %v5833_v4 = vadd.f32 %v5832_v50, %v5831_v36  ;;  %v2793_v36 = vld [vmem:[#allocation10 + $0x120] sm:$0xff]  ;;  %v2783_v50 = vld [vmem:[#allocation10 + $0xd0] sm:$0xff] }
 0xb41   :  { %v5834_v14 = vpop.f32.mrb[42].mxu0  ;;  %v2587_v16 = vadd.f32 %v5833_v4, %v5707_v51  ;;  %v6705_v4 = vpack.c.bf16 %v2793_v36, %v2781_v28  ;;  %v2865_v28 = vld [vmem:[#allocation10 + $0x360] sm:$0xff]  ;;  %v6747_v36 = vpack.c.bf16 %v2868_v17, %v2856_v8  ;;  %v2764_v8 = vld [vmem:[#allocation10 + $0x38] sm:$0xff] }
 0xb42   :  { %v5835_v5 = vpop.f32.mrb[43].mxu0  ;;  %v2776_v17 = vld [vmem:[#allocation10 + $0x98] sm:$0xff] }
 0xb43   :  { %v5836_v63 = vadd.f32 %v5835_v5, %v5834_v14  ;;  %v2795_v14 = vld [vmem:[#allocation10 + $0x130] sm:$0xff]  ;;  %v2806_v5 = vld [vmem:[#allocation10 + $0x188] sm:$0xff]  ;;  %6706 = vmatpush1.bf16.msra.mxu0 %v6705_v4 }
 0xb44   :  { %v2855_v4 = vld [vmem:[#allocation10 + $0x310] sm:$0xff] }
 0xb45   :  { %v5837_v15 = vpop.f32.mrb[44].mxu0  ;;  %v2592_v56 = vadd.f32 %v5836_v63, %v5707_v51  ;;  %v2818_v63 = vld [vmem:[#allocation10 + $0x1e8] sm:$0xff] }
 0xb46   :  { %v5838_v6 = vpop.f32.mrb[45].mxu0 }
 0xb47   :  { %v5839_v32 = vadd.f32 %v5838_v6, %v5837_v15  ;;  %v6737_v15 = vpack.c.bf16 %v2795_v14, %v2783_v50  ;;  %v6707_v6 = vpack.c.bf16 %v2818_v63, %v2806_v5  ;;  %v6717_v50 = vpack.c.bf16 %v2865_v28, %v2853_v59  ;;  %v2867_v14 = vld [vmem:[#allocation10 + $0x370] sm:$0xff]  ;;  %v2878_v63 = vld [vmem:[#allocation10 + $0x3c8] sm:$0xff] }
 0xb48   :  { %v6749_v5 = vpack.c.bf16 %v2867_v14, %v2855_v4  ;;  %v6795_v59 = vpack.c.bf16 %v2776_v17, %v2764_v8  ;;  %v2811_v17 = vld [vmem:[#allocation10 + $0x1b0] sm:$0xff] }
 0xb49   :  { %v5840_v19 = vpop.f32.mrb[46].mxu0  ;;  %v2597_v1 = vadd.f32 %v5839_v32, %v5707_v51  ;;  %v2808_v32 = vld [vmem:[#allocation10 + $0x198] sm:$0xff]  ;;  %6738 = vmatpush1.bf16.msra.mxu1 %v6737_v15  ;;  %6708 = vmatprep.subr.bf16.mxu0 %v6707_v6  ;;  %v2890_v15 = vld [vmem:[#allocation10 + $0x428] sm:$0xff] }
 0xb4a   :  { %v5841_v10 = vpop.f32.mrb[47].mxu0  ;;  %v2880_v6 = vld [vmem:[#allocation10 + $0x3d8] sm:$0xff] }
 0xb4b   :  { %v5842_v24 = vadd.f32 %v5841_v10, %v5840_v19  ;;  %v2820_v19 = vld [vmem:[#allocation10 + $0x1f8] sm:$0xff]  ;;  %v2805_v10 = vld [vmem:[#allocation10 + $0x180] sm:$0xff] }
 0xb4d   :  { %v2602_v39 = vadd.f32 %v5842_v24, %v5707_v51  ;;  %v6739_v24 = vpack.c.bf16 %v2820_v19, %v2808_v32  ;;  %v2817_v51 = vld [vmem:[#allocation10 + $0x1e0] sm:$0xff]  ;;  %v6719_v32 = vpack.c.bf16 %v2890_v15, %v2878_v63  ;;  %v2892_v19 = vld [vmem:[#allocation10 + $0x438] sm:$0xff] }
 0xb4f   :  { %6740 = vmatprep.subr.bf16.mxu1 %v6739_v24  ;;  %v2889_v24 = vld [vmem:[#allocation10 + $0x420] sm:$0xff] }
 0xbf3   :  { %v5875_v13 = vpop.f32.mrb[40].mxu1 }
 0xbf4   :  { %v5876_v29 = vpop.f32.mrb[41].mxu1 }
 0xbf5   :  { %v5877_v18 = vadd.f32 %v5876_v29, %v5875_v13  ;;  %v2807_v13 = vld [vmem:[#allocation10 + $0x190] sm:$0xff] }
 0xbf6   :  { %v2819_v29 = vld [vmem:[#allocation10 + $0x1f0] sm:$0xff] }
 0xbf7   :  { %v5878_v58 = vpop.f32.mrb[42].mxu1  ;;  %v8081_v20 = vadd.f32 %v5877_v18, %v2587_v16  ;;  %v6709_v16 = vpack.c.bf16 %v2817_v51, %v2805_v10  ;;  %v6741_v18 = vpack.c.bf16 %v2819_v29, %v2807_v13  ;;  %v2877_v10 = vld [vmem:[#allocation10 + $0x3c0] sm:$0xff]  ;;  %v6751_v51 = vpack.c.bf16 %v2892_v19, %v2880_v6  ;;  %v2879_v29 = vld [vmem:[#allocation10 + $0x3d0] sm:$0xff] }
 0xbf8   :  { %v5879_v7 = vpop.f32.mrb[43].mxu1  ;;  %v6721_v13 = vpack.c.bf16 %v2889_v24, %v2877_v10  ;;  %v8116_v24 = vld [vmem:[%s8528_s27] ss:$0 sm:$0xff] }
 0xbf9   :  { %v5880_v27 = vadd.f32 %v5879_v7, %v5878_v58  ;;  %2690 = vadd.xlane.f32.xlu0 %v8081_v20  ;;  %6710 = vmatpush1.bf16.msra.mxu0 %v6709_v16  ;;  %v2891_v16 = vld [vmem:[#allocation10 + $0x430] sm:$0xff] }
 0xbfa   :  { %6742 = vmatpush1.bf16.msra.mxu1 %v6741_v18  ;;  %6712 = vmatprep.subr.bf16.mxu0 %v6711_v43  ;;  %v6753_v18 = vpack.c.bf16 %v2891_v16, %v2879_v29  ;;  %v6727_v43 = vpack.c.bf16 %v2938_v53, %v2926_v21  ;;  %v2773_v16 = vld [vmem:[#allocation10 + $0x80] sm:$0xff]  ;;  %v2787_v53 = vld [vmem:[#allocation10 + $0xf0] sm:$0xff] }
 0xbfb   :  { %v5881_v23 = vpop.f32.mrb[44].mxu1  ;;  %v8084_v9 = vadd.f32 %v5880_v27, %v2592_v56  ;;  %v2797_v21 = vld [vmem:[#allocation10 + $0x140] sm:$0xff] }
 0xbfc   :  { %v5882_v26 = vpop.f32.mrb[45].mxu1 }
 0xbfd   :  { %v5883_v30 = vadd.f32 %v5882_v26, %v5881_v23  ;;  %2692 = vadd.xlane.f32.xlu1 %v8084_v9  ;;  %6714 = vmatpush1.bf16.msra.mxu0 %v6713_v25  ;;  %v6729_v25 = vpack.c.bf16 %v2937_v11, %v2925_v45  ;;  %v2810_v45 = vld [vmem:[#allocation10 + $0x1a8] sm:$0xff] }
 0xbff   :  { %v5884_v12 = vpop.f32.mrb[46].mxu1  ;;  %v8087_v46 = vadd.f32 %v5883_v30, %v2597_v1 }
 0xc00   :  { %v5885_v35 = vpop.f32.mrb[47].mxu1 }
 0xc01   :  { %v5886_v22 = vadd.f32 %v5885_v35, %v5884_v12  ;;  %2694 = vadd.xlane.f32.xlu0 %v8087_v46 }
 0xc03   :  { %v8090_v33 = vadd.f32 %v5886_v22, %v2602_v39 }
 0xc05   :  { %2696 = vadd.xlane.f32.xlu1 %v8090_v33 }
 0xc86   :  { %v2691_v58 = vpop.xlane.xlu0 %2690 }
 0xc87   :  { %v2699_v7 = vmul.f32 0.0078125, %v2691_v58  ;;  %v2902_v58 = vld [vmem:[#allocation10 + $0x488] sm:$0xff] }
 0xc89   :  { %v8094_v56 = vsub.f32 %v8081_v20, %v2699_v7  ;;  %v2914_v7 = vld [vmem:[#allocation10 + $0x4e8] sm:$0xff] }
 0xc8a   :  { %v2693_v27 = vpop.xlane.xlu1 %2692 }
 0xc8b   :  { %v2700_v23 = vmul.f32 0.0078125, %v2693_v27  ;;  %v2707_v26 = vmul.f32 %v8094_v56, %v8094_v56  ;;  %v2904_v27 = vld [vmem:[#allocation10 + $0x498] sm:$0xff] }
 0xc8d   :  { %v8099_v1 = vsub.f32 %v8084_v9, %v2700_v23  ;;  %2711 = vadd.xlane.f32.xlu0 %v2707_v26  ;;  %v6723_v23 = vpack.c.bf16 %v2914_v7, %v2902_v58  ;;  %v2916_v26 = vld [vmem:[#allocation10 + $0x4f8] sm:$0xff]  ;;  %v2775_v58 = vld [vmem:[#allocation10 + $0x90] sm:$0xff] }
 0xc8e   :  { %v2695_v30 = vpop.xlane.xlu0 %2694  ;;  %v8119_v7 = vld [vmem:[#allocation8] ss:$0 sm:$0xff] }
 0xc8f   :  { %v2701_v12 = vmul.f32 0.0078125, %v2695_v30  ;;  %v2708_v35 = vmul.f32 %v8099_v1, %v8099_v1  ;;  %v2901_v30 = vld [vmem:[#allocation10 + $0x480] sm:$0xff] }
 0xc91   :  { %v8104_v39 = vsub.f32 %v8087_v46, %v2701_v12  ;;  %2713 = vadd.xlane.f32.xlu1 %v2708_v35  ;;  %v2844_v46 = vld [vmem:[#allocation10 + $0x2b8] sm:$0xff]  ;;  %v2913_v12 = vld [vmem:[#allocation10 + $0x4e0] sm:$0xff]  ;;  %v6755_v35 = vpack.c.bf16 %v2916_v26, %v2904_v27  ;;  %v2786_v27 = vld [vmem:[#allocation10 + $0xe8] sm:$0xff] }
 0xc92   :  { %v2697_v20 = vpop.xlane.xlu1 %2696  ;;  %v6743_v49 = vpack.c.bf16 %v2844_v46, %v2832_v48  ;;  %v2928_v48 = vld [vmem:[#allocation10 + $0x558] sm:$0xff]  ;;  %v2798_v26 = vld [vmem:[#allocation10 + $0x148] sm:$0xff] }
 0xc93   :  { %v2702_v22 = vmul.f32 0.0078125, %v2697_v20  ;;  %v2709_v34 = vmul.f32 %v8104_v39, %v8104_v39  ;;  %v6725_v20 = vpack.c.bf16 %v2913_v12, %v2901_v30  ;;  %v2940_v46 = vld [vmem:[#allocation10 + $0x5b8] sm:$0xff] }
 0xc94   :  { %6744 = vmatprep.subr.bf16.mxu1 %v6743_v49  ;;  %v6759_v49 = vpack.c.bf16 %v2940_v46, %v2928_v48  ;;  %v2788_v30 = vld [vmem:[#allocation10 + $0xf8] sm:$0xff]  ;;  %v2799_v48 = vld [vmem:[#allocation10 + $0x150] sm:$0xff] }
 0xc95   :  { %v8109_v44 = vsub.f32 %v8090_v33, %v2702_v22  ;;  %2715 = vadd.xlane.f32.xlu0 %v2709_v34  ;;  %v2854_v33 = vld [vmem:[#allocation10 + $0x308] sm:$0xff]  ;;  %6746 = vmatpush1.bf16.msra.mxu1 %v6745_v60  ;;  %v2903_v22 = vld [vmem:[#allocation10 + $0x490] sm:$0xff]  ;;  %v6761_v60 = vpack.c.bf16 %v2939_v38, %v2927_v57  ;;  %v2800_v12 = vld [vmem:[#allocation10 + $0x158] sm:$0xff] }
 0xc96   :  { %v6715_v62 = vpack.c.bf16 %v2866_v61, %v2854_v33  ;;  %6748 = vmatprep.subr.bf16.mxu1 %v6747_v36  ;;  %v2915_v34 = vld [vmem:[#allocation10 + $0x4f0] sm:$0xff]  ;;  %v2762_v33 = vld [vmem:[#allocation10 + $0x28] sm:$0xff]  ;;  %v6799_v46 = vpack.c.bf16 %v2800_v12, %v2788_v30  ;;  %v2824_v57 = vld [vmem:[#allocation10 + $0x218] sm:$0xff] }
 0xc97   :  { %v2710_v9 = vmul.f32 %v8109_v44, %v8109_v44  ;;  %v2774_v61 = vld [vmem:[#allocation10 + $0x88] sm:$0xff] }
 0xc98   :  { %6716 = vmatprep.subr.bf16.mxu0 %v6715_v62  ;;  %v6763_v62 = vpack.c.bf16 %v2774_v61, %v2762_v33  ;;  %v2809_v33 = vld [vmem:[#allocation10 + $0x1a0] sm:$0xff] }
 0xc99   :  { %2717 = vadd.xlane.f32.xlu1 %v2710_v9  ;;  %6718 = vmatpush1.bf16.msra.mxu0 %v6717_v50  ;;  %v6757_v9 = vpack.c.bf16 %v2915_v34, %v2903_v22  ;;  %v2785_v34 = vld [vmem:[#allocation10 + $0xe0] sm:$0xff] }
 0xc9a   :  { %6750 = vmatpush1.bf16.msra.mxu1 %v6749_v5  ;;  %6720 = vmatprep.subr.bf16.mxu0 %v6719_v32 }
 0xc9b   :  { %6752 = vmatprep.subr.bf16.mxu1 %v6751_v51 }
 0xc9d   :  { %6722 = vmatpush1.bf16.msra.mxu0 %v6721_v13  ;;  %v2761_v13 = vld [vmem:[#allocation10 + $0x20] sm:$0xff] }
 0xc9e   :  { %6754 = vmatpush1.bf16.msra.mxu1 %v6753_v18  ;;  %6724 = vmatprep.subr.bf16.mxu0 %v6723_v23  ;;  %v2763_v18 = vld [vmem:[#allocation10 + $0x30] sm:$0xff] }
 0xc9f   :  { %6756 = vmatprep.subr.bf16.mxu1 %v6755_v35  ;;  %v6797_v22 = vpack.c.bf16 %v2775_v58, %v2763_v18 }
 0xca1   :  { %6726 = vmatpush1.bf16.msra.mxu0 %v6725_v20  ;;  %v6765_v20 = vpack.c.bf16 %v2773_v16, %v2761_v13  ;;  %v2835_v13 = vld [vmem:[#allocation10 + $0x270] sm:$0xff]  ;;  %v2858_v16 = vld [vmem:[#allocation10 + $0x328] sm:$0xff] }
 0xca2   :  { %6758 = vmatpush1.bf16.msra.mxu1 %v6757_v9  ;;  %6728 = vmatprep.subr.bf16.mxu0 %v6727_v43  ;;  %v6767_v43 = vpack.c.bf16 %v2798_v26, %v2786_v27  ;;  %v2870_v27 = vld [vmem:[#allocation10 + $0x388] sm:$0xff]  ;;  %v2872_v26 = vld [vmem:[#allocation10 + $0x398] sm:$0xff] }
 0xca3   :  { %6760 = vmatprep.subr.bf16.mxu1 %v6759_v49  ;;  %v2822_v49 = vld [vmem:[#allocation10 + $0x208] sm:$0xff] }
 0xca5   :  { %6730 = vmatpush1.bf16.msra.mxu0 %v6729_v25  ;;  %v2812_v25 = vld [vmem:[#allocation10 + $0x1b8] sm:$0xff] }
 0xca6   :  { %6762 = vmatpush1.bf16.msra.mxu1 %v6761_v60  ;;  %6764 = vmatprep.subr.bf16.mxu0 %v6763_v62  ;;  %v6769_v60 = vpack.c.bf16 %v2797_v21, %v2785_v34  ;;  %v2821_v62 = vld [vmem:[#allocation10 + $0x200] sm:$0xff]  ;;  %v6779_v34 = vpack.c.bf16 %v2870_v27, %v2858_v16  ;;  %v2871_v21 = vld [vmem:[#allocation10 + $0x390] sm:$0xff]  ;;  %v2766_v27 = vld [vmem:[#allocation10 + $0x48] sm:$0xff] }
 0xca7   :  { %6796 = vmatprep.subr.bf16.mxu1 %v6795_v59  ;;  %v2823_v59 = vld [vmem:[#allocation10 + $0x210] sm:$0xff] }
 0xd1a   :  { %v2712_v28 = vpop.xlane.xlu0 %2711 }
 0xd1b   :  { %v2719_v36 = vmul.f32 0.0078125, %v2712_v28  ;;  %v6771_v28 = vpack.c.bf16 %v2822_v49, %v2810_v45  ;;  %v2893_v49 = vld [vmem:[#allocation10 + $0x440] sm:$0xff] }
 0xd1d   :  { %v2723_v50 = vadd.f32 1e-05, %v2719_v36  ;;  %v6803_v36 = vpack.c.bf16 %v2824_v57, %v2812_v25 }
 0xd1e   :  { %v2714_v4 = vpop.xlane.xlu1 %2713 }
 0xd1f   :  { %7162 = vrsqrt.f32 %v2723_v50  ;;  %v2720_v14 = vmul.f32 0.0078125, %v2714_v4  ;;  %v2834_v50 = vld [vmem:[#allocation10 + $0x268] sm:$0xff] }
 0xd21   :  { %v2724_v5 = vadd.f32 1e-05, %v2720_v14  ;;  %v2846_v14 = vld [vmem:[#allocation10 + $0x2c8] sm:$0xff] }
 0xd22   :  { %v2716_v63 = vpop.xlane.xlu0 %2715  ;;  %v6775_v18 = vpack.c.bf16 %v2846_v14, %v2834_v50  ;;  %v2907_v14 = vld [vmem:[#allocation10 + $0x4b0] sm:$0xff] }
 0xd23   :  { %7164 = vrsqrt.f32 %v2724_v5  ;;  %v2721_v15 = vmul.f32 0.0078125, %v2716_v63  ;;  %v2848_v5 = vld [vmem:[#allocation10 + $0x2d8] sm:$0xff] }
 0xd25   :  { %v2725_v6 = vadd.f32 1e-05, %v2721_v15  ;;  %v6773_v15 = vpack.c.bf16 %v2821_v62, %v2809_v33  ;;  %v2918_v33 = vld [vmem:[#allocation10 + $0x508] sm:$0xff]  ;;  %v2920_v62 = vld [vmem:[#allocation10 + $0x518] sm:$0xff] }
 0xd26   :  { %v2718_v32 = vpop.xlane.xlu1 %2717 }
 0xd27   :  { %7166 = vrsqrt.f32 %v2725_v6  ;;  %v2722_v19 = vmul.f32 0.0078125, %v2718_v32  ;;  %v6805_v6 = vpack.c.bf16 %v2823_v59, %v2811_v17  ;;  %v2833_v32 = vld [vmem:[#allocation10 + $0x260] sm:$0xff] }
 0xd29   :  { %v7163_v10 = vpop.eup %7162  ;;  %v2726_v51 = vadd.f32 1e-05, %v2722_v19  ;;  %v2845_v19 = vld [vmem:[#allocation10 + $0x2c0] sm:$0xff] }
 0xd2a   :  { %v2731_v29 = vmul.f32 %v7163_v10, %v8094_v56 }
 0xd2b   :  { %7168 = vrsqrt.f32 %v2726_v51 }
 0xd2c   :  { %v2742_v23 = vmul.f32 %v8116_v24, %v2731_v29  ;;  %v2847_v29 = vld [vmem:[#allocation10 + $0x2d0] sm:$0xff] }
 0xd2d   :  { %v7165_v35 = vpop.eup %7164  ;;  %v6809_v12 = vpack.c.bf16 %v2847_v29, %v2835_v13  ;;  %v2941_v13 = vld [vmem:[#allocation10 + $0x5c0] sm:$0xff] }
 0xd2e   :  { %v8123_v9 = vadd.f32 %v8119_v7, %v2742_v23  ;;  %v2732_v56 = vmul.f32 %v7165_v35, %v8099_v1  ;;  %v6801_v1 = vpack.c.bf16 %v2799_v48, %v2787_v53  ;;  %v2860_v23 = vld [vmem:[#allocation10 + $0x338] sm:$0xff]  ;;  %v2857_v35 = vld [vmem:[#allocation10 + $0x320] sm:$0xff]  ;;  %v2882_v53 = vld [vmem:[#allocation10 + $0x3e8] sm:$0xff] }
 0xd2f   :  { %v2894_v48 = vld [vmem:[#allocation10 + $0x448] sm:$0xff] }
 0xd30   :  { %v2743_v11 = vmul.f32 %v8116_v24, %v2732_v56  ;;  %3078 = vmatmul.mubr.f32.vlgmr.msra.gmra.mrb[48].mxu0 %v8123_v9  ;;  %3167 = vmatmul.mubr.f32.vlgmr.msra.gmra.mrb[48].mxu1 %v8123_v9  ;;  %v6811_v56 = vpack.c.bf16 %v2872_v26, %v2860_v23  ;;  %v6783_v25 = vpack.c.bf16 %v2894_v48, %v2882_v53  ;;  %v2778_v23 = vld [vmem:[#allocation10 + $0xa8] sm:$0xff]  ;;  %v2768_v26 = vld [vmem:[#allocation10 + $0x58] sm:$0xff] }
 0xd31   :  { %v7167_v38 = vpop.eup %7166  ;;  %6766 = vmatpush1.bf16.msra.mxu0 %v6765_v20  ;;  %6798 = vmatpush1.bf16.msra.mxu1 %v6797_v22  ;;  %v2869_v20 = vld [vmem:[#allocation10 + $0x380] sm:$0xff]  ;;  %v2790_v53 = vld [vmem:[#allocation10 + $0x108] sm:$0xff] }
 0xd32   :  { %v8130_v61 = vadd.f32 %v8119_v7, %v2743_v11  ;;  %v2733_v8 = vmul.f32 %v7167_v38, %v8104_v39  ;;  %3083 = vmatprep.mubr.f32.mxu0 %v7503_v0  ;;  %3172 = vmatprep.mubr.f32.mxu1 %v7503_v0  ;;  %v2836_v39 = vld [vmem:[#allocation10 + $0x278] sm:$0xff]  ;;  %v2881_v11 = vld [vmem:[#allocation10 + $0x3e0] sm:$0xff]  ;;  %v2883_v38 = vld [vmem:[#allocation10 + $0x3f0] sm:$0xff] }
 0xd33   :  { %6768 = vmatprep.subr.bf16.mxu0 %v6767_v43  ;;  %6800 = vmatprep.subr.bf16.mxu1 %v6799_v46  ;;  %v6807_v58 = vpack.c.bf16 %v2848_v5, %v2836_v39  ;;  %v2884_v43 = vld [vmem:[#allocation10 + $0x3f8] sm:$0xff]  ;;  %v6785_v17 = vpack.c.bf16 %v2893_v49, %v2881_v11  ;;  %v2919_v39 = vld [vmem:[#allocation10 + $0x510] sm:$0xff]  ;;  %v2930_v5 = vld [vmem:[#allocation10 + $0x568] sm:$0xff] }
 0xd34   :  { %v2744_v4 = vmul.f32 %v8116_v24, %v2733_v8  ;;  %3084 = vmatmul.mubr.f32.gmra.mrb[50].mxu0 %v8130_v61  ;;  %3173 = vmatmul.mubr.f32.gmra.mrb[50].mxu1 %v8130_v61  ;;  %v2896_v46 = vld [vmem:[#allocation10 + $0x458] sm:$0xff]  ;;  %v2802_v48 = vld [vmem:[#allocation10 + $0x168] sm:$0xff]  ;;  %v2789_v11 = vld [vmem:[#allocation10 + $0x100] sm:$0xff] }
 0xd35   :  { %v7169_v63 = vpop.eup %7168  ;;  %6770 = vmatpush1.bf16.msra.mxu0 %v6769_v60  ;;  %6802 = vmatpush1.bf16.msra.mxu1 %v6801_v1  ;;  %v6815_v57 = vpack.c.bf16 %v2896_v46, %v2884_v43  ;;  %v2895_v60 = vld [vmem:[#allocation10 + $0x450] sm:$0xff]  ;;  %v2906_v1 = vld [vmem:[#allocation10 + $0x4a8] sm:$0xff]  ;;  %v2908_v8 = vld [vmem:[#allocation10 + $0x4b8] sm:$0xff] }
 0xd36   :  { %v8139_v10 = vadd.f32 %v8119_v7, %v2744_v4  ;;  %v2734_v51 = vmul.f32 %v7169_v63, %v8109_v44  ;;  %3089 = vmatprep.mubr.f32.mxu0 %v7503_v0  ;;  %3178 = vmatprep.mubr.f32.mxu1 %v7503_v0  ;;  %v6777_v44 = vpack.c.bf16 %v2845_v19, %v2833_v32  ;;  %v2942_v63 = vld [vmem:[#allocation10 + $0x5c8] sm:$0xff]  ;;  %v2792_v43 = vld [vmem:[#allocation10 + $0x118] sm:$0xff]  ;;  %v2801_v49 = vld [vmem:[#allocation10 + $0x160] sm:$0xff] }
 0xd37   :  { %6772 = vmatprep.subr.bf16.mxu0 %v6771_v28  ;;  %6804 = vmatprep.subr.bf16.mxu1 %v6803_v36  ;;  %v6817_v59 = vpack.c.bf16 %v2895_v60, %v2883_v38  ;;  %v2905_v28 = vld [vmem:[#allocation10 + $0x4a0] sm:$0xff]  ;;  %v6787_v50 = vpack.c.bf16 %v2918_v33, %v2906_v1  ;;  %v6819_v4 = vpack.c.bf16 %v2920_v62, %v2908_v8  ;;  %v2804_v46 = vld [vmem:[#allocation10 + $0x178] sm:$0xff]  ;;  %v2814_v1 = vld [vmem:[#allocation10 + $0x1c8] sm:$0xff] }
 0xd38   :  { %v2745_v30 = vmul.f32 %v8116_v24, %v2734_v51  ;;  %3090 = vmatmul.mubr.f32.gmra.mrb[52].mxu0 %v8139_v10  ;;  %3179 = vmatmul.mubr.f32.gmra.mrb[52].mxu1 %v8139_v10  ;;  %v2859_v24 = vld [vmem:[#allocation10 + $0x330] sm:$0xff]  ;;  %v2917_v36 = vld [vmem:[#allocation10 + $0x500] sm:$0xff]  ;;  %v6821_v19 = vpack.c.bf16 %v2919_v39, %v2907_v14  ;;  %v6791_v29 = vpack.c.bf16 %v2942_v63, %v2930_v5  ;;  %v2826_v33 = vld [vmem:[#allocation10 + $0x228] sm:$0xff] }
 0xd39   :  { %6774 = vmatpush1.bf16.msra.mxu0 %v6773_v15  ;;  %6806 = vmatpush1.bf16.msra.mxu1 %v6805_v6  ;;  %v6813_v45 = vpack.c.bf16 %v2871_v21, %v2859_v24  ;;  %v2932_v15 = vld [vmem:[#allocation10 + $0x578] sm:$0xff]  ;;  %v6789_v32 = vpack.c.bf16 %v2917_v36, %v2905_v28  ;;  %v2929_v51 = vld [vmem:[#allocation10 + $0x560] sm:$0xff]  ;;  %v2767_v24 = vld [vmem:[#allocation10 + $0x50] sm:$0xff]  ;;  %v6831_v38 = vpack.c.bf16 %v2802_v48, %v2790_v53 }
 0xd3a   :  { %v8148_v22 = vadd.f32 %v8119_v7, %v2745_v30  ;;  %3095 = vmatprep.mubr.f32.mxu0 %v7503_v0  ;;  %3184 = vmatprep.mubr.f32.mxu1 %v7503_v0  ;;  %v6781_v7 = vpack.c.bf16 %v2869_v20, %v2857_v35  ;;  %v2944_v6 = vld [vmem:[#allocation10 + $0x5d8] sm:$0xff]  ;;  %v2765_v35 = vld [vmem:[#allocation10 + $0x40] sm:$0xff]  ;;  %v6827_v20 = vpack.c.bf16 %v2778_v23, %v2766_v27  ;;  %v2779_v21 = vld [vmem:[#allocation10 + $0xb0] sm:$0xff] }
 0xd3b   :  { %6776 = vmatprep.subr.bf16.mxu0 %v6775_v18  ;;  %6808 = vmatprep.subr.bf16.mxu1 %v6807_v58  ;;  %v6823_v16 = vpack.c.bf16 %v2944_v6, %v2932_v15  ;;  %v2931_v18 = vld [vmem:[#allocation10 + $0x570] sm:$0xff]  ;;  %v2780_v30 = vld [vmem:[#allocation10 + $0xb8] sm:$0xff]  ;;  %v6863_v60 = vpack.c.bf16 %v2804_v46, %v2792_v43  ;;  %v2813_v28 = vld [vmem:[#allocation10 + $0x1c0] sm:$0xff]  ;;  %v6835_v14 = vpack.c.bf16 %v2826_v33, %v2814_v1 }
 0xd3c   :  { %3096 = vmatmul.mubr.f32.gmra.mrb[54].mxu0 %v8148_v22  ;;  %3185 = vmatmul.mubr.f32.gmra.mrb[54].mxu1 %v8148_v22  ;;  %v2943_v58 = vld [vmem:[#allocation10 + $0x5d0] sm:$0xff]  ;;  %v2816_v8 = vld [vmem:[#allocation10 + $0x1d8] sm:$0xff]  ;;  %v2825_v36 = vld [vmem:[#allocation10 + $0x220] sm:$0xff] }
 0xd3d   :  { %6778 = vmatpush1.bf16.msra.mxu0 %v6777_v44  ;;  %6810 = vmatpush1.bf16.msra.mxu1 %v6809_v12  ;;  %v6793_v44 = vpack.c.bf16 %v2941_v13, %v2929_v51  ;;  %v6825_v12 = vpack.c.bf16 %v2943_v58, %v2931_v18  ;;  %v2828_v62 = vld [vmem:[#allocation10 + $0x238] sm:$0xff]  ;;  %v2838_v5 = vld [vmem:[#allocation10 + $0x288] sm:$0xff]  ;;  %v2837_v51 = vld [vmem:[#allocation10 + $0x280] sm:$0xff] }
 0xd3e   :  { %6780 = vmatprep.subr.bf16.mxu0 %v6779_v34  ;;  %6812 = vmatprep.subr.bf16.mxu1 %v6811_v56  ;;  %v6859_v34 = vpack.c.bf16 %v2780_v30, %v2768_v26  ;;  %v2777_v56 = vld [vmem:[#allocation10 + $0xa0] sm:$0xff]  ;;  %v6867_v39 = vpack.c.bf16 %v2828_v62, %v2816_v8  ;;  %v2850_v63 = vld [vmem:[#allocation10 + $0x2e8] sm:$0xff]  ;;  %v2840_v15 = vld [vmem:[#allocation10 + $0x298] sm:$0xff] }
 0xd3f   :  { %3255 = vmatprep.mubr.f32.mxu0 %v7503_v0  ;;  %3344 = vmatprep.mubr.f32.mxu1 %v7503_v0  ;;  %v2852_v6 = vld [vmem:[#allocation10 + $0x2f8] sm:$0xff]  ;;  %v2849_v13 = vld [vmem:[#allocation10 + $0x2e0] sm:$0xff]  ;;  %v2862_v18 = vld [vmem:[#allocation10 + $0x348] sm:$0xff]  ;;  %v6839_v58 = vpack.c.bf16 %v2850_v63, %v2838_v5 }
 0xd40   :  { %v6871_v27 = vpack.c.bf16 %v2852_v6, %v2840_v15  ;;  %v2874_v23 = vld [vmem:[#allocation10 + $0x3a8] sm:$0xff]  ;;  %v2864_v26 = vld [vmem:[#allocation10 + $0x358] sm:$0xff] }
 0xd41   :  { %6782 = vmatpush1.bf16.msra.mxu0 %v6781_v7  ;;  %6814 = vmatpush1.bf16.msra.mxu1 %v6813_v45  ;;  %v6829_v7 = vpack.c.bf16 %v2777_v56, %v2765_v35  ;;  %v6861_v45 = vpack.c.bf16 %v2779_v21, %v2767_v24  ;;  %v2876_v30 = vld [vmem:[#allocation10 + $0x3b8] sm:$0xff]  ;;  %v2861_v35 = vld [vmem:[#allocation10 + $0x340] sm:$0xff]  ;;  %v2863_v24 = vld [vmem:[#allocation10 + $0x350] sm:$0xff] }
 0xd42   :  { %6784 = vmatprep.subr.bf16.mxu0 %v6783_v25  ;;  %6816 = vmatprep.subr.bf16.mxu1 %v6815_v57  ;;  %v2791_v25 = vld [vmem:[#allocation10 + $0x110] sm:$0xff]  ;;  %v6875_v56 = vpack.c.bf16 %v2876_v30, %v2864_v26  ;;  %v2886_v53 = vld [vmem:[#allocation10 + $0x408] sm:$0xff]  ;;  %v2888_v43 = vld [vmem:[#allocation10 + $0x418] sm:$0xff] }
 0xd43   :  { %v2803_v57 = vld [vmem:[#allocation10 + $0x170] sm:$0xff]  ;;  %v2898_v48 = vld [vmem:[#allocation10 + $0x468] sm:$0xff]  ;;  %v2900_v46 = vld [vmem:[#allocation10 + $0x478] sm:$0xff] }
 0xd44   :  { %v2875_v21 = vld [vmem:[#allocation10 + $0x3b0] sm:$0xff]  ;;  %v2910_v1 = vld [vmem:[#allocation10 + $0x4c8] sm:$0xff]  ;;  %v2912_v8 = vld [vmem:[#allocation10 + $0x4d8] sm:$0xff] }
 0xd45   :  { %6786 = vmatpush1.bf16.msra.mxu0 %v6785_v17  ;;  %6818 = vmatpush1.bf16.msra.mxu1 %v6817_v59  ;;  %v6833_v17 = vpack.c.bf16 %v2801_v49, %v2789_v11  ;;  %v6865_v59 = vpack.c.bf16 %v2803_v57, %v2791_v25  ;;  %v2885_v11 = vld [vmem:[#allocation10 + $0x400] sm:$0xff]  ;;  %v6847_v25 = vpack.c.bf16 %v2898_v48, %v2886_v53  ;;  %v2922_v33 = vld [vmem:[#allocation10 + $0x528] sm:$0xff]  ;;  %v2924_v62 = vld [vmem:[#allocation10 + $0x538] sm:$0xff] }
 0xd46   :  { %6788 = vmatprep.subr.bf16.mxu0 %v6787_v50  ;;  %6820 = vmatprep.subr.bf16.mxu1 %v6819_v4  ;;  %v2815_v50 = vld [vmem:[#allocation10 + $0x1d0] sm:$0xff]  ;;  %v2897_v49 = vld [vmem:[#allocation10 + $0x460] sm:$0xff]  ;;  %v6879_v57 = vpack.c.bf16 %v2900_v46, %v2888_v43  ;;  %v2934_v5 = vld [vmem:[#allocation10 + $0x588] sm:$0xff] }
 0xd47   :  { %v2827_v4 = vld [vmem:[#allocation10 + $0x230] sm:$0xff]  ;;  %v2946_v63 = vld [vmem:[#allocation10 + $0x5e8] sm:$0xff]  ;;  %v2936_v15 = vld [vmem:[#allocation10 + $0x598] sm:$0xff] }
 0xd48   :  { %v2948_v6 = vld [vmem:[#allocation10 + $0x5f8] sm:$0xff] }
 0xd49   :  { %6790 = vmatpush1.bf16.msra.mxu0 %v6789_v32  ;;  %6822 = vmatpush1.bf16.msra.mxu1 %v6821_v19  ;;  %v6837_v32 = vpack.c.bf16 %v2825_v36, %v2813_v28  ;;  %v6869_v19 = vpack.c.bf16 %v2827_v4, %v2815_v50  ;;  %v2909_v28 = vld [vmem:[#allocation10 + $0x4c0] sm:$0xff]  ;;  %v6851_v50 = vpack.c.bf16 %v2922_v33, %v2910_v1 }
 0xd4a   :  { %6792 = vmatprep.subr.bf16.mxu0 %v6791_v29  ;;  %6824 = vmatprep.subr.bf16.mxu1 %v6823_v16  ;;  %v2839_v29 = vld [vmem:[#allocation10 + $0x290] sm:$0xff]  ;;  %v2921_v36 = vld [vmem:[#allocation10 + $0x520] sm:$0xff]  ;;  %v6883_v4 = vpack.c.bf16 %v2924_v62, %v2912_v8 }
 0xd4b   :  { %v2851_v16 = vld [vmem:[#allocation10 + $0x2f0] sm:$0xff] }
 0xd4d   :  { %6794 = vmatpush1.bf16.msra.mxu0 %v6793_v44  ;;  %6826 = vmatpush1.bf16.msra.mxu1 %v6825_v12  ;;  %v6841_v44 = vpack.c.bf16 %v2849_v13, %v2837_v51  ;;  %v6873_v12 = vpack.c.bf16 %v2851_v16, %v2839_v29  ;;  %v2933_v51 = vld [vmem:[#allocation10 + $0x580] sm:$0xff]  ;;  %v6855_v13 = vpack.c.bf16 %v2946_v63, %v2934_v5 }
 0xd4e   :  { %6828 = vmatprep.subr.bf16.mxu0 %v6827_v20  ;;  %6860 = vmatprep.subr.bf16.mxu1 %v6859_v34  ;;  %v2873_v20 = vld [vmem:[#allocation10 + $0x3a0] sm:$0xff]  ;;  %v6843_v34 = vpack.c.bf16 %v2874_v23, %v2862_v18  ;;  %v6887_v29 = vpack.c.bf16 %v2948_v6, %v2936_v15  ;;  %v2935_v18 = vld [vmem:[#allocation10 + $0x590] sm:$0xff] }
 0xd4f   :  { %v2945_v16 = vld [vmem:[#allocation10 + $0x5e0] sm:$0xff] }
 0xd50   :  { %3256 = vmatmul.mubr.f32.vlgmr.msra.gmra.mrb[56].mxu0 %v8123_v9  ;;  %3345 = vmatmul.mubr.f32.vlgmr.msra.gmra.mrb[56].mxu1 %v8123_v9 }
 0xd51   :  { %6830 = vmatpush1.bf16.msra.mxu0 %v6829_v7  ;;  %6862 = vmatpush1.bf16.msra.mxu1 %v6861_v45  ;;  %v6845_v7 = vpack.c.bf16 %v2873_v20, %v2861_v35  ;;  %v6877_v45 = vpack.c.bf16 %v2875_v21, %v2863_v24 }
 0xd52   :  { %3261 = vmatprep.mubr.f32.mxu0 %v7503_v0  ;;  %3350 = vmatprep.mubr.f32.mxu1 %v7503_v0 }
 0xd53   :  { %6832 = vmatprep.subr.bf16.mxu0 %v6831_v38  ;;  %6864 = vmatprep.subr.bf16.mxu1 %v6863_v60  ;;  %v2887_v38 = vld [vmem:[#allocation10 + $0x410] sm:$0xff] }
 0xd54   :  { %3262 = vmatmul.mubr.f32.gmra.mrb[58].mxu0 %v8130_v61  ;;  %3351 = vmatmul.mubr.f32.gmra.mrb[58].mxu1 %v8130_v61  ;;  %v2899_v60 = vld [vmem:[#allocation10 + $0x470] sm:$0xff] }
 0xd55   :  { %6834 = vmatpush1.bf16.msra.mxu0 %v6833_v17  ;;  %6866 = vmatpush1.bf16.msra.mxu1 %v6865_v59  ;;  %v6849_v17 = vpack.c.bf16 %v2897_v49, %v2885_v11  ;;  %v6881_v59 = vpack.c.bf16 %v2899_v60, %v2887_v38 }
 0xd56   :  { %3267 = vmatprep.mubr.f32.mxu0 %v7503_v0  ;;  %3356 = vmatprep.mubr.f32.mxu1 %v7503_v0 }
 0xd57   :  { %6836 = vmatprep.subr.bf16.mxu0 %v6835_v14  ;;  %6868 = vmatprep.subr.bf16.mxu1 %v6867_v39  ;;  %v2911_v14 = vld [vmem:[#allocation10 + $0x4d0] sm:$0xff] }
 0xd58   :  { %3268 = vmatmul.mubr.f32.gmra.mrb[60].mxu0 %v8139_v10  ;;  %3357 = vmatmul.mubr.f32.gmra.mrb[60].mxu1 %v8139_v10  ;;  %v2923_v39 = vld [vmem:[#allocation10 + $0x530] sm:$0xff] }
 0xd59   :  { %6838 = vmatpush1.bf16.msra.mxu0 %v6837_v32  ;;  %6870 = vmatpush1.bf16.msra.mxu1 %v6869_v19  ;;  %v6853_v32 = vpack.c.bf16 %v2921_v36, %v2909_v28  ;;  %v6885_v19 = vpack.c.bf16 %v2923_v39, %v2911_v14 }
 0xd5a   :  { %3273 = vmatprep.mubr.f32.mxu0 %v7503_v0  ;;  %3362 = vmatprep.mubr.f32.mxu1 %v7503_v0 }
 0xd5b   :  { %6840 = vmatprep.subr.bf16.mxu0 %v6839_v58  ;;  %6872 = vmatprep.subr.bf16.mxu1 %v6871_v27  ;;  %v2947_v58 = vld [vmem:[#allocation10 + $0x5f0] sm:$0xff]  ;;  %v6857_v27 = vpack.c.bf16 %v2945_v16, %v2933_v51 }
 0xd5c   :  { %3274 = vmatmul.mubr.f32.gmra.mrb[62].mxu0 %v8148_v22  ;;  %3363 = vmatmul.mubr.f32.gmra.mrb[62].mxu1 %v8148_v22  ;;  %v6889_v23 = vpack.c.bf16 %v2947_v58, %v2935_v18 }
 0xd5d   :  { %6842 = vmatpush1.bf16.msra.mxu0 %v6841_v44  ;;  %6874 = vmatpush1.bf16.msra.mxu1 %v6873_v12 }
 0xd5e   :  { %6844 = vmatprep.subr.bf16.mxu0 %v6843_v34  ;;  %6876 = vmatprep.subr.bf16.mxu1 %v6875_v56 }
 0xd5f   :  { %3433 = vmatprep.mubr.f32.mxu0 %v7503_v0  ;;  %3522 = vmatprep.mubr.f32.mxu1 %v7503_v0 }
 0xd61   :  { %6846 = vmatpush1.bf16.msra.mxu0 %v6845_v7  ;;  %6878 = vmatpush1.bf16.msra.mxu1 %v6877_v45 }
 0xd62   :  { %6848 = vmatprep.subr.bf16.mxu0 %v6847_v25  ;;  %6880 = vmatprep.subr.bf16.mxu1 %v6879_v57 }
 0xd65   :  { %6850 = vmatpush1.bf16.msra.mxu0 %v6849_v17  ;;  %6882 = vmatpush1.bf16.msra.mxu1 %v6881_v59 }
 0xd66   :  { %6852 = vmatprep.subr.bf16.mxu0 %v6851_v50  ;;  %6884 = vmatprep.subr.bf16.mxu1 %v6883_v4 }
 0xd69   :  { %6854 = vmatpush1.bf16.msra.mxu0 %v6853_v32  ;;  %6886 = vmatpush1.bf16.msra.mxu1 %v6885_v19 }
 0xd6a   :  { %6856 = vmatprep.subr.bf16.mxu0 %v6855_v13  ;;  %6888 = vmatprep.subr.bf16.mxu1 %v6887_v29 }
 0xd6d   :  { %6858 = vmatpush1.bf16.msra.mxu0 %v6857_v27  ;;  %6890 = vmatpush1.bf16.msra.mxu1 %v6889_v23 }
 0xd70   :  { %3434 = vmatmul.mubr.f32.vlgmr.msra.gmra.mrb[64].mxu0 %v8123_v9  ;;  %3523 = vmatmul.mubr.f32.vlgmr.msra.gmra.mrb[64].mxu1 %v8123_v9  ;;  %v8189_v9 = vld [vmem:[%s8491_s8] sm:$0xff] }
 0xd71   :  { %3439 = vmatprep.mubr.f32.mxu0 %v7503_v0  ;;  %3528 = vmatprep.mubr.f32.mxu1 %v7503_v0  ;;  %v2972_v49 = vrot.slane %v8189_v9, %v412_v2  ;;  %v2980_v25 = vrot.slane %v8189_v9, %v420_v40  ;;  %v2976_v60 = vrot.slane %v8189_v9, %v416_v3 }
 0xd72   :  { %v2984_v1 = vrot.slane %v8189_v9, %v424_v42 }
 0xd74   :  { %3440 = vmatmul.mubr.f32.gmra.mrb[66].mxu0 %v8130_v61  ;;  %3529 = vmatmul.mubr.f32.gmra.mrb[66].mxu1 %v8130_v61  ;;  %v8193_v61 = vrot.slane %v8189_v9, %v7818_v55 }
 0xd75   :  { %3445 = vmatprep.mubr.f32.mxu0 %v7503_v0  ;;  %3534 = vmatprep.mubr.f32.mxu1 %v7503_v0 }
 0xd78   :  { %3446 = vmatmul.mubr.f32.gmra.mrb[68].mxu0 %v8139_v10  ;;  %3535 = vmatmul.mubr.f32.gmra.mrb[68].mxu1 %v8139_v10 }
 0xd79   :  { %3451 = vmatprep.mubr.f32.mxu0 %v7503_v0  ;;  %3540 = vmatprep.mubr.f32.mxu1 %v7503_v0 }
 0xd7c   :  { %3452 = vmatmul.mubr.f32.gmra.mrb[70].mxu0 %v8148_v22  ;;  %3541 = vmatmul.mubr.f32.gmra.mrb[70].mxu1 %v8148_v22 }
 0xe03   :  { %v3079_v26 = vpop.f32.mrb[48].mxu0  ;;  %v8195_v30 = vpop.f32.mrb[48].mxu1 }
 0xe04   :  { %v3080_v10 = vadd.f32 %v3079_v26, %v8193_v61  ;;  %v8198_v44 = vpop.f32.mrb[49].mxu0  ;;  %v8200_v0 = vpop.f32.mrb[49].mxu1 }
 0xe06   :  { %6195 = vmatprep.mubr.f32.mxu0 %v3080_v10 }
 0xe07   :  { %v3085_v22 = vpop.f32.mrb[50].mxu0  ;;  %v8202_v12 = vpop.f32.mrb[50].mxu1 }
 0xe08   :  { %v8204_v35 = vpop.f32.mrb[51].mxu0  ;;  %v8206_v20 = vpop.f32.mrb[51].mxu1 }
 0xe0b   :  { %v3091_v34 = vpop.f32.mrb[52].mxu0  ;;  %v8208_v56 = vpop.f32.mrb[52].mxu1 }
 0xe0c   :  { %v3092_v24 = vadd.f32 %v3091_v34, %v8193_v61  ;;  %v8211_v21 = vpop.f32.mrb[53].mxu0  ;;  %v8213_v53 = vpop.f32.mrb[53].mxu1  ;;  %v3086_v34 = vadd.f32 %v3085_v22, %v8193_v61 }
 0xe0e   :  { %6202 = vmatprep.mubr.f32.mxu1 %v3092_v24 }
 0xe0f   :  { %v3097_v48 = vpop.f32.mrb[54].mxu0  ;;  %v8215_v43 = vpop.f32.mrb[54].mxu1 }
 0xe10   :  { %v8217_v46 = vpop.f32.mrb[55].mxu0  ;;  %v8219_v7 = vpop.f32.mrb[55].mxu1 }
 0xe23   :  { %v3257_v45 = vpop.f32.mrb[56].mxu0  ;;  %v3346_v11 = vpop.f32.mrb[56].mxu1 }
 0xe24   :  { %v3259_v57 = vpop.f32.mrb[57].mxu0  ;;  %v3348_v38 = vpop.f32.mrb[57].mxu1  ;;  %v3258_v62 = vadd.f32 %v3257_v45, %v2972_v49  ;;  %v3347_v17 = vadd.f32 %v3346_v11, %v2980_v25 }
 0xe25   :  { %v3260_v50 = vadd.f32 %v3259_v57, %v2976_v60  ;;  %v3349_v40 = vadd.f32 %v3348_v38, %v2984_v1 }
 0xe27   :  { %v3263_v33 = vpop.f32.mrb[58].mxu0  ;;  %v3352_v8 = vpop.f32.mrb[58].mxu1 }
 0xe28   :  { %v3264_v59 = vadd.f32 %v3263_v33, %v2972_v49  ;;  %v3353_v2 = vadd.f32 %v3352_v8, %v2980_v25  ;;  %v3265_v28 = vpop.f32.mrb[59].mxu0  ;;  %v3354_v36 = vpop.f32.mrb[59].mxu1 }
 0xe29   :  { %v3266_v4 = vadd.f32 %v3265_v28, %v2976_v60  ;;  %v3355_v14 = vadd.f32 %v3354_v36, %v2984_v1 }
 0xe2a   :  { %v6891_v39 = vpack.c.bf16 %v3264_v59, %v3258_v62  ;;  %v8233_v5 = vpack.c.bf16 %v3353_v2, %v3347_v17 }
 0xe2b   :  { %v8235_v3 = vpack.c.bf16 %v3266_v4, %v3260_v50  ;;  %v8237_v54 = vpack.c.bf16 %v3355_v14, %v3349_v40  ;;  %v3269_v42 = vpop.f32.mrb[60].mxu0  ;;  %v3358_v63 = vpop.f32.mrb[60].mxu1 }
 0xe2c   :  { %v3271_v15 = vpop.f32.mrb[61].mxu0  ;;  %v3360_v6 = vpop.f32.mrb[61].mxu1  ;;  %6892 = vmatprep.subr.bf16.mxu0 %v6891_v39  ;;  %v3270_v51 = vadd.f32 %v3269_v42, %v2972_v49  ;;  %v3359_v13 = vadd.f32 %v3358_v63, %v2980_v25 }
 0xe2d   :  { %6894 = vmatpush3.bf16.xpose.msra.mxu0 %v6891_v39  ;;  %v3272_v27 = vadd.f32 %v3271_v15, %v2976_v60  ;;  %v3361_v23 = vadd.f32 %v3360_v6, %v2984_v1 }
 0xe2f   :  { %v3275_v32 = vpop.f32.mrb[62].mxu0  ;;  %v3364_v19 = vpop.f32.mrb[62].mxu1 }
 0xe30   :  { %v3276_v29 = vadd.f32 %v3275_v32, %v2972_v49  ;;  %v3365_v16 = vadd.f32 %v3364_v19, %v2980_v25  ;;  %v3277_v18 = vpop.f32.mrb[63].mxu0  ;;  %v3366_v58 = vpop.f32.mrb[63].mxu1  ;;  %v3098_v49 = vadd.f32 %v3097_v48, %v8193_v61  ;;  %v2950_v25 = vld [vmem:[%s8491_s8 + $0x8] sm:$0xf] }
 0xe31   :  { %v3278_v26 = vadd.f32 %v3277_v18, %v2976_v60  ;;  %v3367_v10 = vadd.f32 %v3366_v58, %v2984_v1  ;;  %v2996_v38 = vrot.slane %v2950_v25, %v7894_v52  ;;  %v2992_v22 = vrot.slane %v2950_v25, %v7868_v41 }
 0xe32   :  { %v6895_v24 = vpack.c.bf16 %v3276_v29, %v3270_v51  ;;  %v8240_v45 = vpack.c.bf16 %v3365_v16, %v3359_v13  ;;  %v3000_v60 = vrot.slane %v2950_v25, %v7898_v47  ;;  %v2988_v8 = vrot.slane %v2950_v25, %v7818_v55 }
 0xe33   :  { %v8242_v11 = vpack.c.bf16 %v3278_v26, %v3272_v27  ;;  %v8244_v57 = vpack.c.bf16 %v3367_v10, %v3361_v23 }
 0xe34   :  { %6196 = vmatmul.mubr.f32.vlgmr.msra.gmra.mrb[72].mxu0 %v3086_v34  ;;  %6896 = vmatprep.subr.bf16.mxu1 %v6895_v24 }
 0xe35   :  { %6898 = vmatpush3.bf16.xpose.msra.mxu1 %v6895_v24 }
 0xe3c   :  { %6203 = vmatmul.mubr.f32.vlgmr.msra.gmra.mrb[72].mxu1 %v3098_v49 }
 0xe43   :  { %v3435_v1 = vpop.f32.mrb[64].mxu0  ;;  %v3524_v33 = vpop.f32.mrb[64].mxu1 }
 0xe44   :  { %v3525_v62 = vadd.f32 %v3524_v33, %v2996_v38  ;;  %v3437_v17 = vpop.f32.mrb[65].mxu0  ;;  %v3526_v59 = vpop.f32.mrb[65].mxu1  ;;  %v3436_v36 = vadd.f32 %v3435_v1, %v2988_v8 }
 0xe45   :  { %v3438_v2 = vadd.f32 %v3437_v17, %v2992_v22  ;;  %v3527_v61 = vadd.f32 %v3526_v59, %v3000_v60 }
 0xe47   :  { %v3441_v48 = vpop.f32.mrb[66].mxu0  ;;  %v3530_v28 = vpop.f32.mrb[66].mxu1 }
 0xe48   :  { %v3442_v50 = vadd.f32 %v3441_v48, %v2988_v8  ;;  %v3531_v40 = vadd.f32 %v3530_v28, %v2996_v38  ;;  %v3443_v4 = vpop.f32.mrb[67].mxu0  ;;  %v3532_v14 = vpop.f32.mrb[67].mxu1 }
 0xe49   :  { %v3444_v39 = vadd.f32 %v3443_v4, %v2992_v22  ;;  %v3533_v42 = vadd.f32 %v3532_v14, %v3000_v60 }
 0xe4a   :  { %v6899_v63 = vpack.c.bf16 %v3442_v50, %v3436_v36  ;;  %v8254_v15 = vpack.c.bf16 %v3531_v40, %v3525_v62 }
 0xe4b   :  { %v8256_v6 = vpack.c.bf16 %v3444_v39, %v3438_v2  ;;  %v8258_v55 = vpack.c.bf16 %v3533_v42, %v3527_v61  ;;  %v3447_v32 = vpop.f32.mrb[68].mxu0  ;;  %v3536_v19 = vpop.f32.mrb[68].mxu1 }
 0xe4c   :  { %v3537_v51 = vadd.f32 %v3536_v19, %v2996_v38  ;;  %v3449_v13 = vpop.f32.mrb[69].mxu0  ;;  %v3538_v29 = vpop.f32.mrb[69].mxu1  ;;  %6900 = vmatprep.subr.bf16.mxu0 %v6899_v63  ;;  %v3448_v23 = vadd.f32 %v3447_v32, %v2988_v8 }
 0xe4d   :  { %v3450_v16 = vadd.f32 %v3449_v13, %v2992_v22  ;;  %v3539_v18 = vadd.f32 %v3538_v29, %v3000_v60  ;;  %6902 = vmatpush3.bf16.msra.mxu0 %v6899_v63 }
 0xe4e   :  { %6908 = vmatprep.subr.bf16.mxu0 %v8235_v3 }
 0xe4f   :  { %v3453_v58 = vpop.f32.mrb[70].mxu0  ;;  %v3542_v27 = vpop.f32.mrb[70].mxu1 }
 0xe50   :  { %v3454_v26 = vadd.f32 %v3453_v58, %v2988_v8  ;;  %v3543_v10 = vadd.f32 %v3542_v27, %v2996_v38  ;;  %v3455_v34 = vpop.f32.mrb[71].mxu0  ;;  %v3544_v24 = vpop.f32.mrb[71].mxu1 }
 0xe51   :  { %v3456_v49 = vadd.f32 %v3455_v34, %v2992_v22  ;;  %v3545_v25 = vadd.f32 %v3544_v24, %v3000_v60 }
 0xe52   :  { %v6903_v1 = vpack.c.bf16 %v3454_v26, %v3448_v23  ;;  %v8261_v33 = vpack.c.bf16 %v3543_v10, %v3537_v51 }
 0xe53   :  { %v8263_v62 = vpack.c.bf16 %v3456_v49, %v3450_v16  ;;  %v8265_v17 = vpack.c.bf16 %v3545_v25, %v3539_v18 }
 0xe54   :  { %6904 = vmatprep.subr.bf16.mxu1 %v6903_v1 }
 0xe55   :  { %6906 = vmatpush3.bf16.msra.mxu1 %v6903_v1 }
 0xe56   :  { %6912 = vmatprep.subr.bf16.mxu1 %v8242_v11 }
 0xf07   :  { %v6197_v59 = vpop.f32.mrb[72].mxu0 }
 0xf08   :  { %v3698_v2 = vmul.f32 0.088388346, %v6197_v59  ;;  %v3613_v61 = vpop.f32.mrb[73].mxu0 }
 0xf09   :  { %v3697_v8 = vmul.f32 0.088388346, %v3613_v61 }
 0xf0a   :  { %v3702_v38 = vsel %vm7916_vm2, %v3698_v2, -1e+09 }
 0xf0b   :  { %v3708_v22 = vsel %vm1150_vm1, %v3702_v38, -inf  ;;  %v3701_v60 = vsel %vm7912_vm0, %v3697_v8, -1e+09 }
 0xf0c   :  { %3709 = vmax.xlane.f32.xlu1 %v3708_v22  ;;  %v3705_v48 = vsel %vm1150_vm1, %v3701_v60, -inf }
 0xf0d   :  { %3706 = vmax.xlane.f32.xlu0 %v3705_v48  ;;  %v2960_v48 = vrot.slane %v8189_v9, %v7868_v41 }
 0xf0f   :  { %v6204_v28 = vpop.f32.mrb[72].mxu1 }
 0xf10   :  { %v3700_v36 = vmul.f32 0.088388346, %v6204_v28  ;;  %v3688_v50 = vpop.f32.mrb[73].mxu1 }
 0xf11   :  { %v3699_v40 = vmul.f32 0.088388346, %v3688_v50 }
 0xf12   :  { %v3704_v4 = vsel %vm7916_vm2, %v3700_v36, -1e+09 }
 0xf13   :  { %v3714_v14 = vsel %vm1150_vm1, %v3704_v4, -inf  ;;  %v3703_v39 = vsel %vm7912_vm0, %v3699_v40, -1e+09  ;;  %v3082_v40 = vadd.f32 %v8198_v44, %v2960_v48  ;;  %v3100_v44 = vadd.f32 %v8217_v46, %v2960_v48 }
 0xf14   :  { %3715 = vmax.xlane.f32.xlu1 %v3714_v14  ;;  %v3711_v42 = vsel %vm1150_vm1, %v3703_v39, -inf }
 0xf15   :  { %3712 = vmax.xlane.f32.xlu0 %v3711_v42  ;;  %v3088_v42 = vadd.f32 %v8204_v35, %v2960_v48 }
 0xf99   :  { %v3710_v63 = vpop.xlane.xlu1 %3709 }
 0xf9a   :  { %v3718_v32 = vsub.f32 %v3702_v38, %v3710_v63  ;;  %v3707_v19 = vpop.xlane.xlu0 %3706  ;;  %v3094_v63 = vadd.f32 %v8211_v21, %v2960_v48 }
 0xf9b   :  { %v3717_v51 = vsub.f32 %v3701_v60, %v3707_v19 }
 0xf9c   :  { %v3723_v13 = vmul.f32 1.442695, %v3718_v32 }
 0xf9d   :  { %v3721_v29 = vmul.f32 1.442695, %v3717_v51 }
 0xf9e   :  { %7170 = vpow2.f32 %v3723_v13 }
 0xf9f   :  { %7172 = vpow2.f32 %v3721_v29 }
 0xfa1   :  { %v3716_v16 = vpop.xlane.xlu1 %3715 }
 0xfa2   :  { %v3720_v18 = vsub.f32 %v3704_v4, %v3716_v16  ;;  %v3713_v58 = vpop.xlane.xlu0 %3712 }
 0xfa3   :  { %v3719_v27 = vsub.f32 %v3703_v39, %v3713_v58 }
 0xfa4   :  { %v3727_v23 = vmul.f32 1.442695, %v3720_v18 }
 0xfa5   :  { %v3725_v26 = vmul.f32 1.442695, %v3719_v27 }
 0xfa6   :  { %7174 = vpow2.f32 %v3727_v23 }
 0xfa7   :  { %7176 = vpow2.f32 %v3725_v26 }
 0xfa8   :  { %v7171_v10 = vpop.eup %7170 }
 0xfa9   :  { %v7173_v34 = vpop.eup %7172  ;;  %v3732_v24 = vsel %vm1150_vm1, %v7171_v10, 0.0 }
 0xfaa   :  { %3733 = vadd.xlane.f32.xlu1 %v3732_v24  ;;  %v3729_v49 = vsel %vm1150_vm1, %v7173_v34, 0.0 }
 0xfab   :  { %3730 = vadd.xlane.f32.xlu0 %v3729_v49 }
 0xfb0   :  { %v7175_v25 = vpop.eup %7174 }
 0xfb1   :  { %v7177_v1 = vpop.eup %7176  ;;  %v3738_v59 = vsel %vm1150_vm1, %v7175_v25, 0.0 }
 0xfb2   :  { %3739 = vadd.xlane.f32.xlu1 %v3738_v59  ;;  %v3735_v2 = vsel %vm1150_vm1, %v7177_v1, 0.0 }
 0xfb3   :  { %3736 = vadd.xlane.f32.xlu0 %v3735_v2 }
0x1037   :  { %v3734_v61 = vpop.xlane.xlu1 %3733 }
0x1038   :  { %7178 = vrcp.f32 %v3734_v61  ;;  %v3731_v8 = vpop.xlane.xlu0 %3730 }
0x1039   :  { %7180 = vrcp.f32 %v3731_v8 }
0x103f   :  { %v3740_v38 = vpop.xlane.xlu1 %3739 }
0x1040   :  { %7182 = vrcp.f32 %v3740_v38  ;;  %v3737_v22 = vpop.xlane.xlu0 %3736 }
0x1041   :  { %7184 = vrcp.f32 %v3737_v22 }
0x1042   :  { %v7179_v60 = vpop.eup %7178 }
0x1043   :  { %v7181_v28 = vpop.eup %7180  ;;  %v3744_v50 = vmul.f32 %v7179_v60, %v7171_v10 }
0x1044   :  { %v3742_v36 = vmul.f32 %v7181_v28, %v7173_v34 }
0x1046   :  { %6209 = vmatprep.mubr.msk.f32.mxu0 %vm1150_vm1, %v3742_v36 }
0x1047   :  { %6210 = vmatmul.mubr.msk.f32.vlgmr.msra.gmra.mrb[74].mxu0 %vm1150_vm1, %v3744_v50 }
0x1048   :  { %6910 = vmatpush3.bf16.xpose.msra.mxu0 %v8235_v3  ;;  %6223 = vmatprep.mubr.f32.mxu0 %v3082_v40 }
0x1049   :  { %6916 = vmatprep.subr.bf16.mxu0 %v8256_v6 }
0x104a   :  { %v7183_v4 = vpop.eup %7182 }
0x104b   :  { %v7185_v14 = vpop.eup %7184  ;;  %v3748_v41 = vmul.f32 %v7183_v4, %v7175_v25 }
0x104c   :  { %v3746_v39 = vmul.f32 %v7185_v14, %v7177_v1 }
0x104e   :  { %6216 = vmatprep.mubr.msk.f32.mxu1 %vm1150_vm1, %v3746_v39 }
0x104f   :  { %6224 = vmatmul.mubr.f32.vlgmr.msra.gmra.mrb[76].mxu0 %v3088_v42  ;;  %6217 = vmatmul.mubr.msk.f32.vlgmr.msra.gmra.mrb[74].mxu1 %vm1150_vm1, %v3748_v41 }
0x1050   :  { %6914 = vmatpush3.bf16.xpose.msra.mxu1 %v8242_v11  ;;  %6918 = vmatpush3.bf16.msra.mxu0 %v8256_v6 }
0x1051   :  { %6230 = vmatprep.mubr.f32.mxu1 %v3094_v63  ;;  %6920 = vmatprep.subr.bf16.mxu1 %v8263_v62 }
0x1052   :  { %6924 = vmatprep.subr.bf16.mxu0 %v8233_v5 }
0x1057   :  { %6231 = vmatmul.mubr.f32.vlgmr.msra.gmra.mrb[76].mxu1 %v3100_v44 }
0x1058   :  { %6922 = vmatpush3.bf16.msra.mxu1 %v8263_v62 }
0x1059   :  { %6928 = vmatprep.subr.bf16.mxu1 %v8240_v45 }
0x111a   :  { %v8302_v35 = vpop.f32.mrb[74].mxu0 }
0x111b   :  { %v8304_v21 = vpop.f32.mrb[75].mxu0 }
0x1122   :  { %v6225_v3 = vpop.f32.mrb[76].mxu0  ;;  %v8306_v11 = vpop.f32.mrb[74].mxu1 }
0x1123   :  { %v4062_v6 = vmul.f32 0.088388346, %v6225_v3  ;;  %v3977_v32 = vpop.f32.mrb[77].mxu0  ;;  %v8308_v19 = vpop.f32.mrb[75].mxu1 }
0x1124   :  { %v4061_v51 = vmul.f32 0.088388346, %v3977_v32  ;;  %v2964_v32 = vrot.slane %v8189_v9, %v7894_v52 }
0x1125   :  { %v4066_v46 = vsel %vm7916_vm2, %v4062_v6, -1e+09 }
0x1126   :  { %v4072_v13 = vsel %vm1150_vm1, %v4066_v46, -inf  ;;  %v4065_v62 = vsel %vm7912_vm0, %v4061_v51, -1e+09 }
0x1127   :  { %4073 = vmax.xlane.f32.xlu1 %v4072_v13  ;;  %v4069_v29 = vsel %vm1150_vm1, %v4065_v62, -inf }
0x1128   :  { %4070 = vmax.xlane.f32.xlu0 %v4069_v29 }
0x112a   :  { %v6232_v16 = vpop.f32.mrb[76].mxu1 }
0x112b   :  { %v4064_v18 = vmul.f32 0.088388346, %v6232_v16  ;;  %v4052_v58 = vpop.f32.mrb[77].mxu1 }
0x112c   :  { %v4063_v27 = vmul.f32 0.088388346, %v4052_v58  ;;  %v3175_v58 = vadd.f32 %v8202_v12, %v2964_v32 }
0x112d   :  { %v4068_v23 = vsel %vm7916_vm2, %v4064_v18, -1e+09 }
0x112e   :  { %v4078_v26 = vsel %vm1150_vm1, %v4068_v23, -inf  ;;  %v4067_v10 = vsel %vm7912_vm0, %v4063_v27, -1e+09  ;;  %v3181_v27 = vadd.f32 %v8208_v56, %v2964_v32 }
0x112f   :  { %4079 = vmax.xlane.f32.xlu1 %v4078_v26  ;;  %v4075_v34 = vsel %vm1150_vm1, %v4067_v10, -inf }
0x1130   :  { %4076 = vmax.xlane.f32.xlu0 %v4075_v34 }
0x11b4   :  { %v4074_v24 = vpop.xlane.xlu1 %4073 }
0x11b5   :  { %v4082_v49 = vsub.f32 %v4066_v46, %v4074_v24  ;;  %v4071_v25 = vpop.xlane.xlu0 %4070 }
0x11b6   :  { %v4081_v1 = vsub.f32 %v4065_v62, %v4071_v25  ;;  %v3169_v62 = vadd.f32 %v8195_v30, %v2964_v32  ;;  %v3187_v30 = vadd.f32 %v8215_v43, %v2964_v32 }
0x11b7   :  { %v4087_v59 = vmul.f32 1.442695, %v4082_v49 }
0x11b8   :  { %v4085_v2 = vmul.f32 1.442695, %v4081_v1 }
0x11b9   :  { %7186 = vpow2.f32 %v4087_v59 }
0x11ba   :  { %7188 = vpow2.f32 %v4085_v2 }
0x11bc   :  { %v4080_v61 = vpop.xlane.xlu1 %4079 }
0x11bd   :  { %v4084_v8 = vsub.f32 %v4068_v23, %v4080_v61  ;;  %v4077_v38 = vpop.xlane.xlu0 %4076 }
0x11be   :  { %v4083_v22 = vsub.f32 %v4067_v10, %v4077_v38 }
0x11bf   :  { %v4091_v60 = vmul.f32 1.442695, %v4084_v8 }
0x11c0   :  { %v4089_v48 = vmul.f32 1.442695, %v4083_v22 }
0x11c1   :  { %7190 = vpow2.f32 %v4091_v60 }
0x11c2   :  { %7192 = vpow2.f32 %v4089_v48 }
0x11c3   :  { %v7187_v28 = vpop.eup %7186 }
0x11c4   :  { %v7189_v36 = vpop.eup %7188  ;;  %v4096_v50 = vsel %vm1150_vm1, %v7187_v28, 0.0 }
0x11c5   :  { %4097 = vadd.xlane.f32.xlu1 %v4096_v50  ;;  %v4093_v40 = vsel %vm1150_vm1, %v7189_v36, 0.0 }
0x11c6   :  { %4094 = vadd.xlane.f32.xlu0 %v4093_v40 }
0x11cb   :  { %v7191_v4 = vpop.eup %7190 }
0x11cc   :  { %v7193_v14 = vpop.eup %7192  ;;  %v4102_v39 = vsel %vm1150_vm1, %v7191_v4, 0.0 }
0x11cd   :  { %4103 = vadd.xlane.f32.xlu1 %v4102_v39  ;;  %v4099_v42 = vsel %vm1150_vm1, %v7193_v14, 0.0 }
0x11ce   :  { %4100 = vadd.xlane.f32.xlu0 %v4099_v42 }
0x1252   :  { %v4098_v41 = vpop.xlane.xlu1 %4097 }
0x1253   :  { %7194 = vrcp.f32 %v4098_v41  ;;  %v4095_v63 = vpop.xlane.xlu0 %4094 }
0x1254   :  { %7196 = vrcp.f32 %v4095_v63 }
0x125a   :  { %v4104_v44 = vpop.xlane.xlu1 %4103 }
0x125b   :  { %7198 = vrcp.f32 %v4104_v44  ;;  %v4101_v3 = vpop.xlane.xlu0 %4100 }
0x125c   :  { %7200 = vrcp.f32 %v4101_v3 }
0x125d   :  { %v7195_v6 = vpop.eup %7194 }
0x125e   :  { %v7197_v51 = vpop.eup %7196  ;;  %v4108_v13 = vmul.f32 %v7195_v6, %v7187_v28 }
0x125f   :  { %v4106_v46 = vmul.f32 %v7197_v51, %v7189_v36 }
0x1261   :  { %6237 = vmatprep.mubr.msk.f32.mxu0 %vm1150_vm1, %v4106_v46 }
0x1262   :  { %6238 = vmatmul.mubr.msk.f32.vlgmr.msra.gmra.mrb[78].mxu0 %vm1150_vm1, %v4108_v13 }
0x1263   :  { %6926 = vmatpush3.bf16.xpose.msra.mxu0 %v8233_v5  ;;  %6251 = vmatprep.mubr.f32.mxu0 %v3169_v62 }
0x1264   :  { %6932 = vmatprep.subr.bf16.mxu0 %v8254_v15 }
0x1265   :  { %v7199_v29 = vpop.eup %7198 }
0x1266   :  { %v7201_v16 = vpop.eup %7200  ;;  %v4112_v52 = vmul.f32 %v7199_v29, %v7191_v4 }
0x1267   :  { %v4110_v18 = vmul.f32 %v7201_v16, %v7193_v14 }
0x1269   :  { %6244 = vmatprep.mubr.msk.f32.mxu1 %vm1150_vm1, %v4110_v18 }
0x126a   :  { %6252 = vmatmul.mubr.f32.vlgmr.msra.gmra.mrb[80].mxu0 %v3175_v58  ;;  %6245 = vmatmul.mubr.msk.f32.vlgmr.msra.gmra.mrb[78].mxu1 %vm1150_vm1, %v4112_v52  ;;  %v2968_v52 = vrot.slane %v8189_v9, %v7898_v47 }
0x126b   :  { %6930 = vmatpush3.bf16.xpose.msra.mxu1 %v8240_v45  ;;  %6934 = vmatpush3.bf16.msra.mxu0 %v8254_v15 }
0x126c   :  { %6258 = vmatprep.mubr.f32.mxu1 %v3181_v27  ;;  %6936 = vmatprep.subr.bf16.mxu1 %v8261_v33  ;;  %v3183_v9 = vadd.f32 %v8213_v53, %v2968_v52 }
0x126d   :  { %6940 = vmatprep.subr.bf16.mxu0 %v8237_v54 }
0x1272   :  { %6259 = vmatmul.mubr.f32.vlgmr.msra.gmra.mrb[80].mxu1 %v3187_v30 }
0x1273   :  { %6938 = vmatpush3.bf16.msra.mxu1 %v8261_v33 }
0x1274   :  { %6944 = vmatprep.subr.bf16.mxu1 %v8244_v57 }
0x1335   :  { %v8344_v12 = vpop.f32.mrb[78].mxu0 }
0x1336   :  { %v8346_v56 = vpop.f32.mrb[79].mxu0 }
0x133d   :  { %v6253_v5 = vpop.f32.mrb[80].mxu0  ;;  %v8348_v45 = vpop.f32.mrb[78].mxu1 }
0x133e   :  { %v4426_v15 = vmul.f32 0.088388346, %v6253_v5  ;;  %v4341_v23 = vpop.f32.mrb[81].mxu0  ;;  %v8350_v26 = vpop.f32.mrb[79].mxu1 }
0x133f   :  { %v4425_v10 = vmul.f32 0.088388346, %v4341_v23 }
0x1340   :  { %v4430_v43 = vsel %vm7916_vm2, %v4426_v15, -1e+09  ;;  %v3171_v15 = vadd.f32 %v8200_v0, %v2968_v52  ;;  %v3189_v0 = vadd.f32 %v8219_v7, %v2968_v52 }
0x1341   :  { %v4436_v34 = vsel %vm1150_vm1, %v4430_v43, -inf  ;;  %v4429_v33 = vsel %vm7912_vm0, %v4425_v10, -1e+09 }
0x1342   :  { %4437 = vmax.xlane.f32.xlu1 %v4436_v34  ;;  %v4433_v24 = vsel %vm1150_vm1, %v4429_v33, -inf  ;;  %v3177_v34 = vadd.f32 %v8206_v20, %v2968_v52  ;;  %v5052_v52 = vld [vmem:[#allocation11 + $0x188] sm:$0xff] }
0x1343   :  { %4434 = vmax.xlane.f32.xlu0 %v4433_v24 }
0x1345   :  { %v6260_v49 = vpop.f32.mrb[80].mxu1 }
0x1346   :  { %v4428_v25 = vmul.f32 0.088388346, %v6260_v49  ;;  %v4416_v1 = vpop.f32.mrb[81].mxu1 }
0x1347   :  { %v4427_v59 = vmul.f32 0.088388346, %v4416_v1 }
0x1348   :  { %v4432_v2 = vsel %vm7916_vm2, %v4428_v25, -1e+09 }
0x1349   :  { %v4442_v61 = vsel %vm1150_vm1, %v4432_v2, -inf  ;;  %v4431_v8 = vsel %vm7912_vm0, %v4427_v59, -1e+09 }
0x134a   :  { %4443 = vmax.xlane.f32.xlu1 %v4442_v61  ;;  %v4439_v38 = vsel %vm1150_vm1, %v4431_v8, -inf }
0x134b   :  { %4440 = vmax.xlane.f32.xlu0 %v4439_v38 }
0x13cf   :  { %v4438_v22 = vpop.xlane.xlu1 %4437 }
0x13d0   :  { %v4446_v60 = vsub.f32 %v4430_v43, %v4438_v22  ;;  %v4435_v48 = vpop.xlane.xlu0 %4434 }
0x13d1   :  { %v4445_v28 = vsub.f32 %v4429_v33, %v4435_v48 }
0x13d2   :  { %v4451_v36 = vmul.f32 1.442695, %v4446_v60 }
0x13d3   :  { %v4449_v50 = vmul.f32 1.442695, %v4445_v28 }
0x13d4   :  { %7202 = vpow2.f32 %v4451_v36 }
0x13d5   :  { %7204 = vpow2.f32 %v4449_v50 }
0x13d7   :  { %v4444_v40 = vpop.xlane.xlu1 %4443 }
0x13d8   :  { %v4448_v4 = vsub.f32 %v4432_v2, %v4444_v40  ;;  %v4441_v14 = vpop.xlane.xlu0 %4440 }
0x13d9   :  { %v4447_v39 = vsub.f32 %v4431_v8, %v4441_v14 }
0x13da   :  { %v4455_v42 = vmul.f32 1.442695, %v4448_v4 }
0x13db   :  { %v4453_v41 = vmul.f32 1.442695, %v4447_v39 }
0x13dc   :  { %7206 = vpow2.f32 %v4455_v42 }
0x13dd   :  { %7208 = vpow2.f32 %v4453_v41 }
0x13de   :  { %v7203_v63 = vpop.eup %7202 }
0x13df   :  { %v7205_v44 = vpop.eup %7204  ;;  %v4460_v3 = vsel %vm1150_vm1, %v7203_v63, 0.0 }
0x13e0   :  { %4461 = vadd.xlane.f32.xlu1 %v4460_v3  ;;  %v4457_v6 = vsel %vm1150_vm1, %v7205_v44, 0.0 }
0x13e1   :  { %4458 = vadd.xlane.f32.xlu0 %v4457_v6 }
0x13e6   :  { %v7207_v32 = vpop.eup %7206 }
0x13e7   :  { %v7209_v51 = vpop.eup %7208  ;;  %v4466_v46 = vsel %vm1150_vm1, %v7207_v32, 0.0 }
0x13e8   :  { %4467 = vadd.xlane.f32.xlu1 %v4466_v46  ;;  %v4463_v13 = vsel %vm1150_vm1, %v7209_v51, 0.0 }
0x13e9   :  { %4464 = vadd.xlane.f32.xlu0 %v4463_v13 }
0x146d   :  { %v4462_v62 = vpop.xlane.xlu1 %4461 }
0x146e   :  { %7210 = vrcp.f32 %v4462_v62  ;;  %v4459_v29 = vpop.xlane.xlu0 %4458 }
0x146f   :  { %7212 = vrcp.f32 %v4459_v29  ;;  %v5019_v29 = vld [vmem:[#allocation11 + $0x80] sm:$0xff] }
0x1475   :  { %v4468_v16 = vpop.xlane.xlu1 %4467 }
0x1476   :  { %7214 = vrcp.f32 %v4468_v16  ;;  %v4465_v18 = vpop.xlane.xlu0 %4464  ;;  %v5020_v16 = vld [vmem:[#allocation11 + $0x88] sm:$0xff] }
0x1477   :  { %7216 = vrcp.f32 %v4465_v18  ;;  %v6955_v18 = vpack.c.bf16 %v5020_v16, %v5019_v29  ;;  %v5012_v29 = vld [vmem:[#allocation11 + $0x48] sm:$0xff] }
0x1478   :  { %v7211_v58 = vpop.eup %7210 }
0x1479   :  { %v7213_v27 = vpop.eup %7212  ;;  %v4472_v5 = vmul.f32 %v7211_v58, %v7203_v63  ;;  %v5051_v58 = vld [vmem:[#allocation11 + $0x180] sm:$0xff] }
0x147a   :  { %v4470_v30 = vmul.f32 %v7213_v27, %v7205_v44  ;;  %v6987_v27 = vpack.c.bf16 %v5052_v52, %v5051_v58  ;;  %v5039_v52 = vld [vmem:[#allocation11 + $0x120] sm:$0xff] }
0x147c   :  { %6265 = vmatprep.mubr.msk.f32.mxu0 %vm1150_vm1, %v4470_v30 }
0x147d   :  { %6266 = vmatmul.mubr.msk.f32.vlgmr.msra.gmra.mrb[82].mxu0 %vm1150_vm1, %v4472_v5 }
0x147e   :  { %6942 = vmatpush3.bf16.xpose.msra.mxu0 %v8237_v54  ;;  %6279 = vmatprep.mubr.f32.mxu0 %v3171_v15 }
0x147f   :  { %6948 = vmatprep.subr.bf16.mxu0 %v8258_v55 }
0x1480   :  { %v7215_v23 = vpop.eup %7214 }
0x1481   :  { %v7217_v10 = vpop.eup %7216  ;;  %v4476_v47 = vmul.f32 %v7215_v23, %v7207_v32 }
0x1482   :  { %v4474_v43 = vmul.f32 %v7217_v10, %v7209_v51  ;;  %v5003_v10 = vld [vmem:[#allocation11] sm:$0xff] }
0x1484   :  { %6272 = vmatprep.mubr.msk.f32.mxu1 %vm1150_vm1, %v4474_v43  ;;  %v5004_v43 = vld [vmem:[#allocation11 + $0x8] sm:$0xff] }
0x1485   :  { %6280 = vmatmul.mubr.f32.vlgmr.msra.gmra.mrb[84].mxu0 %v3177_v34  ;;  %6273 = vmatmul.mubr.msk.f32.vlgmr.msra.gmra.mrb[82].mxu1 %vm1150_vm1, %v4476_v47  ;;  %v5021_v47 = vld [vmem:[#allocation11 + $0x90] sm:$0xff] }
0x1486   :  { %6946 = vmatpush3.bf16.xpose.msra.mxu1 %v8244_v57  ;;  %6950 = vmatpush3.bf16.msra.mxu0 %v8258_v55 }
0x1487   :  { %6286 = vmatprep.mubr.f32.mxu1 %v3183_v9  ;;  %6952 = vmatprep.subr.bf16.mxu1 %v8265_v17  ;;  %v5022_v9 = vld [vmem:[#allocation11 + $0x98] sm:$0xff] }
0x1488   :  { %6956 = vmatprep.subr.bf16.mxu0 %v6955_v18  ;;  %v5029_v18 = vld [vmem:[#allocation11 + $0xd0] sm:$0xff] }
0x148d   :  { %6287 = vmatmul.mubr.f32.vlgmr.msra.gmra.mrb[84].mxu1 %v3189_v0 }
0x148e   :  { %6954 = vmatpush3.bf16.msra.mxu1 %v8265_v17 }
0x148f   :  { %6988 = vmatprep.subr.bf16.mxu1 %v6987_v27  ;;  %v5040_v27 = vld [vmem:[#allocation11 + $0x128] sm:$0xff] }
0x1550   :  { %v8384_v20 = vpop.f32.mrb[82].mxu0 }
0x1551   :  { %v8386_v54 = vpop.f32.mrb[83].mxu0 }
0x1558   :  { %v6281_v53 = vpop.f32.mrb[84].mxu0  ;;  %v8388_v33 = vpop.f32.mrb[82].mxu1 }
0x1559   :  { %v4790_v24 = vmul.f32 0.088388346, %v6281_v53  ;;  %v4705_v49 = vpop.f32.mrb[85].mxu0  ;;  %v8390_v57 = vpop.f32.mrb[83].mxu1 }
0x155a   :  { %v4789_v55 = vmul.f32 0.088388346, %v4705_v49 }
0x155b   :  { %v4794_v25 = vsel %vm7916_vm2, %v4790_v24, -1e+09  ;;  %v6957_v24 = vpack.c.bf16 %v5004_v43, %v5003_v10  ;;  %v5013_v10 = vld [vmem:[#allocation11 + $0x50] sm:$0xff]  ;;  %v5014_v43 = vld [vmem:[#allocation11 + $0x58] sm:$0xff] }
0x155c   :  { %v4800_v7 = vsel %vm1150_vm1, %v4794_v25, -inf  ;;  %v4793_v17 = vsel %vm7912_vm0, %v4789_v55, -1e+09  ;;  %v6959_v55 = vpack.c.bf16 %v5022_v9, %v5021_v47  ;;  %v5031_v9 = vld [vmem:[#allocation11 + $0xe0] sm:$0xff] }
0x155d   :  { %4801 = vmax.xlane.f32.xlu1 %v4800_v7  ;;  %v4797_v1 = vsel %vm1150_vm1, %v4793_v17, -inf  ;;  %v5006_v7 = vld [vmem:[#allocation11 + $0x18] sm:$0xff] }
0x155e   :  { %4798 = vmax.xlane.f32.xlu0 %v4797_v1  ;;  %v5024_v1 = vld [vmem:[#allocation11 + $0xa8] sm:$0xff] }
0x1560   :  { %v6288_v59 = vpop.f32.mrb[84].mxu1 }
0x1561   :  { %v4792_v2 = vmul.f32 0.088388346, %v6288_v59  ;;  %v4780_v61 = vpop.f32.mrb[85].mxu1 }
0x1562   :  { %v4791_v8 = vmul.f32 0.088388346, %v4780_v61  ;;  %v5008_v61 = vld [vmem:[#allocation11 + $0x28] sm:$0xff] }
0x1563   :  { %v4796_v38 = vsel %vm7916_vm2, %v4792_v2, -1e+09  ;;  %v5007_v2 = vld [vmem:[#allocation11 + $0x20] sm:$0xff] }
0x1564   :  { %v4806_v22 = vsel %vm1150_vm1, %v4796_v38, -inf  ;;  %v4795_v60 = vsel %vm7912_vm0, %v4791_v8, -1e+09 }
0x1565   :  { %4807 = vmax.xlane.f32.xlu1 %v4806_v22  ;;  %v4803_v48 = vsel %vm1150_vm1, %v4795_v60, -inf  ;;  %v5035_v22 = vld [vmem:[#allocation11 + $0x100] sm:$0xff] }
0x1566   :  { %4804 = vmax.xlane.f32.xlu0 %v4803_v48 }
0x15ea   :  { %v4802_v28 = vpop.xlane.xlu1 %4801 }
0x15eb   :  { %v4810_v36 = vsub.f32 %v4794_v25, %v4802_v28  ;;  %v4799_v50 = vpop.xlane.xlu0 %4798  ;;  %v5005_v25 = vld [vmem:[#allocation11 + $0x10] sm:$0xff]  ;;  %v5026_v28 = vld [vmem:[#allocation11 + $0xb8] sm:$0xff] }
0x15ec   :  { %v4809_v40 = vsub.f32 %v4793_v17, %v4799_v50  ;;  %v5023_v17 = vld [vmem:[#allocation11 + $0xa0] sm:$0xff]  ;;  %v6961_v59 = vpack.c.bf16 %v5006_v7, %v5005_v25  ;;  %v5054_v50 = vld [vmem:[#allocation11 + $0x198] sm:$0xff]  ;;  %v5060_v25 = vld [vmem:[#allocation11 + $0x1c8] sm:$0xff]  ;;  %v6977_v7 = vpack.c.bf16 %v5014_v43, %v5013_v10 }
0x15ed   :  { %v4815_v4 = vmul.f32 1.442695, %v4810_v36  ;;  %v6963_v8 = vpack.c.bf16 %v5024_v1, %v5023_v17  ;;  %v5053_v36 = vld [vmem:[#allocation11 + $0x190] sm:$0xff]  ;;  %v5015_v17 = vld [vmem:[#allocation11 + $0x60] sm:$0xff]  ;;  %v5016_v1 = vld [vmem:[#allocation11 + $0x68] sm:$0xff] }
0x15ee   :  { %v4813_v14 = vmul.f32 1.442695, %v4809_v40 }
0x15ef   :  { %7218 = vpow2.f32 %v4815_v4 }
0x15f0   :  { %7220 = vpow2.f32 %v4813_v14  ;;  %v6965_v14 = vpack.c.bf16 %v5008_v61, %v5007_v2  ;;  %v5033_v61 = vld [vmem:[#allocation11 + $0xf0] sm:$0xff] }
0x15f2   :  { %v4808_v39 = vpop.xlane.xlu1 %4807 }
0x15f3   :  { %v4812_v37 = vsub.f32 %v4796_v38, %v4808_v39  ;;  %v4805_v42 = vpop.xlane.xlu0 %4804  ;;  %v5025_v38 = vld [vmem:[#allocation11 + $0xb0] sm:$0xff] }
0x15f4   :  { %v4811_v41 = vsub.f32 %v4795_v60, %v4805_v42  ;;  %v5036_v60 = vld [vmem:[#allocation11 + $0x108] sm:$0xff]  ;;  %v5009_v39 = vld [vmem:[#allocation11 + $0x30] sm:$0xff] }
0x15f5   :  { %v4819_v63 = vmul.f32 1.442695, %v4812_v37  ;;  %v5010_v37 = vld [vmem:[#allocation11 + $0x38] sm:$0xff]  ;;  %v6989_v42 = vpack.c.bf16 %v5036_v60, %v5035_v22  ;;  %v5044_v22 = vld [vmem:[#allocation11 + $0x148] sm:$0xff] }
0x15f6   :  { %v4817_v44 = vmul.f32 1.442695, %v4811_v41  ;;  %v6967_v41 = vpack.c.bf16 %v5026_v28, %v5025_v38  ;;  %v5043_v38 = vld [vmem:[#allocation11 + $0x140] sm:$0xff]  ;;  %v5034_v60 = vld [vmem:[#allocation11 + $0xf8] sm:$0xff] }
0x15f7   :  { %7222 = vpow2.f32 %v4819_v63  ;;  %v5027_v63 = vld [vmem:[#allocation11 + $0xc0] sm:$0xff]  ;;  %v5062_v28 = vld [vmem:[#allocation11 + $0x1d8] sm:$0xff] }
0x15f8   :  { %7224 = vpow2.f32 %v4817_v44  ;;  %v6991_v44 = vpack.c.bf16 %v5054_v50, %v5053_v36  ;;  %v6981_v36 = vpack.c.bf16 %v5016_v1, %v5015_v17  ;;  %v5017_v50 = vld [vmem:[#allocation11 + $0x70] sm:$0xff] }
0x15f9   :  { %v7219_v31 = vpop.eup %7218 }
0x15fa   :  { %v7221_v3 = vpop.eup %7220  ;;  %v4824_v6 = vsel %vm1150_vm1, %v7219_v31, 0.0 }
0x15fb   :  { %4825 = vadd.xlane.f32.xlu1 %v4824_v6  ;;  %v4821_v32 = vsel %vm1150_vm1, %v7221_v3, 0.0  ;;  %v5028_v6 = vld [vmem:[#allocation11 + $0xc8] sm:$0xff] }
0x15fc   :  { %4822 = vadd.xlane.f32.xlu0 %v4821_v32  ;;  %v5055_v32 = vld [vmem:[#allocation11 + $0x1a0] sm:$0xff] }
0x1601   :  { %v7223_v51 = vpop.eup %7222 }
0x1602   :  { %v7225_v46 = vpop.eup %7224  ;;  %v4830_v13 = vsel %vm1150_vm1, %v7223_v51, 0.0 }
0x1603   :  { %4831 = vadd.xlane.f32.xlu1 %v4830_v13  ;;  %v4827_v62 = vsel %vm1150_vm1, %v7225_v46, 0.0  ;;  %v5056_v13 = vld [vmem:[#allocation11 + $0x1a8] sm:$0xff] }
0x1604   :  { %4828 = vadd.xlane.f32.xlu0 %v4827_v62  ;;  %v5011_v62 = vld [vmem:[#allocation11 + $0x40] sm:$0xff]  ;;  %v6995_v58 = vpack.c.bf16 %v5056_v13, %v5055_v32  ;;  %v5065_v32 = vld [vmem:[#allocation11 + $0x1f0] sm:$0xff]  ;;  %v5066_v13 = vld [vmem:[#allocation11 + $0x1f8] sm:$0xff] }
0x1688   :  { %v4826_v30 = vpop.xlane.xlu1 %4825 }
0x1689   :  { %7226 = vrcp.f32 %v4826_v30  ;;  %v4823_v5 = vpop.xlane.xlu0 %4822  ;;  %v5030_v30 = vld [vmem:[#allocation11 + $0xd8] sm:$0xff] }
0x168a   :  { %7228 = vrcp.f32 %v4823_v5  ;;  %v5057_v5 = vld [vmem:[#allocation11 + $0x1b0] sm:$0xff]  ;;  %v6975_v47 = vpack.c.bf16 %v5030_v30, %v5029_v18 }
0x1690   :  { %v4832_v15 = vpop.xlane.xlu1 %4831 }
0x1691   :  { %7230 = vrcp.f32 %v4832_v15  ;;  %v4829_v23 = vpop.xlane.xlu0 %4828  ;;  %v5058_v15 = vld [vmem:[#allocation11 + $0x1b8] sm:$0xff] }
0x1692   :  { %7232 = vrcp.f32 %v4829_v23  ;;  %v6973_v23 = vpack.c.bf16 %v5012_v29, %v5011_v62  ;;  %v7015_v62 = vpack.c.bf16 %v5066_v13, %v5065_v32  ;;  %v5049_v29 = vld [vmem:[#allocation11 + $0x170] sm:$0xff] }
0x1693   :  { %v7227_v34 = vpop.eup %7226 }
0x1694   :  { %v7229_v0 = vpop.eup %7228  ;;  %v4836_v49 = vmul.f32 %v7227_v34, %v7219_v31  ;;  %v5037_v31 = vld [vmem:[#allocation11 + $0x110] sm:$0xff]  ;;  %v6997_v34 = vpack.c.bf16 %v5040_v27, %v5039_v52 }
0x1695   :  { %v4834_v53 = vmul.f32 %v7229_v0, %v7221_v3  ;;  %v5038_v3 = vld [vmem:[#allocation11 + $0x118] sm:$0xff]  ;;  %v6999_v0 = vpack.c.bf16 %v5058_v15, %v5057_v5 }
0x1696   :  { %v6993_v16 = vpack.c.bf16 %v5038_v3, %v5037_v31  ;;  %v5047_v3 = vld [vmem:[#allocation11 + $0x160] sm:$0xff] }
0x1697   :  { %6293 = vmatprep.mubr.msk.f32.mxu0 %vm1150_vm1, %v4834_v53  ;;  %v5041_v53 = vld [vmem:[#allocation11 + $0x130] sm:$0xff] }
0x1698   :  { %6294 = vmatmul.mubr.msk.f32.vlgmr.msra.gmra.mrb[86].mxu0 %vm1150_vm1, %v4836_v49  ;;  %v5032_v49 = vld [vmem:[#allocation11 + $0xe8] sm:$0xff] }
0x1699   :  { %6958 = vmatpush3.bf16.msra.mxu0 %v6957_v24  ;;  %5138 = vmatprep.mubr.f32.mxu0 %v8346_v56  ;;  %v5042_v24 = vld [vmem:[#allocation11 + $0x138] sm:$0xff]  ;;  %v6979_v2 = vpack.c.bf16 %v5032_v49, %v5031_v9 }
0x169a   :  { %6960 = vmatprep.subr.bf16.mxu0 %v6959_v55  ;;  %v5059_v55 = vld [vmem:[#allocation11 + $0x1c0] sm:$0xff] }
0x169b   :  { %v7231_v48 = vpop.eup %7230 }
0x169c   :  { %v7233_v40 = vpop.eup %7232  ;;  %v4840_v56 = vmul.f32 %v7231_v48, %v7223_v51  ;;  %v6971_v51 = vpack.c.bf16 %v5028_v6, %v5027_v63  ;;  %v5061_v48 = vld [vmem:[#allocation11 + $0x1d0] sm:$0xff]  ;;  %v5048_v6 = vld [vmem:[#allocation11 + $0x168] sm:$0xff] }
0x169d   :  { %6962 = vmatpush3.bf16.msra.mxu0 %v6961_v59  ;;  %v4838_v4 = vmul.f32 %v7233_v40, %v7225_v46  ;;  %v6969_v46 = vpack.c.bf16 %v5010_v37, %v5009_v39  ;;  %v7001_v59 = vpack.c.bf16 %v5042_v24, %v5041_v53  ;;  %v7005_v40 = vpack.c.bf16 %v5044_v22, %v5043_v38  ;;  %v5045_v37 = vld [vmem:[#allocation11 + $0x150] sm:$0xff]  ;;  %v5310_v38 = vld [vmem:[#allocation14] sm:$0xff] }
0x169e   :  { %6964 = vmatprep.subr.bf16.mxu0 %v6963_v8  ;;  %v7003_v8 = vpack.c.bf16 %v5060_v25, %v5059_v55  ;;  %v7007_v39 = vpack.c.bf16 %v5062_v28, %v5061_v48  ;;  %v5311_v22 = vld [vmem:[#allocation14 + $0x8] sm:$0xff]  ;;  %v5313_v28 = vld [vmem:[#allocation14 + $0x18] sm:$0xff] }
0x169f   :  { %6300 = vmatprep.mubr.msk.f32.mxu1 %vm1150_vm1, %v4838_v4  ;;  %v6983_v4 = vpack.c.bf16 %v5034_v60, %v5033_v61  ;;  %v5312_v60 = vld [vmem:[#allocation14 + $0x10] sm:$0xff]  ;;  %v7019_v48 = vpack.c.bf16 %v5311_v22, %v5310_v38 }
0x16a0   :  { %6301 = vmatmul.mubr.msk.f32.vlgmr.msra.gmra.mrb[86].mxu1 %vm1150_vm1, %v4840_v56  ;;  %v5063_v56 = vld [vmem:[#allocation11 + $0x1e0] sm:$0xff] }
0x16a1   :  { %6966 = vmatpush3.bf16.msra.mxu0 %v6965_v14  ;;  %6990 = vmatpush3.bf16.msra.mxu1 %v6989_v42  ;;  %v5018_v14 = vld [vmem:[#allocation11 + $0x78] sm:$0xff] }
0x16a2   :  { %6968 = vmatprep.subr.bf16.mxu0 %v6967_v41  ;;  %6992 = vmatprep.subr.bf16.mxu1 %v6991_v44  ;;  %v5046_v42 = vld [vmem:[#allocation11 + $0x158] sm:$0xff]  ;;  %v5064_v41 = vld [vmem:[#allocation11 + $0x1e8] sm:$0xff]  ;;  %v6985_v63 = vpack.c.bf16 %v5018_v14, %v5017_v50 }
0x16a3   :  { %v7009_v44 = vpack.c.bf16 %v5046_v42, %v5045_v37  ;;  %v7011_v31 = vpack.c.bf16 %v5064_v41, %v5063_v56 }
0x16a5   :  { %6970 = vmatpush3.bf16.msra.mxu0 %v6969_v46  ;;  %6994 = vmatpush3.bf16.msra.mxu1 %v6993_v16  ;;  %v7013_v46 = vpack.c.bf16 %v5048_v6, %v5047_v3  ;;  %v5050_v16 = vld [vmem:[#allocation11 + $0x178] sm:$0xff] }
0x16a6   :  { %6972 = vmatprep.subr.bf16.mxu0 %v6971_v51  ;;  %6996 = vmatprep.subr.bf16.mxu1 %v6995_v58  ;;  %v7017_v51 = vpack.c.bf16 %v5050_v16, %v5049_v29  ;;  %v5316_v16 = vld [vmem:[#allocation14 + $0x30] sm:$0xff] }
0x16a9   :  { %6974 = vmatpush3.bf16.msra.mxu0 %v6973_v23  ;;  %6998 = vmatpush3.bf16.msra.mxu1 %v6997_v34  ;;  %v5726_v23 = vld [vmem:[%s8493_s10] ss:$0 sm:$0xff] }
0x16aa   :  { %6976 = vmatprep.subr.bf16.mxu0 %v6975_v47  ;;  %7000 = vmatprep.subr.bf16.mxu1 %v6999_v0 }
0x16ad   :  { %6978 = vmatpush3.bf16.msra.mxu0 %v6977_v7  ;;  %7002 = vmatpush3.bf16.msra.mxu1 %v7001_v59 }
0x16ae   :  { %6980 = vmatprep.subr.bf16.mxu0 %v6979_v2  ;;  %7004 = vmatprep.subr.bf16.mxu1 %v7003_v8 }
0x16b1   :  { %6982 = vmatpush3.bf16.msra.mxu0 %v6981_v36  ;;  %7006 = vmatpush3.bf16.msra.mxu1 %v7005_v40  ;;  %v7023_v36 = vpack.c.bf16 %v5313_v28, %v5312_v60 }
0x16b2   :  { %6984 = vmatprep.subr.bf16.mxu0 %v6983_v4  ;;  %7008 = vmatprep.subr.bf16.mxu1 %v7007_v39 }
0x16b5   :  { %6986 = vmatpush3.bf16.msra.mxu0 %v6985_v63  ;;  %7010 = vmatpush3.bf16.msra.mxu1 %v7009_v44 }
0x16b6   :  { %7012 = vmatprep.subr.bf16.mxu1 %v7011_v31  ;;  %7020 = vmatprep.subr.bf16.mxu0 %v7019_v48 }
0x16b8   :  { %5139 = vmatmul.mubr.f32.vlgmr.msra.gmra.mrb[88].mxu0 %v8304_v21 }
0x16b9   :  { %5143 = vmatprep.mubr.f32.mxu0 %v8344_v12  ;;  %7014 = vmatpush3.bf16.msra.mxu1 %v7013_v46  ;;  %v5314_v46 = vld [vmem:[#allocation14 + $0x20] sm:$0xff] }
0x16ba   :  { %7016 = vmatprep.subr.bf16.mxu1 %v7015_v62  ;;  %7022 = vmatpush3.bf16.msra.mxu0 %v7019_v48  ;;  %v5315_v62 = vld [vmem:[#allocation14 + $0x28] sm:$0xff] }
0x16bb   :  { %7024 = vmatprep.subr.bf16.mxu0 %v7023_v36  ;;  %v7027_v29 = vpack.c.bf16 %v5315_v62, %v5314_v46  ;;  %v5491_v62 = vld [vmem:[#allocation16 + $0x18] sm:$0xff] }
0x16bc   :  { %5144 = vmatmul.mubr.f32.gmra.mrb[90].mxu0 %v8302_v35 }
0x16bd   :  { %5148 = vmatprep.mubr.f32.mxu0 %v8350_v26  ;;  %7018 = vmatpush3.bf16.msra.mxu1 %v7017_v51  ;;  %v5317_v51 = vld [vmem:[#allocation14 + $0x38] sm:$0xff] }
0x16be   :  { %7026 = vmatpush3.bf16.msra.mxu0 %v7023_v36 }
0x16bf   :  { %7028 = vmatprep.subr.bf16.mxu0 %v7027_v29 }
0x16c0   :  { %5149 = vmatmul.mubr.f32.gmra.mrb[92].mxu0 %v8308_v19 }
0x16c1   :  { %5153 = vmatprep.mubr.f32.mxu0 %v8348_v45 }
0x16c2   :  { %7030 = vmatpush3.bf16.msra.mxu0 %v7027_v29 }
0x16c4   :  { %5154 = vmatmul.mubr.f32.gmra.mrb[94].mxu0 %v8306_v11 }
0x176b   :  { %v6295_v18 = vpop.f32.mrb[86].mxu0 }
0x176c   :  { %v4913_v21 = vpop.f32.mrb[87].mxu0 }
0x176d   :  { %5223 = vmatprep.mubr.f32.mxu1 %v4913_v21  ;;  %v5318_v21 = vld [vmem:[#allocation14 + $0x40] sm:$0xff] }
0x176e   :  { %5224 = vmatmul.mubr.f32.vlgmr.msra.gmra.mrb[88].mxu1 %v8386_v54 }
0x176f   :  { %5228 = vmatprep.mubr.f32.mxu1 %v6295_v18  ;;  %v7031_v18 = vpack.c.bf16 %v5317_v51, %v5316_v16  ;;  %v5492_v16 = vld [vmem:[#allocation16 + $0x20] sm:$0xff]  ;;  %v5493_v51 = vld [vmem:[#allocation16 + $0x28] sm:$0xff] }
0x1771   :  { %7032 = vmatprep.subr.bf16.mxu0 %v7031_v18 }
0x1772   :  { %5229 = vmatmul.mubr.f32.gmra.mrb[90].mxu1 %v8384_v20  ;;  %7034 = vmatpush3.bf16.msra.mxu0 %v7031_v18  ;;  %v7059_v18 = vpack.c.bf16 %v5493_v51, %v5492_v16  ;;  %v5732_v16 = vld [vmem:[%s8501_s18] ss:$0 sm:$0xff] }
0x1773   :  { %v6302_v35 = vpop.f32.mrb[86].mxu1 }
0x1774   :  { %v4994_v12 = vpop.f32.mrb[87].mxu1 }
0x1775   :  { %5233 = vmatprep.mubr.f32.mxu1 %v4994_v12 }
0x1776   :  { %5234 = vmatmul.mubr.f32.gmra.mrb[92].mxu1 %v8390_v57 }
0x1777   :  { %5238 = vmatprep.mubr.f32.mxu1 %v6302_v35  ;;  %v5319_v35 = vld [vmem:[#allocation14 + $0x48] sm:$0xff] }
0x1778   :  { %v7035_v12 = vpack.c.bf16 %v5319_v35, %v5318_v21 }
0x177a   :  { %5239 = vmatmul.mubr.f32.gmra.mrb[94].mxu1 %v8388_v33  ;;  %7036 = vmatprep.subr.bf16.mxu0 %v7035_v12 }
0x177b   :  { %7038 = vmatpush3.bf16.msra.mxu0 %v7035_v12 }
0x178b   :  { %v5983_v11 = vpop.f32.mrb[88].mxu0 }
0x178c   :  { %v5984_v19 = vpop.f32.mrb[89].mxu0 }
0x178d   :  { %v5985_v45 = vadd.f32 %v5984_v19, %v5983_v11  ;;  %v5320_v11 = vld [vmem:[#allocation14 + $0x50] sm:$0xff]  ;;  %v5321_v19 = vld [vmem:[#allocation14 + $0x58] sm:$0xff] }
0x178f   :  { %v5986_v26 = vpop.f32.mrb[90].mxu0  ;;  %v5141_v43 = vadd.f32 %v5985_v45, %v5726_v23  ;;  %v7039_v45 = vpack.c.bf16 %v5321_v19, %v5320_v11 }
0x1790   :  { %v5987_v58 = vpop.f32.mrb[91].mxu0 }
0x1791   :  { %v5988_v52 = vadd.f32 %v5987_v58, %v5986_v26  ;;  %7040 = vmatprep.subr.bf16.mxu0 %v7039_v45  ;;  %v5322_v26 = vld [vmem:[#allocation14 + $0x60] sm:$0xff]  ;;  %v5323_v58 = vld [vmem:[#allocation14 + $0x68] sm:$0xff] }
0x1792   :  { %7042 = vmatpush3.bf16.msra.mxu0 %v7039_v45 }
0x1793   :  { %v5989_v27 = vpop.f32.mrb[92].mxu0  ;;  %v5146_v0 = vadd.f32 %v5988_v52, %v5726_v23  ;;  %v7043_v52 = vpack.c.bf16 %v5323_v58, %v5322_v26 }
0x1794   :  { %v5990_v30 = vpop.f32.mrb[93].mxu0 }
0x1795   :  { %v5991_v54 = vadd.f32 %v5990_v30, %v5989_v27  ;;  %7044 = vmatprep.subr.bf16.mxu0 %v7043_v52  ;;  %v5324_v27 = vld [vmem:[#allocation14 + $0x70] sm:$0xff]  ;;  %v5325_v30 = vld [vmem:[#allocation14 + $0x78] sm:$0xff] }
0x1796   :  { %7046 = vmatpush3.bf16.msra.mxu0 %v7043_v52 }
0x1797   :  { %v5992_v5 = vpop.f32.mrb[94].mxu0  ;;  %v5151_v25 = vadd.f32 %v5991_v54, %v5726_v23  ;;  %v7047_v54 = vpack.c.bf16 %v5325_v30, %v5324_v27 }
0x1798   :  { %v5993_v15 = vpop.f32.mrb[95].mxu0 }
0x1799   :  { %v5994_v20 = vadd.f32 %v5993_v15, %v5992_v5  ;;  %7048 = vmatprep.subr.bf16.mxu0 %v7047_v54 }
0x179a   :  { %7050 = vmatpush3.bf16.msra.mxu0 %v7047_v54 }
0x179b   :  { %v5156_v2 = vadd.f32 %v5994_v20, %v5726_v23 }
0x1841   :  { %v6027_v57 = vpop.f32.mrb[88].mxu1 }
0x1842   :  { %v6028_v10 = vpop.f32.mrb[89].mxu1 }
0x1843   :  { %v6029_v33 = vadd.f32 %v6028_v10, %v6027_v57 }
0x1845   :  { %v6030_v34 = vpop.f32.mrb[90].mxu1  ;;  %v5226_v47 = vadd.f32 %v6029_v33, %v5141_v43 }
0x1846   :  { %v6031_v9 = vpop.f32.mrb[91].mxu1 }
0x1847   :  { %v6032_v53 = vadd.f32 %v6031_v9, %v6030_v34  ;;  %5244 = vadd.xlane.f32.xlu0 %v5226_v47 }
0x1849   :  { %v6033_v24 = vpop.f32.mrb[92].mxu1  ;;  %v5231_v49 = vadd.f32 %v6032_v53, %v5146_v0 }
0x184a   :  { %v6034_v55 = vpop.f32.mrb[93].mxu1 }
0x184b   :  { %v6035_v7 = vadd.f32 %v6034_v55, %v6033_v24  ;;  %5246 = vadd.xlane.f32.xlu1 %v5231_v49  ;;  %v5727_v24 = vld [vmem:[%s8494_s11] ss:$0 sm:$0xff]  ;;  %v5728_v55 = vld [vmem:[#allocation13] ss:$0 sm:$0xff] }
0x184d   :  { %v6036_v17 = vpop.f32.mrb[94].mxu1  ;;  %v5236_v1 = vadd.f32 %v6035_v7, %v5151_v25 }
0x184e   :  { %v6037_v59 = vpop.f32.mrb[95].mxu1 }
0x184f   :  { %v6038_v61 = vadd.f32 %v6037_v59, %v6036_v17  ;;  %5248 = vadd.xlane.f32.xlu0 %v5236_v1 }
0x1851   :  { %v5241_v8 = vadd.f32 %v6038_v61, %v5156_v2 }
0x1853   :  { %5250 = vadd.xlane.f32.xlu1 %v5241_v8 }
0x18d4   :  { %v5245_v50 = vpop.xlane.xlu0 %5244 }
0x18d5   :  { %v5252_v40 = vmul.f32 0.0078125, %v5245_v50  ;;  %v5729_v50 = vld [vmem:[%s8497_s14] ss:$0 sm:$0xff] }
0x18d7   :  { %v8427_v4 = vsub.f32 %v5226_v47, %v5252_v40 }
0x18d8   :  { %v5247_v14 = vpop.xlane.xlu1 %5246 }
0x18d9   :  { %v5253_v39 = vmul.f32 0.0078125, %v5247_v14  ;;  %v5260_v37 = vmul.f32 %v8427_v4, %v8427_v4 }
0x18db   :  { %v8431_v42 = vsub.f32 %v5231_v49, %v5253_v39  ;;  %5264 = vadd.xlane.f32.xlu0 %v5260_v37 }
0x18dc   :  { %v5249_v56 = vpop.xlane.xlu0 %5248 }
0x18dd   :  { %v5254_v41 = vmul.f32 0.0078125, %v5249_v56  ;;  %v5261_v63 = vmul.f32 %v8431_v42, %v8431_v42 }
0x18df   :  { %v8435_v44 = vsub.f32 %v5236_v1, %v5254_v41  ;;  %5266 = vadd.xlane.f32.xlu1 %v5261_v63 }
0x18e0   :  { %v5251_v31 = vpop.xlane.xlu1 %5250 }
0x18e1   :  { %v5255_v3 = vmul.f32 0.0078125, %v5251_v31  ;;  %v5262_v6 = vmul.f32 %v8435_v44, %v8435_v44 }
0x18e3   :  { %v8439_v32 = vsub.f32 %v5241_v8, %v5255_v3  ;;  %5268 = vadd.xlane.f32.xlu0 %v5262_v6  ;;  %v5488_v6 = vld [vmem:[#allocation16] sm:$0xff] }
0x18e5   :  { %v5263_v13 = vmul.f32 %v8439_v32, %v8439_v32 }
0x18e7   :  { %5270 = vadd.xlane.f32.xlu1 %v5263_v13  ;;  %v5490_v13 = vld [vmem:[#allocation16 + $0x10] sm:$0xff] }
0x18e8   :  { %v7055_v29 = vpack.c.bf16 %v5491_v62, %v5490_v13 }
0x1968   :  { %v5265_v5 = vpop.xlane.xlu0 %5264 }
0x1969   :  { %v5272_v15 = vmul.f32 0.0078125, %v5265_v5 }
0x196b   :  { %v5276_v20 = vadd.f32 1e-05, %v5272_v15 }
0x196c   :  { %v5267_v23 = vpop.xlane.xlu1 %5266 }
0x196d   :  { %7234 = vrsqrt.f32 %v5276_v20  ;;  %v5273_v57 = vmul.f32 0.0078125, %v5267_v23 }
0x196f   :  { %v5277_v10 = vadd.f32 1e-05, %v5273_v57  ;;  %v5494_v57 = vld [vmem:[#allocation16 + $0x30] sm:$0xff] }
0x1970   :  { %v5269_v43 = vpop.xlane.xlu0 %5268 }
0x1971   :  { %7236 = vrsqrt.f32 %v5277_v10  ;;  %v5274_v33 = vmul.f32 0.0078125, %v5269_v43  ;;  %v5495_v10 = vld [vmem:[#allocation16 + $0x38] sm:$0xff] }
0x1972   :  { %v7063_v43 = vpack.c.bf16 %v5495_v10, %v5494_v57 }
0x1973   :  { %v5278_v34 = vadd.f32 1e-05, %v5274_v33  ;;  %v5496_v33 = vld [vmem:[#allocation16 + $0x40] sm:$0xff] }
0x1974   :  { %v5271_v47 = vpop.xlane.xlu1 %5270 }
0x1975   :  { %7238 = vrsqrt.f32 %v5278_v34  ;;  %v5275_v9 = vmul.f32 0.0078125, %v5271_v47  ;;  %v5497_v34 = vld [vmem:[#allocation16 + $0x48] sm:$0xff] }
0x1976   :  { %v7067_v47 = vpack.c.bf16 %v5497_v34, %v5496_v33 }
0x1977   :  { %v7235_v0 = vpop.eup %7234  ;;  %v5279_v53 = vadd.f32 1e-05, %v5275_v9  ;;  %v5498_v9 = vld [vmem:[#allocation16 + $0x50] sm:$0xff] }
0x1978   :  { %v5284_v49 = vmul.f32 %v7235_v0, %v8427_v4  ;;  %v5499_v0 = vld [vmem:[#allocation16 + $0x58] sm:$0xff] }
0x1979   :  { %7240 = vrsqrt.f32 %v5279_v53  ;;  %v7071_v53 = vpack.c.bf16 %v5499_v0, %v5498_v9 }
0x197a   :  { %v5295_v25 = vmul.f32 %v5727_v24, %v5284_v49  ;;  %v5501_v49 = vld [vmem:[#allocation16 + $0x68] sm:$0xff] }
0x197b   :  { %v7237_v7 = vpop.eup %7236 }
0x197c   :  { %v5285_v17 = vmul.f32 %v7237_v7, %v8431_v42  ;;  %v5306_v1 = vadd.f32 %v5728_v55, %v5295_v25  ;;  %v5502_v25 = vld [vmem:[#allocation16 + $0x70] sm:$0xff]  ;;  %v5503_v7 = vld [vmem:[#allocation16 + $0x78] sm:$0xff] }
0x197e   :  { %6335 = vmatprep.mubr.f32.mxu0 %v5306_v1  ;;  %v5296_v59 = vmul.f32 %v5727_v24, %v5285_v17  ;;  %v7079_v17 = vpack.c.bf16 %v5503_v7, %v5502_v25 }
0x197f   :  { %v7239_v2 = vpop.eup %7238 }
0x1980   :  { %v5307_v61 = vadd.f32 %v5728_v55, %v5296_v59  ;;  %v5286_v8 = vmul.f32 %v7239_v2, %v8435_v44 }
0x1982   :  { %6336 = vmatmul.mubr.f32.vlgmr.msra.gmra.mrb[96].mxu0 %v5307_v61  ;;  %v5297_v38 = vmul.f32 %v5727_v24, %v5286_v8 }
0x1983   :  { %v7241_v22 = vpop.eup %7240 }
0x1984   :  { %v5308_v60 = vadd.f32 %v5728_v55, %v5297_v38  ;;  %v5287_v48 = vmul.f32 %v7241_v22, %v8439_v32  ;;  %v5489_v32 = vld [vmem:[#allocation16 + $0x8] sm:$0xff] }
0x1985   :  { %v7051_v46 = vpack.c.bf16 %v5489_v32, %v5488_v6 }
0x1986   :  { %6338 = vmatprep.mubr.f32.mxu0 %v5308_v60  ;;  %v5298_v28 = vmul.f32 %v5727_v24, %v5287_v48  ;;  %v5500_v24 = vld [vmem:[#allocation16 + $0x60] sm:$0xff] }
0x1987   :  { %7052 = vmatprep.subr.bf16.mxu1 %v7051_v46 }
0x1988   :  { %v5309_v36 = vadd.f32 %v5728_v55, %v5298_v28  ;;  %7054 = vmatpush3.bf16.msra.mxu1 %v7051_v46  ;;  %v7075_v55 = vpack.c.bf16 %v5501_v49, %v5500_v24 }
0x1989   :  { %7056 = vmatprep.subr.bf16.mxu1 %v7055_v29 }
0x198a   :  { %6339 = vmatmul.mubr.f32.gmra.mrb[98].mxu0 %v5309_v36 }
0x198c   :  { %7058 = vmatpush3.bf16.msra.mxu1 %v7055_v29 }
0x198d   :  { %7060 = vmatprep.subr.bf16.mxu1 %v7059_v18 }
0x1990   :  { %7062 = vmatpush3.bf16.msra.mxu1 %v7059_v18 }
0x1991   :  { %7064 = vmatprep.subr.bf16.mxu1 %v7063_v43 }
0x1994   :  { %7066 = vmatpush3.bf16.msra.mxu1 %v7063_v43 }
0x1995   :  { %7068 = vmatprep.subr.bf16.mxu1 %v7067_v47 }
0x1998   :  { %7070 = vmatpush3.bf16.msra.mxu1 %v7067_v47 }
0x1999   :  { %7072 = vmatprep.subr.bf16.mxu1 %v7071_v53 }
0x199c   :  { %7074 = vmatpush3.bf16.msra.mxu1 %v7071_v53 }
0x199d   :  { %7076 = vmatprep.subr.bf16.mxu1 %v7075_v55 }
0x19a0   :  { %7078 = vmatpush3.bf16.msra.mxu1 %v7075_v55 }
0x19a1   :  { %7080 = vmatprep.subr.bf16.mxu1 %v7079_v17 }
0x19a4   :  { %7082 = vmatpush3.bf16.msra.mxu1 %v7079_v17 }
0x1a55   :  { %v6337_v40 = vpop.f32.mrb[96].mxu0 }
0x1a56   :  { %v5405_v4 = vadd.f32 %v6337_v40, %v5729_v50  ;;  %v5399_v14 = vpop.f32.mrb[97].mxu0 }
0x1a57   :  { %v5400_v39 = vadd.f32 %v5729_v50, %v5399_v14 }
0x1a58   :  { %v5419_v37 = vmax.f32 %v5405_v4, 0.0  ;;  %v5730_v4 = vld [vmem:[%s8498_s15] ss:$0 sm:$0xff] }
0x1a59   :  { %v5418_v42 = vmax.f32 %v5400_v39, 0.0 }
0x1a5a   :  { %5424 = vadd.xlane.f32.xlu1 %v5419_v37 }
0x1a5b   :  { %5422 = vadd.xlane.f32.xlu0 %v5418_v42 }
0x1a5d   :  { %v6340_v56 = vpop.f32.mrb[98].mxu0 }
0x1a5e   :  { %v5415_v41 = vadd.f32 %v6340_v56, %v5729_v50  ;;  %v5409_v63 = vpop.f32.mrb[99].mxu0 }
0x1a5f   :  { %v5410_v44 = vadd.f32 %v5729_v50, %v5409_v63 }
0x1a60   :  { %v5421_v31 = vmax.f32 %v5415_v41, 0.0 }
0x1a61   :  { %v5420_v3 = vmax.f32 %v5410_v44, 0.0 }
0x1a62   :  { %5428 = vadd.xlane.f32.xlu1 %v5421_v31 }
0x1a63   :  { %5426 = vadd.xlane.f32.xlu0 %v5420_v3 }
0x1ae7   :  { %v5425_v21 = vpop.xlane.xlu1 %5424 }
0x1ae8   :  { %v5431_v35 = vmul.f32 0.0078125, %v5425_v21  ;;  %v5423_v12 = vpop.xlane.xlu0 %5422 }
0x1ae9   :  { %v5430_v11 = vmul.f32 0.0078125, %v5423_v12 }
0x1aea   :  { %v5435_v19 = vsub.f32 %v5419_v37, %v5431_v35 }
0x1aeb   :  { %v5434_v45 = vsub.f32 %v5418_v42, %v5430_v11  ;;  %v5731_v42 = vld [vmem:[%s8499_s16] ss:$0 sm:$0xff] }
0x1aec   :  { %v5439_v26 = vmul.f32 %v5435_v19, %v5435_v19 }
0x1aed   :  { %v5438_v58 = vmul.f32 %v5434_v45, %v5434_v45 }
0x1aee   :  { %5444 = vadd.xlane.f32.xlu1 %v5439_v26 }
0x1aef   :  { %v5429_v52 = vpop.xlane.xlu1 %5428  ;;  %5442 = vadd.xlane.f32.xlu0 %v5438_v58 }
0x1af0   :  { %v5433_v27 = vmul.f32 0.0078125, %v5429_v52  ;;  %v5427_v30 = vpop.xlane.xlu0 %5426 }
0x1af1   :  { %v5432_v54 = vmul.f32 0.0078125, %v5427_v30 }
0x1af2   :  { %v5437_v5 = vsub.f32 %v5421_v31, %v5433_v27 }
0x1af3   :  { %v5436_v15 = vsub.f32 %v5420_v3, %v5432_v54 }
0x1af4   :  { %v5441_v20 = vmul.f32 %v5437_v5, %v5437_v5 }
0x1af5   :  { %v5440_v23 = vmul.f32 %v5436_v15, %v5436_v15 }
0x1af6   :  { %5448 = vadd.xlane.f32.xlu1 %v5441_v20 }
0x1af7   :  { %5446 = vadd.xlane.f32.xlu0 %v5440_v23 }
0x1b7b   :  { %v5445_v1 = vpop.xlane.xlu1 %5444 }
0x1b7c   :  { %v5451_v59 = vmul.f32 0.0078125, %v5445_v1  ;;  %v5443_v2 = vpop.xlane.xlu0 %5442 }
0x1b7d   :  { %v5450_v61 = vmul.f32 0.0078125, %v5443_v2 }
0x1b7e   :  { %v5455_v8 = vadd.f32 1e-05, %v5451_v59 }
0x1b7f   :  { %v5454_v38 = vadd.f32 1e-05, %v5450_v61 }
0x1b80   :  { %7242 = vrsqrt.f32 %v5455_v8 }
0x1b81   :  { %7244 = vrsqrt.f32 %v5454_v38 }
0x1b83   :  { %v5449_v22 = vpop.xlane.xlu1 %5448 }
0x1b84   :  { %v5453_v60 = vmul.f32 0.0078125, %v5449_v22  ;;  %v5447_v48 = vpop.xlane.xlu0 %5446 }
0x1b85   :  { %v5452_v28 = vmul.f32 0.0078125, %v5447_v48  ;;  %v5733_v48 = vld [vmem:[%s8502_s19] ss:$0 sm:$0xff]  ;;  %s5675_s19 = sshll.u32 %s7504_s0, 4  ;;  %s5676_s19 = int_to_ptr.vmem [resolvable:$true] %s5675_s19 }
0x1b86   :  { %v5457_v36 = vadd.f32 1e-05, %v5453_v60  ;;  %p7461_p3 = scmp.lt.s32.totalorder %s5676_s19, %s5676_s19 }
0x1b87   :  { %v5456_v50 = vadd.f32 1e-05, %v5452_v28 }
0x1b88   :  { %7246 = vrsqrt.f32 %v5457_v36 }
0x1b89   :  { %7248 = vrsqrt.f32 %v5456_v50 }
0x1b8a   :  { %v7243_v40 = vpop.eup %7242 }
0x1b8b   :  { %v7245_v14 = vpop.eup %7244  ;;  %v5463_v39 = vmul.f32 %v7243_v40, %v5435_v19  ;;  %v5734_v40 = vld [vmem:[%s8503_s20] ss:$0 sm:$0xff]  ;;  %s7456_s20 = scalar_lea.vmem %s5676_s19, 512 }
0x1b8c   :  { %v5462_v37 = vmul.f32 %v7245_v14, %v5434_v45  ;;  %p7457_p2 = scmp.ne.s32.totalorder %s5676_s19, %s7456_s20  ;;  %p7462_p4 = scmp.lt.s32.totalorder %s7456_s20, %s7456_s20 }
0x1b8d   :  { %v5474_v56 = vmul.f32 %v5730_v4, %v5463_v39 }
0x1b8e   :  { %v5473_v41 = vmul.f32 %v5730_v4, %v5462_v37  ;;  %p7463_p5 = por %p7462_p4, %p7461_p3 }
0x1b8f   :  { %v5485_v44 = vadd.f32 %v5731_v42, %v5474_v56 }
0x1b90   :  { %v5484_v63 = vadd.f32 %v5731_v42, %v5473_v41  ;;  %p7464_p6 = pnand %p7463_p5, %p7457_p2 }
0x1b92   :  { %v7247_v31 = vpop.eup %7246  ;;  %6373 = vmatprep.mubr.f32.mxu1 %v5484_v63 }
0x1b93   :  { %v7249_v3 = vpop.eup %7248  ;;  %6374 = vmatmul.mubr.f32.vlgmr.msra.gmra.mrb[96].mxu1 %v5485_v44  ;;  %v5465_v6 = vmul.f32 %v7247_v31, %v5437_v5 }
0x1b94   :  { %v5464_v32 = vmul.f32 %v7249_v3, %v5436_v15 }
0x1b95   :  { %v5476_v13 = vmul.f32 %v5730_v4, %v5465_v6 }
0x1b96   :  { %v5475_v46 = vmul.f32 %v5730_v4, %v5464_v32 }
0x1b97   :  { %v5487_v29 = vadd.f32 %v5731_v42, %v5476_v13 }
0x1b98   :  { %v5486_v62 = vadd.f32 %v5731_v42, %v5475_v46 }
0x1b9a   :  { %6376 = vmatprep.mubr.f32.mxu1 %v5486_v62 }
0x1b9b   :  { %6377 = vmatmul.mubr.f32.gmra.mrb[98].mxu1 %v5487_v29 }
0x1c66   :  { %v6375_v51 = vpop.f32.mrb[96].mxu1 }
0x1c67   :  { %v5583_v18 = vadd.f32 %v6375_v51, %v5732_v16  ;;  %v5577_v21 = vpop.f32.mrb[97].mxu1 }
0x1c68   :  { %v5578_v35 = vadd.f32 %v5732_v16, %v5577_v21 }
0x1c69   :  { %v5597_v12 = vmax.f32 %v5583_v18, 0.0 }
0x1c6a   :  { %v5596_v11 = vmax.f32 %v5578_v35, 0.0 }
0x1c6b   :  { %5602 = vadd.xlane.f32.xlu1 %v5597_v12 }
0x1c6c   :  { %5600 = vadd.xlane.f32.xlu0 %v5596_v11 }
0x1c6e   :  { %v6378_v19 = vpop.f32.mrb[98].mxu1 }
0x1c6f   :  { %v5593_v45 = vadd.f32 %v6378_v19, %v5732_v16  ;;  %v5587_v26 = vpop.f32.mrb[99].mxu1 }
0x1c70   :  { %v5588_v58 = vadd.f32 %v5732_v16, %v5587_v26 }
0x1c71   :  { %v5599_v52 = vmax.f32 %v5593_v45, 0.0 }
0x1c72   :  { %v5598_v27 = vmax.f32 %v5588_v58, 0.0 }
0x1c73   :  { %5606 = vadd.xlane.f32.xlu1 %v5599_v52 }
0x1c74   :  { %5604 = vadd.xlane.f32.xlu0 %v5598_v27 }
0x1cf8   :  { %v5603_v30 = vpop.xlane.xlu1 %5602 }
0x1cf9   :  { %v5609_v54 = vmul.f32 0.0078125, %v5603_v30  ;;  %v5601_v5 = vpop.xlane.xlu0 %5600 }
0x1cfa   :  { %v5608_v15 = vmul.f32 0.0078125, %v5601_v5 }
0x1cfb   :  { %v5613_v20 = vsub.f32 %v5597_v12, %v5609_v54 }
0x1cfc   :  { %v5612_v23 = vsub.f32 %v5596_v11, %v5608_v15 }
0x1cfd   :  { %v5617_v57 = vmul.f32 %v5613_v20, %v5613_v20 }
0x1cfe   :  { %v5616_v10 = vmul.f32 %v5612_v23, %v5612_v23 }
0x1cff   :  { %5622 = vadd.xlane.f32.xlu1 %v5617_v57 }
0x1d00   :  { %v5607_v43 = vpop.xlane.xlu1 %5606  ;;  %5620 = vadd.xlane.f32.xlu0 %v5616_v10 }
0x1d01   :  { %v5611_v33 = vmul.f32 0.0078125, %v5607_v43  ;;  %v5605_v34 = vpop.xlane.xlu0 %5604 }
0x1d02   :  { %v5610_v47 = vmul.f32 0.0078125, %v5605_v34 }
0x1d03   :  { %v5615_v9 = vsub.f32 %v5599_v52, %v5611_v33 }
0x1d04   :  { %v5614_v0 = vsub.f32 %v5598_v27, %v5610_v47 }
0x1d05   :  { %v5619_v53 = vmul.f32 %v5615_v9, %v5615_v9 }
0x1d06   :  { %v5618_v24 = vmul.f32 %v5614_v0, %v5614_v0 }
0x1d07   :  { %5626 = vadd.xlane.f32.xlu1 %v5619_v53 }
0x1d08   :  { %5624 = vadd.xlane.f32.xlu0 %v5618_v24 }
0x1d8c   :  { %v5623_v49 = vpop.xlane.xlu1 %5622 }
0x1d8d   :  { %v5629_v55 = vmul.f32 0.0078125, %v5623_v49  ;;  %v5621_v25 = vpop.xlane.xlu0 %5620 }
0x1d8e   :  { %v5628_v7 = vmul.f32 0.0078125, %v5621_v25 }
0x1d8f   :  { %v5633_v17 = vadd.f32 1e-05, %v5629_v55 }
0x1d90   :  { %v5632_v1 = vadd.f32 1e-05, %v5628_v7 }
0x1d91   :  { %7250 = vrsqrt.f32 %v5633_v17 }
0x1d92   :  { %7252 = vrsqrt.f32 %v5632_v1 }
0x1d94   :  { %v5627_v59 = vpop.xlane.xlu1 %5626 }
0x1d95   :  { %v5631_v2 = vmul.f32 0.0078125, %v5627_v59  ;;  %v5625_v61 = vpop.xlane.xlu0 %5624 }
0x1d96   :  { %v5630_v8 = vmul.f32 0.0078125, %v5625_v61 }
0x1d97   :  { %v5635_v38 = vadd.f32 1e-05, %v5631_v2 }
0x1d98   :  { %v5634_v22 = vadd.f32 1e-05, %v5630_v8 }
0x1d99   :  { %7254 = vrsqrt.f32 %v5635_v38 }
0x1d9a   :  { %7256 = vrsqrt.f32 %v5634_v22 }
0x1d9b   :  { %v7251_v60 = vpop.eup %7250 }
0x1d9c   :  { %v7253_v28 = vpop.eup %7252  ;;  %v5641_v36 = vmul.f32 %v7251_v60, %v5613_v20 }
0x1d9d   :  { %v5640_v50 = vmul.f32 %v7253_v28, %v5612_v23 }
0x1d9e   :  { %v5652_v4 = vmul.f32 %v5733_v48, %v5641_v36 }
0x1d9f   :  { %v5651_v14 = vmul.f32 %v5733_v48, %v5640_v50 }
0x1da0   :  { %v5663_v39 = vadd.f32 %v5734_v40, %v5652_v4 }
0x1da1   :  { %v5662_v37 = vadd.f32 %v5734_v40, %v5651_v14 }
0x1da2   :  { %5667 = vst [vmem:[#allocation17 + $0x8] sm:$0xff] %v5663_v39 }
0x1da3   :  { %v7255_v42 = vpop.eup %7254  ;;  %5666 = vst [vmem:[#allocation17] sm:$0xff] %v5662_v37 }
0x1da4   :  { %v7257_v56 = vpop.eup %7256  ;;  %v5643_v41 = vmul.f32 %v7255_v42, %v5615_v9 }
0x1da5   :  { %v5642_v63 = vmul.f32 %v7257_v56, %v5614_v0 }
0x1da6   :  { %v5654_v44 = vmul.f32 %v5733_v48, %v5643_v41 }
0x1da7   :  { %v5653_v31 = vmul.f32 %v5733_v48, %v5642_v63 }
0x1da8   :  { %v5665_v3 = vadd.f32 %v5734_v40, %v5654_v44 }
0x1da9   :  { %v5664_v6 = vadd.f32 %v5734_v40, %v5653_v31 }
0x1daa   :  { %5669 = vst [vmem:[#allocation17 + $0x18] sm:$0xff] %v5665_v3 }
0x1dab   :  { %5668 = vst [vmem:[#allocation17 + $0x10] sm:$0xff] %v5664_v6 }
0x1dac   :  { %7467 = shalt.err (!%p7464_p6)
}
0x1dad   :  { %s8529_s23 = sld [smem:[#allocation30_spill]] }
0x1db3   :  { %s7468_s13 = scalar_lea.hbm %s8529_s23, 512 }
0x1db4   :  { %p7469_p7 = scmp.ne.s32.totalorder %s8529_s23, %s7468_s13  ;;  %p7472_p8 = scmp.lt.u32.totalorder %s7468_s13, %s8529_s23 }
0x1db6   :  { %p7474_p9 = pnand %p7472_p8, %p7469_p7 }
0x1db8   :  { %7477 = shalt.err (!%p7474_p9)
}
0x1db9   :  { %5681 = dma.vmem_to_hbm [thread:$0]  %s5676_s19, 512, %s8529_s23, [#allocation4], %s7496_s26, %s7496_s26, %s7497_s3  }
0x1dba   :  { %7488 = dma.done.wait [#allocation4], 512  }
0x1dbb   :  { %7489 = vsyncadd [#allocation4], 4294966784 }
0x1dbc   :  { %5685 = vsyncpa [#allocation3], 1 }
0x1dbd   :  { %5686 = vsyncpa [#allocation6], 1 }
0x1dbe   :  { %5687 = vsyncpa [#allocation9], 1 }
0x1dbf   :  { %5688 = vsyncpa [#allocation12], 1 }
0x1dc0   :  { %5689 = vsyncpa [#allocation15], 1 }
0x1dc1   :  { %5690 = vsyncpa [#allocation4], 1 }

</bundles_post_ra>
